<compile_context>
chip_gen: v7x
topology: tpu7x:2x2x1
jax: 0.10.0
libtpu: 0.0.40
codegen_flags: <defaults>
</compile_context>

<pallas_src>
import functools

import jax
import jax.numpy as jnp
from jax import lax
from jax.experimental import pallas as pl
from jax.experimental.pallas import tpu as pltpu

LANE = 128          # all feature dims zero-padded to a multiple of this
SUBLANE = 8
BN_EPS = 1e-5       # PyTorch BatchNorm1d default eps
MAX_ROW_TILE = 512  # row-tile cap: keeps per-call VMEM small even on v7x (64 MiB)


def _round_up(n, m):
    return ((n + m - 1) // m) * m


def _row_tile(m_true):
    return min(MAX_ROW_TILE, _round_up(m_true, LANE))


# ----------------------------------------------------------------------------
# Pallas kernels
# ----------------------------------------------------------------------------
def _msg_kernel(xj_ref, e_ref, wa_ref, wb_ref, b_ref, o_ref, *, e_true, tile_m):
    """n_msg = ReLU(x_j @ Wa + e @ Wb + b)  (concat eliminated by splitting W).
    Padded edge rows are zeroed so the downstream scatter adds nothing."""
    i = pl.program_id(0)
    y = jnp.dot(xj_ref[...], wa_ref[...], preferred_element_type=jnp.float32)
    y = y + jnp.dot(e_ref[...], wb_ref[...], preferred_element_type=jnp.float32)
    y = jnp.maximum(y + b_ref[...], 0.0)
    rows = lax.broadcasted_iota(jnp.int32, (tile_m, 1), 0) + i * tile_m
    y = jnp.where(rows < e_true, y, 0.0)
    o_ref[...] = y.astype(o_ref.dtype)


def _update_a_kernel(eps_ref, agg_ref, x_ref, w1_ref, b1_ref,
                     h_ref, stats_ref, *, m_true, tile_m):
    """z = agg + (1+eps)*x ;  h = z @ w1 + b1 ;  accumulate masked sum / sumsq of h."""
    i = pl.program_id(0)

    @pl.when(i == 0)
    def _():
        stats_ref[...] = jnp.zeros_like(stats_ref)

    eps = eps_ref[0]
    z = agg_ref[...].astype(jnp.float32) + (1.0 + eps) * x_ref[...].astype(jnp.float32)
    h = jnp.dot(z.astype(jnp.bfloat16), w1_ref[...],
                preferred_element_type=jnp.float32) + b1_ref[...]
    h_ref[...] = h

    rows = lax.broadcasted_iota(jnp.int32, (tile_m, 1), 0) + i * tile_m
    hm = jnp.where(rows < m_true, h, 0.0)           # exclude padded rows from BN stats
    stats_ref[0:1, :] = stats_ref[0:1, :] + jnp.sum(hm, axis=0, keepdims=True)
    stats_ref[1:2, :] = stats_ref[1:2, :] + jnp.sum(hm * hm, axis=0, keepdims=True)


def _update_b_kernel(h_ref, stats_ref, g_ref, be_ref, w2_ref, b2_ref,
                     h2_ref, stats2_ref, *, m_true, tile_m):
    """hn = ReLU(BN(h)) ;  h2 = hn @ w2 + b2 ;  accumulate masked sum / sumsq of h2."""
    i = pl.program_id(0)

    @pl.when(i == 0)
    def _():
        stats2_ref[...] = jnp.zeros_like(stats2_ref)

    inv_m = 1.0 / float(m_true)
    mean = stats_ref[0:1, :] * inv_m
    var = jnp.maximum(stats_ref[1:2, :] * inv_m - mean * mean, 0.0)
    hn = (h_ref[...] - mean) * (lax.rsqrt(var + BN_EPS) * g_ref[...]) + be_ref[...]
    hn = jnp.maximum(hn, 0.0)
    h2 = jnp.dot(hn.astype(jnp.bfloat16), w2_ref[...],
                 preferred_element_type=jnp.float32) + b2_ref[...]
    h2_ref[...] = h2

    rows = lax.broadcasted_iota(jnp.int32, (tile_m, 1), 0) + i * tile_m
    hm = jnp.where(rows < m_true, h2, 0.0)
    stats2_ref[0:1, :] = stats2_ref[0:1, :] + jnp.sum(hm, axis=0, keepdims=True)
    stats2_ref[1:2, :] = stats2_ref[1:2, :] + jnp.sum(hm * hm, axis=0, keepdims=True)


def _update_c_kernel(h2_ref, stats_ref, g_ref, be_ref, o_ref, *, m_true):
    """o = ReLU(BN(h2))."""
    inv_m = 1.0 / float(m_true)
    mean = stats_ref[0:1, :] * inv_m
    var = jnp.maximum(stats_ref[1:2, :] * inv_m - mean * mean, 0.0)
    hn = (h2_ref[...] - mean) * (lax.rsqrt(var + BN_EPS) * g_ref[...]) + be_ref[...]
    o_ref[...] = jnp.maximum(hn, 0.0).astype(o_ref.dtype)


def _readout_kernel(xn_ref, xe_ref, w1a_ref, b1a_ref, w1b_ref, b1b_ref,
                    w2a_ref, w2b_ref, b2_ref, o_ref):
    """Fused readout head: ReLU(lin1_node), ReLU(lin1_edge), split lin2 (no concat)."""
    h0 = jnp.dot(xn_ref[...].astype(jnp.bfloat16), w1a_ref[...],
                 preferred_element_type=jnp.float32) + b1a_ref[...]
    h0 = jnp.maximum(h0, 0.0)
    h1 = jnp.dot(xe_ref[...].astype(jnp.bfloat16), w1b_ref[...],
                 preferred_element_type=jnp.float32) + b1b_ref[...]
    h1 = jnp.maximum(h1, 0.0)
    y = jnp.dot(h0.astype(jnp.bfloat16), w2a_ref[...], preferred_element_type=jnp.float32)
    y = y + jnp.dot(h1.astype(jnp.bfloat16), w2b_ref[...], preferred_element_type=jnp.float32)
    o_ref[...] = y + b2_ref[...]


# ----------------------------------------------------------------------------
# pallas_call wrappers
# ----------------------------------------------------------------------------
def pallas_message_linear(x_j, e, wa, wb, b, *, e_true, tile_m):
    m_pad, d_in = x_j.shape
    d_out = wa.shape[1]
    grid = (m_pad // tile_m,)
    return pl.pallas_call(
        functools.partial(_msg_kernel, e_true=e_true, tile_m=tile_m),
        out_shape=jax.ShapeDtypeStruct((m_pad, d_out), jnp.bfloat16),
        grid_spec=pltpu.PrefetchScalarGridSpec(
            num_scalar_prefetch=0,
            grid=grid,
            in_specs=[
                pl.BlockSpec((tile_m, d_in), lambda i: (i, 0)),
                pl.BlockSpec((tile_m, d_in), lambda i: (i, 0)),
                pl.BlockSpec((d_in, d_out), lambda i: (0, 0)),   # resident weights
                pl.BlockSpec((d_in, d_out), lambda i: (0, 0)),
                pl.BlockSpec((1, d_out), lambda i: (0, 0)),
            ],
            out_specs=pl.BlockSpec((tile_m, d_out), lambda i: (i, 0)),
        ),
        compiler_params=pltpu.CompilerParams(dimension_semantics=("parallel",)),
    )(x_j, e, wa, wb, b)


def pallas_update_mlp(agg, x, eps, p, *, m_true, tile_m):
    """z = agg + (1+eps)*x ; ReLU(BN(z@w1+b1)) ; ReLU(BN(.@w2+b2))
    Two-pass BN: per-feature sum/sumsq are accumulated across row tiles (masked for
    padding) into a revisited (2, H) output block, then normalized in the next stage."""
    m_pad, d_in = x.shape
    h_p = p["w1"].shape[1]
    grid = (m_pad // tile_m,)

    def row_spec(d):
        return pl.BlockSpec((tile_m, d), lambda i: (i, 0))

    def const_spec(r, c):
        return pl.BlockSpec((r, c), lambda i: (0, 0))

    smem_eps = pl.BlockSpec(memory_space=pltpu.MemorySpace.SMEM)
    arb = pltpu.CompilerParams(dimension_semantics=("arbitrary",))

    h1, stats1 = pl.pallas_call(
        functools.partial(_update_a_kernel, m_true=m_true, tile_m=tile_m),
        out_shape=(jax.ShapeDtypeStruct((m_pad, h_p), jnp.float32),
                   jax.ShapeDtypeStruct((2, h_p), jnp.float32)),
        grid_spec=pltpu.PrefetchScalarGridSpec(
            num_scalar_prefetch=0, grid=grid,
            in_specs=[smem_eps, row_spec(d_in), row_spec(d_in),
                      const_spec(d_in, h_p), const_spec(1, h_p)],
            out_specs=(row_spec(h_p), const_spec(2, h_p)),
        ),
        compiler_params=arb,
    )(eps, agg, x, p["w1"], p["b1"])

    h2, stats2 = pl.pallas_call(
        functools.partial(_update_b_kernel, m_true=m_true, tile_m=tile_m),
        out_shape=(jax.ShapeDtypeStruct((m_pad, h_p), jnp.float32),
                   jax.ShapeDtypeStruct((2, h_p), jnp.float32)),
        grid_spec=pltpu.PrefetchScalarGridSpec(
            num_scalar_prefetch=0, grid=grid,
            in_specs=[row_spec(h_p), const_spec(2, h_p),
                      const_spec(1, h_p), const_spec(1, h_p),
                      const_spec(h_p, h_p), const_spec(1, h_p)],
            out_specs=(row_spec(h_p), const_spec(2, h_p)),
        ),
        compiler_params=arb,
    )(h1, stats1, p["g1"], p["be1"], p["w2"], p["b2"])

    out = pl.pallas_call(
        functools.partial(_update_c_kernel, m_true=m_true),
        out_shape=jax.ShapeDtypeStruct((m_pad, h_p), jnp.bfloat16),
        grid_spec=pltpu.PrefetchScalarGridSpec(
            num_scalar_prefetch=0, grid=grid,
            in_specs=[row_spec(h_p), const_spec(2, h_p),
                      const_spec(1, h_p), const_spec(1, h_p)],
            out_specs=row_spec(h_p),
        ),
        compiler_params=pltpu.CompilerParams(dimension_semantics=("parallel",)),
    )(h2, stats2, p["g2"], p["be2"])
    return out


def pallas_readout(xn, xe, p):
    b_pad = xn.shape[0]
    out_p = p["w2a"].shape[1]
    vmem = lambda: pl.BlockSpec(memory_space=pltpu.MemorySpace.VMEM)
    return pl.pallas_call(
        _readout_kernel,
        out_shape=jax.ShapeDtypeStruct((b_pad, out_p), jnp.float32),
        in_specs=[vmem() for _ in range(9)],
        out_specs=vmem(),
    )(xn, xe, p["w1a"], p["b1a"], p["w1b"], p["b1b"],
      p["w2a"], p["w2b"], p["b2"])


# ----------------------------------------------------------------------------
# Parameter initialization (PyTorch-Linear-style uniform bounds, then lane padding)
# ----------------------------------------------------------------------------
def _linear_params(key, fan_in, fan_out):
    kw, kb = jax.random.split(key)
    bound = 1.0 / (fan_in ** 0.5)
    w = jax.random.uniform(kw, (fan_in, fan_out), jnp.float32, -bound, bound)
    b = jax.random.uniform(kb, (fan_out,), jnp.float32, -bound, bound)
    return w, b


def _pad_w(w, rows_p, cols_p):
    r, c = w.shape
    return jnp.pad(w, ((0, rows_p - r), (0, cols_p - c))).astype(jnp.bfloat16)


def _pad_row(v, cols_p):
    return jnp.pad(v, (0, cols_p - v.shape[0])).reshape(1, -1).astype(jnp.float32)


def _update_nn_params(key, layer_dim, hidden, ld_p, h_p):
    k1, k2 = jax.random.split(key)
    w1, b1 = _linear_params(k1, layer_dim, hidden)
    w2, b2 = _linear_params(k2, hidden, hidden)
    ones = jnp.ones((hidden,), jnp.float32)
    zeros = jnp.zeros((hidden,), jnp.float32)
    return dict(
        w1=_pad_w(w1, ld_p, h_p), b1=_pad_row(b1, h_p),
        g1=_pad_row(ones, h_p), be1=_pad_row(zeros, h_p),
        w2=_pad_w(w2, h_p, h_p), b2=_pad_row(b2, h_p),
        g2=_pad_row(ones, h_p), be2=_pad_row(zeros, h_p),
    )


def init_mpnn_params(key, atom_types, bond_types, out_size, num_layers,
                     hidden, embed_dim, final_hidden_multiplier):
    d_p = _round_up(embed_dim, LANE)
    h_p = _round_up(hidden, LANE)
    fh = final_hidden_multiplier * hidden
    f_p = _round_up(fh, LANE)
    o_p = _round_up(out_size, LANE)

    keys = jax.random.split(key, 3 + num_layers)
    atom = jax.random.normal(keys[0], (atom_types, embed_dim), jnp.float32)
    bond = jax.random.normal(keys[1], (bond_types, embed_dim), jnp.float32)
    params = {
        "atom_emb": jnp.pad(atom, ((0, 0), (0, d_p - embed_dim))).astype(jnp.bfloat16),
        "bond_emb": jnp.pad(bond, ((0, 0), (0, d_p - embed_dim))).astype(jnp.bfloat16),
        "convs": [],
    }
    for i in range(num_layers):
        layer_dim = embed_dim if i == 0 else hidden
        ld_p = d_p if i == 0 else h_p
        ck = jax.random.split(keys[2 + i], 3)
        msg_w, msg_b = _linear_params(ck[0], layer_dim * 2, layer_dim)
        params["convs"].append(dict(
            eps1=jnp.zeros((1,), jnp.float32),   # train_eps=False -> buffers fixed at 0.0
            eps2=jnp.zeros((1,), jnp.float32),
            msg_wa=_pad_w(msg_w[:layer_dim], ld_p, ld_p),
            msg_wb=_pad_w(msg_w[layer_dim:], ld_p, ld_p),
            msg_b=_pad_row(msg_b, ld_p),
            n_update=_update_nn_params(ck[1], layer_dim, hidden, ld_p, h_p),
            e_update=_update_nn_params(ck[2], layer_dim, hidden, ld_p, h_p),
        ))
    lk = jax.random.split(keys[2 + num_layers], 3)
    w1a, b1a = _linear_params(lk[0], hidden, fh)
    w1b, b1b = _linear_params(lk[1], hidden, fh)
    w2, b2 = _linear_params(lk[2], fh * 2, out_size)
    params["readout"] = dict(
        w1a=_pad_w(w1a, h_p, f_p), b1a=_pad_row(b1a, f_p),
        w1b=_pad_w(w1b, h_p, f_p), b1b=_pad_row(b1b, f_p),
        w2a=_pad_w(w2[:fh], f_p, o_p),
        w2b=_pad_w(w2[fh:], f_p, o_p),
        b2=_pad_row(b2, o_p),
    )
    return params


# ----------------------------------------------------------------------------
# Forward pass
# ----------------------------------------------------------------------------
def mpnn_conv_forward(x, e, src, dst, cp, *, n_true, e_true, n_tile, e_tile):
    """One MPNNConv layer on padded tensors.  x:[N_pad,Dp] e:[E_pad,Dp]."""
    n_pad = x.shape[0]
    x_j = jnp.take(x, src, axis=0)                 # gather (XLA glue)

    n_msg = pallas_message_linear(x_j, e, cp["msg_wa"], cp["msg_wb"], cp["msg_b"],
                                  e_true=e_true, tile_m=e_tile)
    # mp_weight aggregation: scatter-sum onto target nodes (padded messages are zero).
    n_agg = jax.ops.segment_sum(n_msg.astype(jnp.float32), dst, num_segments=n_pad)
    n_out = pallas_update_mlp(n_agg, x, cp["eps1"], cp["n_update"],
                              m_true=n_true, tile_m=n_tile)

    # edge update: e_msg = x ;  e_agg = x[dst] + x[src]
    e_agg = jnp.take(x, dst, axis=0) + x_j
    e_out = pallas_update_mlp(e_agg, e, cp["eps2"], cp["e_update"],
                              m_true=e_true, tile_m=e_tile)
    return n_out, e_out


def mpnn_forward(params, x_ids, e_ids, edge_index, batch, batch_size, out_size):
    n_true = int(x_ids.shape[0])
    e_true = int(e_ids.shape[0])
    n_tile = _row_tile(n_true)
    e_tile = _row_tile(e_true)
    n_pad = _round_up(n_true, n_tile)
    e_pad = _round_up(e_true, e_tile)

    # Pad graph structure.  Padded edges point at node 0 (their messages are zeroed
    # in-kernel); padded nodes/edges are excluded from BN stats (in-kernel mask) and
    # from the readout pooling (out-of-range segment ids are dropped by segment_sum).
    x_ids_p = jnp.pad(x_ids, (0, n_pad - n_true))
    e_ids_p = jnp.pad(e_ids, (0, e_pad - e_true))
    src = jnp.pad(edge_index[0], (0, e_pad - e_true))
    dst = jnp.pad(edge_index[1], (0, e_pad - e_true))
    batch_p = jnp.pad(batch, (0, n_pad - n_true))
    node_valid = jnp.arange(n_pad) < n_true
    edge_valid = jnp.arange(e_pad) < e_true
    batch_nodes = jnp.where(node_valid, batch_p, batch_size)
    batch_edges = jnp.where(edge_valid, jnp.take(batch_p, src), batch_size)

    # embedding lookup (glue)
    x = jnp.take(params["atom_emb"], x_ids_p, axis=0)
    e = jnp.take(params["bond_emb"], e_ids_p, axis=0)

    for cp in params["convs"]:
        x, e = mpnn_conv_forward(x, e, src, dst, cp,
                                 n_true=n_true, e_true=e_true,
                                 n_tile=n_tile, e_tile=e_tile)
    # jump_mode=None -> last layer output only

    # readout (create_ro_weight ~ global add pooling over graph batch)
    xn = jax.ops.segment_sum(x.astype(jnp.float32), batch_nodes, num_segments=batch_size)
    xe = jax.ops.segment_sum(e.astype(jnp.float32), batch_edges, num_segments=batch_size)

    b_pad = _round_up(batch_size, SUBLANE)
    xn = jnp.pad(xn, ((0, b_pad - batch_size), (0, 0)))
    xe = jnp.pad(xe, ((0, b_pad - batch_size), (0, 0)))

    out = pallas_readout(xn, xe, params["readout"])
    return out[:batch_size, :out_size]


# ----------------------------------------------------------------------------
# Demo
# ----------------------------------------------------------------------------
if __name__ == "__main__":
    ATOM_TYPES, BOND_TYPES = 10, 6
    OUT_SIZE, NUM_LAYERS, HIDDEN, EMBED_DIM, FHM = 3, 2, 32, 32, 2
    N_NODES, N_EDGES, BATCH_SIZE = 16, 32, 2

    key = jax.random.PRNGKey(0)
    kp, kx, ke, kei = jax.random.split(key, 4)

    params = init_mpnn_params(kp, ATOM_TYPES, BOND_TYPES, OUT_SIZE,
                              NUM_LAYERS, HIDDEN, EMBED_DIM, FHM)

    x_ids = jax.random.randint(kx, (N_NODES,), 0, ATOM_TYPES)
    e_ids = jax.random.randint(ke, (N_EDGES,), 0, BOND_TYPES)
    edge_index = jax.random.randint(kei, (2, N_EDGES), 0, N_NODES)
    # first half of nodes -> graph 0, second half -> graph 1
    batch = (jnp.arange(N_NODES) >= (N_NODES // 2)).astype(jnp.int32)

    fwd = jax.jit(mpnn_forward, static_argnames=("batch_size", "out_size"))
    out = fwd(params, x_ids, e_ids, edge_index, batch,
              batch_size=BATCH_SIZE, out_size=OUT_SIZE)
    jax.block_until_ready(out)

    assert out.shape == (BATCH_SIZE, OUT_SIZE), out.shape
    assert bool(jnp.all(jnp.isfinite(out)))
    print("KERNEL_OK")
</pallas_src>

<mosaic_0001>
module attributes {stable_mosaic.version = 11 : i64} {
  func.func @_msg_kernel(%arg0: i32, %arg1: memref<128x128xbf16, #tpu.memory_space<vmem>>, %arg2: memref<128x128xbf16, #tpu.memory_space<vmem>>, %arg3: memref<128x128xbf16, #tpu.memory_space<vmem>>, %arg4: memref<128x128xbf16, #tpu.memory_space<vmem>>, %arg5: memref<1x128xf32, #tpu.memory_space<vmem>>, %arg6: memref<128x128xbf16, #tpu.memory_space<vmem>>) attributes {dimension_semantics = [#tpu.dimension_semantics<parallel>], iteration_bounds = array<i64: 1>, scalar_prefetch = 0 : i64, scratch_operands = 0 : i64, tpu.core_type = #tpu.core_type<tc>, window_params = [{transform_indices = @transform_0, window_bounds = array<i64: 128, 128>}, {transform_indices = @transform_1, window_bounds = array<i64: 128, 128>}, {pipeline_mode = #tpu.pipeline_mode<synchronous>, transform_indices = @transform_2, window_bounds = array<i64: 128, 128>}, {pipeline_mode = #tpu.pipeline_mode<synchronous>, transform_indices = @transform_3, window_bounds = array<i64: 128, 128>}, {pipeline_mode = #tpu.pipeline_mode<synchronous>, transform_indices = @transform_4, window_bounds = array<i64: 1, 128>}, {transform_indices = @transform_5, window_bounds = array<i64: 128, 128>}]} {
    %c0 = arith.constant 0 : index
    %c0_0 = arith.constant 0 : index
    %0 = vector.load %arg1[%c0, %c0_0] : memref<128x128xbf16, #tpu.memory_space<vmem>>, vector<128x128xbf16>
    %c0_1 = arith.constant 0 : index
    %c0_2 = arith.constant 0 : index
    %1 = vector.load %arg3[%c0_1, %c0_2] : memref<128x128xbf16, #tpu.memory_space<vmem>>, vector<128x128xbf16>
    %cst = arith.constant dense<0.000000e+00> : vector<128x128xf32>
    %2 = tpu.matmul %0, %1, %cst {dimension_numbers = #tpu.dot_dimension_numbers<[1], [0], [0], [1], [0, 0, 1, 1], [], []>} : vector<128x128xbf16>, vector<128x128xbf16>, vector<128x128xf32> -> vector<128x128xf32>
    %c0_3 = arith.constant 0 : index
    %c0_4 = arith.constant 0 : index
    %3 = vector.load %arg2[%c0_3, %c0_4] : memref<128x128xbf16, #tpu.memory_space<vmem>>, vector<128x128xbf16>
    %c0_5 = arith.constant 0 : index
    %c0_6 = arith.constant 0 : index
    %4 = vector.load %arg4[%c0_5, %c0_6] : memref<128x128xbf16, #tpu.memory_space<vmem>>, vector<128x128xbf16>
    %cst_7 = arith.constant dense<0.000000e+00> : vector<128x128xf32>
    %5 = tpu.matmul %3, %4, %cst_7 {dimension_numbers = #tpu.dot_dimension_numbers<[1], [0], [0], [1], [0, 0, 1, 1], [], []>} : vector<128x128xbf16>, vector<128x128xbf16>, vector<128x128xf32> -> vector<128x128xf32>
    %6 = arith.addf %2, %5 : vector<128x128xf32>
    %c0_8 = arith.constant 0 : index
    %c0_9 = arith.constant 0 : index
    %7 = vector.load %arg5[%c0_8, %c0_9] : memref<1x128xf32, #tpu.memory_space<vmem>>, vector<1x128xf32>
    %8 = vector.broadcast %7 : vector<1x128xf32> to vector<128x128xf32>
    %9 = arith.addf %6, %8 : vector<128x128xf32>
    %cst_10 = arith.constant 0.000000e+00 : f32
    %10 = vector.broadcast %cst_10 : f32 to vector<128x128xf32>
    %11 = arith.maximumf %9, %10 : vector<128x128xf32>
    %12 = tpu.iota {dimensions = array<i32: 0>} : vector<128x1xi32>
    %c128_i32 = arith.constant 128 : i32
    %13 = arith.muli %arg0, %c128_i32 : i32
    %14 = vector.broadcast %13 : i32 to vector<128x1xi32>
    %15 = arith.addi %12, %14 : vector<128x1xi32>
    %c32_i32 = arith.constant 32 : i32
    %16 = vector.broadcast %c32_i32 : i32 to vector<128x1xi32>
    %17 = arith.cmpi slt, %15, %16 : vector<128x1xi32>
    %cst_11 = arith.constant 0.000000e+00 : f32
    %18 = vector.shape_cast %17 : vector<128x1xi1> to vector<128x1xi1>
    %19 = vector.broadcast %18 : vector<128x1xi1> to vector<128x128xi1>
    %20 = vector.broadcast %cst_11 : f32 to vector<128x128xf32>
    %21 = arith.select %19, %11, %20 : vector<128x128xi1>, vector<128x128xf32>
    %22 = arith.truncf %21 : vector<128x128xf32> to vector<128x128xbf16>
    %c0_12 = arith.constant 0 : index
    %c0_13 = arith.constant 0 : index
    %23 = vector.load %arg6[%c0_12, %c0_13] : memref<128x128xbf16, #tpu.memory_space<vmem>>, vector<128x128xbf16>
    tpu.vector_store %arg6[%c0_12, %c0_13], %22 {strides = array<i32>} : memref<128x128xbf16, #tpu.memory_space<vmem>>, vector<128x128xbf16>,
    return
  }
  func.func @transform_0(%arg0: i32) -> (i32, i32) {
    %c0_i32 = arith.constant 0 : i32
    %c0_i32_0 = arith.constant 0 : i32
    return %arg0, %c0_i32 : i32, i32
  }
  func.func @transform_1(%arg0: i32) -> (i32, i32) {
    %c0_i32 = arith.constant 0 : i32
    %c0_i32_0 = arith.constant 0 : i32
    return %arg0, %c0_i32 : i32, i32
  }
  func.func @transform_2(%arg0: i32) -> (i32, i32) {
    %c0_i32 = arith.constant 0 : i32
    %c0_i32_0 = arith.constant 0 : i32
    %c0_i32_1 = arith.constant 0 : i32
    return %c0_i32, %c0_i32_0 : i32, i32
  }
  func.func @transform_3(%arg0: i32) -> (i32, i32) {
    %c0_i32 = arith.constant 0 : i32
    %c0_i32_0 = arith.constant 0 : i32
    %c0_i32_1 = arith.constant 0 : i32
    return %c0_i32, %c0_i32_0 : i32, i32
  }
  func.func @transform_4(%arg0: i32) -> (i32, i32) {
    %c0_i32 = arith.constant 0 : i32
    %c0_i32_0 = arith.constant 0 : i32
    %c0_i32_1 = arith.constant 0 : i32
    return %c0_i32, %c0_i32_0 : i32, i32
  }
  func.func @transform_5(%arg0: i32) -> (i32, i32) {
    %c0_i32 = arith.constant 0 : i32
    %c0_i32_0 = arith.constant 0 : i32
    return %arg0, %c0_i32 : i32, i32
  }
}

module attributes {stable_mosaic.version = 11 : i64} {
  func.func @_update_b_kernel(%arg0: i32, %arg1: memref<128x128xf32, #tpu.memory_space<vmem>>, %arg2: memref<2x128xf32, #tpu.memory_space<vmem>>, %arg3: memref<1x128xf32, #tpu.memory_space<vmem>>, %arg4: memref<1x128xf32, #tpu.memory_space<vmem>>, %arg5: memref<128x128xbf16, #tpu.memory_space<vmem>>, %arg6: memref<1x128xf32, #tpu.memory_space<vmem>>, %arg7: memref<128x128xf32, #tpu.memory_space<vmem>>, %arg8: memref<2x128xf32, #tpu.memory_space<vmem>>) attributes {dimension_semantics = [#tpu.dimension_semantics<arbitrary>], iteration_bounds = array<i64: 1>, scalar_prefetch = 0 : i64, scratch_operands = 0 : i64, tpu.core_type = #tpu.core_type<tc>, window_params = [{transform_indices = @transform_0, window_bounds = array<i64: 128, 128>}, {pipeline_mode = #tpu.pipeline_mode<synchronous>, transform_indices = @transform_1, window_bounds = array<i64: 2, 128>}, {pipeline_mode = #tpu.pipeline_mode<synchronous>, transform_indices = @transform_2, window_bounds = array<i64: 1, 128>}, {pipeline_mode = #tpu.pipeline_mode<synchronous>, transform_indices = @transform_3, window_bounds = array<i64: 1, 128>}, {pipeline_mode = #tpu.pipeline_mode<synchronous>, transform_indices = @transform_4, window_bounds = array<i64: 128, 128>}, {pipeline_mode = #tpu.pipeline_mode<synchronous>, transform_indices = @transform_5, window_bounds = array<i64: 1, 128>}, {transform_indices = @transform_6, window_bounds = array<i64: 128, 128>}, {pipeline_mode = #tpu.pipeline_mode<synchronous>, transform_indices = @transform_7, window_bounds = array<i64: 2, 128>}]} {
    %c0_i32 = arith.constant 0 : i32
    %0 = arith.cmpi eq, %arg0, %c0_i32 : i32
    %1 = arith.extui %0 : i1 to i32
    %c0_i32_0 = arith.constant 0 : i32
    %2 = arith.cmpi ne, %1, %c0_i32_0 : i32
    scf.if %2 {
      %cst_31 = arith.constant 0.000000e+00 : f32
      %56 = vector.broadcast %cst_31 : f32 to vector<2x128xf32>
      %c0_32 = arith.constant 0 : index
      %c0_33 = arith.constant 0 : index
      %57 = vector.load %arg8[%c0_32, %c0_33] : memref<2x128xf32, #tpu.memory_space<vmem>>, vector<2x128xf32>
      tpu.vector_store %arg8[%c0_32, %c0_33], %56 {strides = array<i32>} : memref<2x128xf32, #tpu.memory_space<vmem>>, vector<2x128xf32>,
    } else {
    }
    %c0 = arith.constant 0 : index
    %c0_1 = arith.constant 0 : index
    %3 = vector.load %arg2[%c0, %c0_1] : memref<2x128xf32, #tpu.memory_space<vmem>>, vector<1x128xf32>
    %cst = arith.constant 3.125000e-02 : f32
    %4 = vector.broadcast %cst : f32 to vector<1x128xf32>
    %5 = arith.mulf %3, %4 : vector<1x128xf32>
    %c1 = arith.constant 1 : index
    %c0_2 = arith.constant 0 : index
    %6 = vector.load %arg2[%c1, %c0_2] : memref<2x128xf32, #tpu.memory_space<vmem>>, vector<1x128xf32>
    %cst_3 = arith.constant 3.125000e-02 : f32
    %7 = vector.broadcast %cst_3 : f32 to vector<1x128xf32>
    %8 = arith.mulf %6, %7 : vector<1x128xf32>
    %9 = arith.mulf %5, %5 : vector<1x128xf32>
    %10 = arith.subf %8, %9 : vector<1x128xf32>
    %cst_4 = arith.constant 0.000000e+00 : f32
    %11 = vector.broadcast %cst_4 : f32 to vector<1x128xf32>
    %12 = arith.maximumf %10, %11 : vector<1x128xf32>
    %c0_5 = arith.constant 0 : index
    %c0_6 = arith.constant 0 : index
    %13 = vector.load %arg1[%c0_5, %c0_6] : memref<128x128xf32, #tpu.memory_space<vmem>>, vector<128x128xf32>
    %14 = vector.broadcast %5 : vector<1x128xf32> to vector<128x128xf32>
    %15 = arith.subf %13, %14 : vector<128x128xf32>
    %cst_7 = arith.constant 9.99999974E-6 : f32
    %16 = vector.broadcast %cst_7 : f32 to vector<1x128xf32>
    %17 = arith.addf %12, %16 : vector<1x128xf32>
    %18 = math.rsqrt %17 : vector<1x128xf32>
    %c0_8 = arith.constant 0 : index
    %c0_9 = arith.constant 0 : index
    %19 = vector.load %arg3[%c0_8, %c0_9] : memref<1x128xf32, #tpu.memory_space<vmem>>, vector<1x128xf32>
    %20 = arith.mulf %18, %19 : vector<1x128xf32>
    %21 = vector.broadcast %20 : vector<1x128xf32> to vector<128x128xf32>
    %22 = arith.mulf %15, %21 : vector<128x128xf32>
    %c0_10 = arith.constant 0 : index
    %c0_11 = arith.constant 0 : index
    %23 = vector.load %arg4[%c0_10, %c0_11] : memref<1x128xf32, #tpu.memory_space<vmem>>, vector<1x128xf32>
    %24 = vector.broadcast %23 : vector<1x128xf32> to vector<128x128xf32>
    %25 = arith.addf %22, %24 : vector<128x128xf32>
    %cst_12 = arith.constant 0.000000e+00 : f32
    %26 = vector.broadcast %cst_12 : f32 to vector<128x128xf32>
    %27 = arith.maximumf %25, %26 : vector<128x128xf32>
    %28 = arith.truncf %27 : vector<128x128xf32> to vector<128x128xbf16>
    %c0_13 = arith.constant 0 : index
    %c0_14 = arith.constant 0 : index
    %29 = vector.load %arg5[%c0_13, %c0_14] : memref<128x128xbf16, #tpu.memory_space<vmem>>, vector<128x128xbf16>
    %cst_15 = arith.constant dense<0.000000e+00> : vector<128x128xf32>
    %30 = tpu.matmul %28, %29, %cst_15 {dimension_numbers = #tpu.dot_dimension_numbers<[1], [0], [0], [1], [0, 0, 1, 1], [], []>} : vector<128x128xbf16>, vector<128x128xbf16>, vector<128x128xf32> -> vector<128x128xf32>
    %c0_16 = arith.constant 0 : index
    %c0_17 = arith.constant 0 : index
    %31 = vector.load %arg6[%c0_16, %c0_17] : memref<1x128xf32, #tpu.memory_space<vmem>>, vector<1x128xf32>
    %32 = vector.broadcast %31 : vector<1x128xf32> to vector<128x128xf32>
    %33 = arith.addf %30, %32 : vector<128x128xf32>
    %c0_18 = arith.constant 0 : index
    %c0_19 = arith.constant 0 : index
    %34 = vector.load %arg7[%c0_18, %c0_19] : memref<128x128xf32, #tpu.memory_space<vmem>>, vector<128x128xf32>
    tpu.vector_store %arg7[%c0_18, %c0_19], %33 {strides = array<i32>} : memref<128x128xf32, #tpu.memory_space<vmem>>, vector<128x128xf32>,
    %35 = tpu.iota {dimensions = array<i32: 0>} : vector<128x1xi32>
    %c128_i32 = arith.constant 128 : i32
    %36 = arith.muli %arg0, %c128_i32 : i32
    %37 = vector.broadcast %36 : i32 to vector<128x1xi32>
    %38 = arith.addi %35, %37 : vector<128x1xi32>
    %c32_i32 = arith.constant 32 : i32
    %39 = vector.broadcast %c32_i32 : i32 to vector<128x1xi32>
    %40 = arith.cmpi slt, %38, %39 : vector<128x1xi32>
    %cst_20 = arith.constant 0.000000e+00 : f32
    %41 = vector.shape_cast %40 : vector<128x1xi1> to vector<128x1xi1>
    %42 = vector.broadcast %41 : vector<128x1xi1> to vector<128x128xi1>
    %43 = vector.broadcast %cst_20 : f32 to vector<128x128xf32>
    %44 = arith.select %42, %33, %43 : vector<128x128xi1>, vector<128x128xf32>
    %c0_21 = arith.constant 0 : index
    %c0_22 = arith.constant 0 : index
    %45 = vector.load %arg8[%c0_21, %c0_22] : memref<2x128xf32, #tpu.memory_space<vmem>>, vector<1x128xf32>
    %cst_23 = arith.constant dense<0.000000e+00> : vector<128xf32>
    %46 = vector.multi_reduction <add>, %44, %cst_23 [0] : vector<128x128xf32> to vector<128xf32>
    %47 = vector.shape_cast %46 : vector<128xf32> to vector<1x128xf32>
    %48 = arith.addf %45, %47 : vector<1x128xf32>
    %c0_24 = arith.constant 0 : index
    %c0_25 = arith.constant 0 : index
    %49 = vector.load %arg8[%c0_24, %c0_25] : memref<2x128xf32, #tpu.memory_space<vmem>>, vector<1x128xf32>
    tpu.vector_store %arg8[%c0_24, %c0_25], %48 {strides = array<i32>} : memref<2x128xf32, #tpu.memory_space<vmem>>, vector<1x128xf32>,
    %c1_26 = arith.constant 1 : index
    %c0_27 = arith.constant 0 : index
    %50 = vector.load %arg8[%c1_26, %c0_27] : memref<2x128xf32, #tpu.memory_space<vmem>>, vector<1x128xf32>
    %51 = arith.mulf %44, %44 : vector<128x128xf32>
    %cst_28 = arith.constant dense<0.000000e+00> : vector<128xf32>
    %52 = vector.multi_reduction <add>, %51, %cst_28 [0] : vector<128x128xf32> to vector<128xf32>
    %53 = vector.shape_cast %52 : vector<128xf32> to vector<1x128xf32>
    %54 = arith.addf %50, %53 : vector<1x128xf32>
    %c1_29 = arith.constant 1 : index
    %c0_30 = arith.constant 0 : index
    %55 = vector.load %arg8[%c1_29, %c0_30] : memref<2x128xf32, #tpu.memory_space<vmem>>, vector<1x128xf32>
    tpu.vector_store %arg8[%c1_29, %c0_30], %54 {strides = array<i32>} : memref<2x128xf32, #tpu.memory_space<vmem>>, vector<1x128xf32>,
    return
  }
  func.func @transform_0(%arg0: i32) -> (i32, i32) {
    %c0_i32 = arith.constant 0 : i32
    %c0_i32_0 = arith.constant 0 : i32
    return %arg0, %c0_i32 : i32, i32
  }
  func.func @transform_1(%arg0: i32) -> (i32, i32) {
    %c0_i32 = arith.constant 0 : i32
    %c0_i32_0 = arith.constant 0 : i32
    %c0_i32_1 = arith.constant 0 : i32
    return %c0_i32, %c0_i32_0 : i32, i32
  }
  func.func @transform_2(%arg0: i32) -> (i32, i32) {
    %c0_i32 = arith.constant 0 : i32
    %c0_i32_0 = arith.constant 0 : i32
    %c0_i32_1 = arith.constant 0 : i32
    return %c0_i32, %c0_i32_0 : i32, i32
  }
  func.func @transform_3(%arg0: i32) -> (i32, i32) {
    %c0_i32 = arith.constant 0 : i32
    %c0_i32_0 = arith.constant 0 : i32
    %c0_i32_1 = arith.constant 0 : i32
    return %c0_i32, %c0_i32_0 : i32, i32
  }
  func.func @transform_4(%arg0: i32) -> (i32, i32) {
    %c0_i32 = arith.constant 0 : i32
    %c0_i32_0 = arith.constant 0 : i32
    %c0_i32_1 = arith.constant 0 : i32
    return %c0_i32, %c0_i32_0 : i32, i32
  }
  func.func @transform_5(%arg0: i32) -> (i32, i32) {
    %c0_i32 = arith.constant 0 : i32
    %c0_i32_0 = arith.constant 0 : i32
    %c0_i32_1 = arith.constant 0 : i32
    return %c0_i32, %c0_i32_0 : i32, i32
  }
  func.func @transform_6(%arg0: i32) -> (i32, i32) {
    %c0_i32 = arith.constant 0 : i32
    %c0_i32_0 = arith.constant 0 : i32
    return %arg0, %c0_i32 : i32, i32
  }
  func.func @transform_7(%arg0: i32) -> (i32, i32) {
    %c0_i32 = arith.constant 0 : i32
    %c0_i32_0 = arith.constant 0 : i32
    %c0_i32_1 = arith.constant 0 : i32
    return %c0_i32, %c0_i32_0 : i32, i32
  }
}

module attributes {stable_mosaic.version = 11 : i64} {
  func.func @_update_a_kernel(%arg0: i32, %arg1: memref<1xf32, #tpu.memory_space<smem>>, %arg2: memref<128x128xbf16, #tpu.memory_space<vmem>>, %arg3: memref<128x128xbf16, #tpu.memory_space<vmem>>, %arg4: memref<128x128xbf16, #tpu.memory_space<vmem>>, %arg5: memref<1x128xf32, #tpu.memory_space<vmem>>, %arg6: memref<128x128xf32, #tpu.memory_space<vmem>>, %arg7: memref<2x128xf32, #tpu.memory_space<vmem>>) attributes {dimension_semantics = [#tpu.dimension_semantics<arbitrary>], iteration_bounds = array<i64: 1>, scalar_prefetch = 0 : i64, scratch_operands = 0 : i64, tpu.core_type = #tpu.core_type<tc>, window_params = [{transform_indices = @transform_0, window_bounds = array<i64: 1>}, {transform_indices = @transform_1, window_bounds = array<i64: 128, 128>}, {transform_indices = @transform_2, window_bounds = array<i64: 128, 128>}, {pipeline_mode = #tpu.pipeline_mode<synchronous>, transform_indices = @transform_3, window_bounds = array<i64: 128, 128>}, {pipeline_mode = #tpu.pipeline_mode<synchronous>, transform_indices = @transform_4, window_bounds = array<i64: 1, 128>}, {transform_indices = @transform_5, window_bounds = array<i64: 128, 128>}, {pipeline_mode = #tpu.pipeline_mode<synchronous>, transform_indices = @transform_6, window_bounds = array<i64: 2, 128>}]} {
    %c0_i32 = arith.constant 0 : i32
    %0 = arith.cmpi eq, %arg0, %c0_i32 : i32
    %1 = arith.extui %0 : i1 to i32
    %c0_i32_0 = arith.constant 0 : i32
    %2 = arith.cmpi ne, %1, %c0_i32_0 : i32
    scf.if %2 {
      %cst_22 = arith.constant 0.000000e+00 : f32
      %40 = vector.broadcast %cst_22 : f32 to vector<2x128xf32>
      %c0_23 = arith.constant 0 : index
      %c0_24 = arith.constant 0 : index
      %41 = vector.load %arg7[%c0_23, %c0_24] : memref<2x128xf32, #tpu.memory_space<vmem>>, vector<2x128xf32>
      tpu.vector_store %arg7[%c0_23, %c0_24], %40 {strides = array<i32>} : memref<2x128xf32, #tpu.memory_space<vmem>>, vector<2x128xf32>,
    } else {
    }
    %c0 = arith.constant 0 : index
    %3 = memref.load %arg1[%c0] : memref<1xf32, #tpu.memory_space<smem>>
    %c0_1 = arith.constant 0 : index
    %c0_2 = arith.constant 0 : index
    %4 = vector.load %arg2[%c0_1, %c0_2] : memref<128x128xbf16, #tpu.memory_space<vmem>>, vector<128x128xbf16>
    %5 = arith.extf %4 : vector<128x128xbf16> to vector<128x128xf32>
    %cst = arith.constant 1.000000e+00 : f32
    %6 = arith.addf %cst, %3 : f32
    %c0_3 = arith.constant 0 : index
    %c0_4 = arith.constant 0 : index
    %7 = vector.load %arg3[%c0_3, %c0_4] : memref<128x128xbf16, #tpu.memory_space<vmem>>, vector<128x128xbf16>
    %8 = arith.extf %7 : vector<128x128xbf16> to vector<128x128xf32>
    %9 = vector.broadcast %6 : f32 to vector<128x128xf32>
    %10 = arith.mulf %9, %8 : vector<128x128xf32>
    %11 = arith.addf %5, %10 : vector<128x128xf32>
    %12 = arith.truncf %11 : vector<128x128xf32> to vector<128x128xbf16>
    %c0_5 = arith.constant 0 : index
    %c0_6 = arith.constant 0 : index
    %13 = vector.load %arg4[%c0_5, %c0_6] : memref<128x128xbf16, #tpu.memory_space<vmem>>, vector<128x128xbf16>
    %cst_7 = arith.constant dense<0.000000e+00> : vector<128x128xf32>
    %14 = tpu.matmul %12, %13, %cst_7 {dimension_numbers = #tpu.dot_dimension_numbers<[1], [0], [0], [1], [0, 0, 1, 1], [], []>} : vector<128x128xbf16>, vector<128x128xbf16>, vector<128x128xf32> -> vector<128x128xf32>
    %c0_8 = arith.constant 0 : index
    %c0_9 = arith.constant 0 : index
    %15 = vector.load %arg5[%c0_8, %c0_9] : memref<1x128xf32, #tpu.memory_space<vmem>>, vector<1x128xf32>
    %16 = vector.broadcast %15 : vector<1x128xf32> to vector<128x128xf32>
    %17 = arith.addf %14, %16 : vector<128x128xf32>
    %c0_10 = arith.constant 0 : index
    %c0_11 = arith.constant 0 : index
    %18 = vector.load %arg6[%c0_10, %c0_11] : memref<128x128xf32, #tpu.memory_space<vmem>>, vector<128x128xf32>
    tpu.vector_store %arg6[%c0_10, %c0_11], %17 {strides = array<i32>} : memref<128x128xf32, #tpu.memory_space<vmem>>, vector<128x128xf32>,
    %19 = tpu.iota {dimensions = array<i32: 0>} : vector<128x1xi32>
    %c128_i32 = arith.constant 128 : i32
    %20 = arith.muli %arg0, %c128_i32 : i32
    %21 = vector.broadcast %20 : i32 to vector<128x1xi32>
    %22 = arith.addi %19, %21 : vector<128x1xi32>
    %c32_i32 = arith.constant 32 : i32
    %23 = vector.broadcast %c32_i32 : i32 to vector<128x1xi32>
    %24 = arith.cmpi slt, %22, %23 : vector<128x1xi32>
    %cst_12 = arith.constant 0.000000e+00 : f32
    %25 = vector.shape_cast %24 : vector<128x1xi1> to vector<128x1xi1>
    %26 = vector.broadcast %25 : vector<128x1xi1> to vector<128x128xi1>
    %27 = vector.broadcast %cst_12 : f32 to vector<128x128xf32>
    %28 = arith.select %26, %17, %27 : vector<128x128xi1>, vector<128x128xf32>
    %c0_13 = arith.constant 0 : index
    %c0_14 = arith.constant 0 : index
    %29 = vector.load %arg7[%c0_13, %c0_14] : memref<2x128xf32, #tpu.memory_space<vmem>>, vector<1x128xf32>
    %cst_15 = arith.constant dense<0.000000e+00> : vector<128xf32>
    %30 = vector.multi_reduction <add>, %28, %cst_15 [0] : vector<128x128xf32> to vector<128xf32>
    %31 = vector.shape_cast %30 : vector<128xf32> to vector<1x128xf32>
    %32 = arith.addf %29, %31 : vector<1x128xf32>
    %c0_16 = arith.constant 0 : index
    %c0_17 = arith.constant 0 : index
    %33 = vector.load %arg7[%c0_16, %c0_17] : memref<2x128xf32, #tpu.memory_space<vmem>>, vector<1x128xf32>
    tpu.vector_store %arg7[%c0_16, %c0_17], %32 {strides = array<i32>} : memref<2x128xf32, #tpu.memory_space<vmem>>, vector<1x128xf32>,
    %c1 = arith.constant 1 : index
    %c0_18 = arith.constant 0 : index
    %34 = vector.load %arg7[%c1, %c0_18] : memref<2x128xf32, #tpu.memory_space<vmem>>, vector<1x128xf32>
    %35 = arith.mulf %28, %28 : vector<128x128xf32>
    %cst_19 = arith.constant dense<0.000000e+00> : vector<128xf32>
    %36 = vector.multi_reduction <add>, %35, %cst_19 [0] : vector<128x128xf32> to vector<128xf32>
    %37 = vector.shape_cast %36 : vector<128xf32> to vector<1x128xf32>
    %38 = arith.addf %34, %37 : vector<1x128xf32>
    %c1_20 = arith.constant 1 : index
    %c0_21 = arith.constant 0 : index
    %39 = vector.load %arg7[%c1_20, %c0_21] : memref<2x128xf32, #tpu.memory_space<vmem>>, vector<1x128xf32>
    tpu.vector_store %arg7[%c1_20, %c0_21], %38 {strides = array<i32>} : memref<2x128xf32, #tpu.memory_space<vmem>>, vector<1x128xf32>,
    return
  }
  func.func @transform_0(%arg0: i32) -> i32 {
    %c0_i32 = arith.constant 0 : i32
    %c0_i32_0 = arith.constant 0 : i32
    return %c0_i32 : i32
  }
  func.func @transform_1(%arg0: i32) -> (i32, i32) {
    %c0_i32 = arith.constant 0 : i32
    %c0_i32_0 = arith.constant 0 : i32
    return %arg0, %c0_i32 : i32, i32
  }
  func.func @transform_2(%arg0: i32) -> (i32, i32) {
    %c0_i32 = arith.constant 0 : i32
    %c0_i32_0 = arith.constant 0 : i32
    return %arg0, %c0_i32 : i32, i32
  }
  func.func @transform_3(%arg0: i32) -> (i32, i32) {
    %c0_i32 = arith.constant 0 : i32
    %c0_i32_0 = arith.constant 0 : i32
    %c0_i32_1 = arith.constant 0 : i32
    return %c0_i32, %c0_i32_0 : i32, i32
  }
  func.func @transform_4(%arg0: i32) -> (i32, i32) {
    %c0_i32 = arith.constant 0 : i32
    %c0_i32_0 = arith.constant 0 : i32
    %c0_i32_1 = arith.constant 0 : i32
    return %c0_i32, %c0_i32_0 : i32, i32
  }
  func.func @transform_5(%arg0: i32) -> (i32, i32) {
    %c0_i32 = arith.constant 0 : i32
    %c0_i32_0 = arith.constant 0 : i32
    return %arg0, %c0_i32 : i32, i32
  }
  func.func @transform_6(%arg0: i32) -> (i32, i32) {
    %c0_i32 = arith.constant 0 : i32
    %c0_i32_0 = arith.constant 0 : i32
    %c0_i32_1 = arith.constant 0 : i32
    return %c0_i32, %c0_i32_0 : i32, i32
  }
}

module attributes {stable_mosaic.version = 11 : i64} {
  func.func @_update_c_kernel(%arg0: i32, %arg1: memref<128x128xf32, #tpu.memory_space<vmem>>, %arg2: memref<2x128xf32, #tpu.memory_space<vmem>>, %arg3: memref<1x128xf32, #tpu.memory_space<vmem>>, %arg4: memref<1x128xf32, #tpu.memory_space<vmem>>, %arg5: memref<128x128xbf16, #tpu.memory_space<vmem>>) attributes {dimension_semantics = [#tpu.dimension_semantics<parallel>], iteration_bounds = array<i64: 1>, scalar_prefetch = 0 : i64, scratch_operands = 0 : i64, tpu.core_type = #tpu.core_type<tc>, window_params = [{transform_indices = @transform_0, window_bounds = array<i64: 128, 128>}, {pipeline_mode = #tpu.pipeline_mode<synchronous>, transform_indices = @transform_1, window_bounds = array<i64: 2, 128>}, {pipeline_mode = #tpu.pipeline_mode<synchronous>, transform_indices = @transform_2, window_bounds = array<i64: 1, 128>}, {pipeline_mode = #tpu.pipeline_mode<synchronous>, transform_indices = @transform_3, window_bounds = array<i64: 1, 128>}, {transform_indices = @transform_4, window_bounds = array<i64: 128, 128>}]} {
    %c0 = arith.constant 0 : index
    %c0_0 = arith.constant 0 : index
    %0 = vector.load %arg2[%c0, %c0_0] : memref<2x128xf32, #tpu.memory_space<vmem>>, vector<1x128xf32>
    %cst = arith.constant 3.125000e-02 : f32
    %1 = vector.broadcast %cst : f32 to vector<1x128xf32>
    %2 = arith.mulf %0, %1 : vector<1x128xf32>
    %c1 = arith.constant 1 : index
    %c0_1 = arith.constant 0 : index
    %3 = vector.load %arg2[%c1, %c0_1] : memref<2x128xf32, #tpu.memory_space<vmem>>, vector<1x128xf32>
    %cst_2 = arith.constant 3.125000e-02 : f32
    %4 = vector.broadcast %cst_2 : f32 to vector<1x128xf32>
    %5 = arith.mulf %3, %4 : vector<1x128xf32>
    %6 = arith.mulf %2, %2 : vector<1x128xf32>
    %7 = arith.subf %5, %6 : vector<1x128xf32>
    %cst_3 = arith.constant 0.000000e+00 : f32
    %8 = vector.broadcast %cst_3 : f32 to vector<1x128xf32>
    %9 = arith.maximumf %7, %8 : vector<1x128xf32>
    %c0_4 = arith.constant 0 : index
    %c0_5 = arith.constant 0 : index
    %10 = vector.load %arg1[%c0_4, %c0_5] : memref<128x128xf32, #tpu.memory_space<vmem>>, vector<128x128xf32>
    %11 = vector.broadcast %2 : vector<1x128xf32> to vector<128x128xf32>
    %12 = arith.subf %10, %11 : vector<128x128xf32>
    %cst_6 = arith.constant 9.99999974E-6 : f32
    %13 = vector.broadcast %cst_6 : f32 to vector<1x128xf32>
    %14 = arith.addf %9, %13 : vector<1x128xf32>
    %15 = math.rsqrt %14 : vector<1x128xf32>
    %c0_7 = arith.constant 0 : index
    %c0_8 = arith.constant 0 : index
    %16 = vector.load %arg3[%c0_7, %c0_8] : memref<1x128xf32, #tpu.memory_space<vmem>>, vector<1x128xf32>
    %17 = arith.mulf %15, %16 : vector<1x128xf32>
    %18 = vector.broadcast %17 : vector<1x128xf32> to vector<128x128xf32>
    %19 = arith.mulf %12, %18 : vector<128x128xf32>
    %c0_9 = arith.constant 0 : index
    %c0_10 = arith.constant 0 : index
    %20 = vector.load %arg4[%c0_9, %c0_10] : memref<1x128xf32, #tpu.memory_space<vmem>>, vector<1x128xf32>
    %21 = vector.broadcast %20 : vector<1x128xf32> to vector<128x128xf32>
    %22 = arith.addf %19, %21 : vector<128x128xf32>
    %cst_11 = arith.constant 0.000000e+00 : f32
    %23 = vector.broadcast %cst_11 : f32 to vector<128x128xf32>
    %24 = arith.maximumf %22, %23 : vector<128x128xf32>
    %25 = arith.truncf %24 : vector<128x128xf32> to vector<128x128xbf16>
    %c0_12 = arith.constant 0 : index
    %c0_13 = arith.constant 0 : index
    %26 = vector.load %arg5[%c0_12, %c0_13] : memref<128x128xbf16, #tpu.memory_space<vmem>>, vector<128x128xbf16>
    tpu.vector_store %arg5[%c0_12, %c0_13], %25 {strides = array<i32>} : memref<128x128xbf16, #tpu.memory_space<vmem>>, vector<128x128xbf16>,
    return
  }
  func.func @transform_0(%arg0: i32) -> (i32, i32) {
    %c0_i32 = arith.constant 0 : i32
    %c0_i32_0 = arith.constant 0 : i32
    return %arg0, %c0_i32 : i32, i32
  }
  func.func @transform_1(%arg0: i32) -> (i32, i32) {
    %c0_i32 = arith.constant 0 : i32
    %c0_i32_0 = arith.constant 0 : i32
    %c0_i32_1 = arith.constant 0 : i32
    return %c0_i32, %c0_i32_0 : i32, i32
  }
  func.func @transform_2(%arg0: i32) -> (i32, i32) {
    %c0_i32 = arith.constant 0 : i32
    %c0_i32_0 = arith.constant 0 : i32
    %c0_i32_1 = arith.constant 0 : i32
    return %c0_i32, %c0_i32_0 : i32, i32
  }
  func.func @transform_3(%arg0: i32) -> (i32, i32) {
    %c0_i32 = arith.constant 0 : i32
    %c0_i32_0 = arith.constant 0 : i32
    %c0_i32_1 = arith.constant 0 : i32
    return %c0_i32, %c0_i32_0 : i32, i32
  }
  func.func @transform_4(%arg0: i32) -> (i32, i32) {
    %c0_i32 = arith.constant 0 : i32
    %c0_i32_0 = arith.constant 0 : i32
    return %arg0, %c0_i32 : i32, i32
  }
}

module attributes {stable_mosaic.version = 11 : i64} {
  func.func @_update_a_kernel(%arg0: i32, %arg1: memref<1xf32, #tpu.memory_space<smem>>, %arg2: memref<128x128xf32, #tpu.memory_space<vmem>>, %arg3: memref<128x128xbf16, #tpu.memory_space<vmem>>, %arg4: memref<128x128xbf16, #tpu.memory_space<vmem>>, %arg5: memref<1x128xf32, #tpu.memory_space<vmem>>, %arg6: memref<128x128xf32, #tpu.memory_space<vmem>>, %arg7: memref<2x128xf32, #tpu.memory_space<vmem>>) attributes {dimension_semantics = [#tpu.dimension_semantics<arbitrary>], iteration_bounds = array<i64: 1>, scalar_prefetch = 0 : i64, scratch_operands = 0 : i64, tpu.core_type = #tpu.core_type<tc>, window_params = [{transform_indices = @transform_0, window_bounds = array<i64: 1>}, {transform_indices = @transform_1, window_bounds = array<i64: 128, 128>}, {transform_indices = @transform_2, window_bounds = array<i64: 128, 128>}, {pipeline_mode = #tpu.pipeline_mode<synchronous>, transform_indices = @transform_3, window_bounds = array<i64: 128, 128>}, {pipeline_mode = #tpu.pipeline_mode<synchronous>, transform_indices = @transform_4, window_bounds = array<i64: 1, 128>}, {transform_indices = @transform_5, window_bounds = array<i64: 128, 128>}, {pipeline_mode = #tpu.pipeline_mode<synchronous>, transform_indices = @transform_6, window_bounds = array<i64: 2, 128>}]} {
    %c0_i32 = arith.constant 0 : i32
    %0 = arith.cmpi eq, %arg0, %c0_i32 : i32
    %1 = arith.extui %0 : i1 to i32
    %c0_i32_0 = arith.constant 0 : i32
    %2 = arith.cmpi ne, %1, %c0_i32_0 : i32
    scf.if %2 {
      %cst_22 = arith.constant 0.000000e+00 : f32
      %39 = vector.broadcast %cst_22 : f32 to vector<2x128xf32>
      %c0_23 = arith.constant 0 : index
      %c0_24 = arith.constant 0 : index
      %40 = vector.load %arg7[%c0_23, %c0_24] : memref<2x128xf32, #tpu.memory_space<vmem>>, vector<2x128xf32>
      tpu.vector_store %arg7[%c0_23, %c0_24], %39 {strides = array<i32>} : memref<2x128xf32, #tpu.memory_space<vmem>>, vector<2x128xf32>,
    } else {
    }
    %c0 = arith.constant 0 : index
    %3 = memref.load %arg1[%c0] : memref<1xf32, #tpu.memory_space<smem>>
    %c0_1 = arith.constant 0 : index
    %c0_2 = arith.constant 0 : index
    %4 = vector.load %arg2[%c0_1, %c0_2] : memref<128x128xf32, #tpu.memory_space<vmem>>, vector<128x128xf32>
    %cst = arith.constant 1.000000e+00 : f32
    %5 = arith.addf %cst, %3 : f32
    %c0_3 = arith.constant 0 : index
    %c0_4 = arith.constant 0 : index
    %6 = vector.load %arg3[%c0_3, %c0_4] : memref<128x128xbf16, #tpu.memory_space<vmem>>, vector<128x128xbf16>
    %7 = arith.extf %6 : vector<128x128xbf16> to vector<128x128xf32>
    %8 = vector.broadcast %5 : f32 to vector<128x128xf32>
    %9 = arith.mulf %8, %7 : vector<128x128xf32>
    %10 = arith.addf %4, %9 : vector<128x128xf32>
    %11 = arith.truncf %10 : vector<128x128xf32> to vector<128x128xbf16>
    %c0_5 = arith.constant 0 : index
    %c0_6 = arith.constant 0 : index
    %12 = vector.load %arg4[%c0_5, %c0_6] : memref<128x128xbf16, #tpu.memory_space<vmem>>, vector<128x128xbf16>
    %cst_7 = arith.constant dense<0.000000e+00> : vector<128x128xf32>
    %13 = tpu.matmul %11, %12, %cst_7 {dimension_numbers = #tpu.dot_dimension_numbers<[1], [0], [0], [1], [0, 0, 1, 1], [], []>} : vector<128x128xbf16>, vector<128x128xbf16>, vector<128x128xf32> -> vector<128x128xf32>
    %c0_8 = arith.constant 0 : index
    %c0_9 = arith.constant 0 : index
    %14 = vector.load %arg5[%c0_8, %c0_9] : memref<1x128xf32, #tpu.memory_space<vmem>>, vector<1x128xf32>
    %15 = vector.broadcast %14 : vector<1x128xf32> to vector<128x128xf32>
    %16 = arith.addf %13, %15 : vector<128x128xf32>
    %c0_10 = arith.constant 0 : index
    %c0_11 = arith.constant 0 : index
    %17 = vector.load %arg6[%c0_10, %c0_11] : memref<128x128xf32, #tpu.memory_space<vmem>>, vector<128x128xf32>
    tpu.vector_store %arg6[%c0_10, %c0_11], %16 {strides = array<i32>} : memref<128x128xf32, #tpu.memory_space<vmem>>, vector<128x128xf32>,
    %18 = tpu.iota {dimensions = array<i32: 0>} : vector<128x1xi32>
    %c128_i32 = arith.constant 128 : i32
    %19 = arith.muli %arg0, %c128_i32 : i32
    %20 = vector.broadcast %19 : i32 to vector<128x1xi32>
    %21 = arith.addi %18, %20 : vector<128x1xi32>
    %c16_i32 = arith.constant 16 : i32
    %22 = vector.broadcast %c16_i32 : i32 to vector<128x1xi32>
    %23 = arith.cmpi slt, %21, %22 : vector<128x1xi32>
    %cst_12 = arith.constant 0.000000e+00 : f32
    %24 = vector.shape_cast %23 : vector<128x1xi1> to vector<128x1xi1>
    %25 = vector.broadcast %24 : vector<128x1xi1> to vector<128x128xi1>
    %26 = vector.broadcast %cst_12 : f32 to vector<128x128xf32>
    %27 = arith.select %25, %16, %26 : vector<128x128xi1>, vector<128x128xf32>
    %c0_13 = arith.constant 0 : index
    %c0_14 = arith.constant 0 : index
    %28 = vector.load %arg7[%c0_13, %c0_14] : memref<2x128xf32, #tpu.memory_space<vmem>>, vector<1x128xf32>
    %cst_15 = arith.constant dense<0.000000e+00> : vector<128xf32>
    %29 = vector.multi_reduction <add>, %27, %cst_15 [0] : vector<128x128xf32> to vector<128xf32>
    %30 = vector.shape_cast %29 : vector<128xf32> to vector<1x128xf32>
    %31 = arith.addf %28, %30 : vector<1x128xf32>
    %c0_16 = arith.constant 0 : index
    %c0_17 = arith.constant 0 : index
    %32 = vector.load %arg7[%c0_16, %c0_17] : memref<2x128xf32, #tpu.memory_space<vmem>>, vector<1x128xf32>
    tpu.vector_store %arg7[%c0_16, %c0_17], %31 {strides = array<i32>} : memref<2x128xf32, #tpu.memory_space<vmem>>, vector<1x128xf32>,
    %c1 = arith.constant 1 : index
    %c0_18 = arith.constant 0 : index
    %33 = vector.load %arg7[%c1, %c0_18] : memref<2x128xf32, #tpu.memory_space<vmem>>, vector<1x128xf32>
    %34 = arith.mulf %27, %27 : vector<128x128xf32>
    %cst_19 = arith.constant dense<0.000000e+00> : vector<128xf32>
    %35 = vector.multi_reduction <add>, %34, %cst_19 [0] : vector<128x128xf32> to vector<128xf32>
    %36 = vector.shape_cast %35 : vector<128xf32> to vector<1x128xf32>
    %37 = arith.addf %33, %36 : vector<1x128xf32>
    %c1_20 = arith.constant 1 : index
    %c0_21 = arith.constant 0 : index
    %38 = vector.load %arg7[%c1_20, %c0_21] : memref<2x128xf32, #tpu.memory_space<vmem>>, vector<1x128xf32>
    tpu.vector_store %arg7[%c1_20, %c0_21], %37 {strides = array<i32>} : memref<2x128xf32, #tpu.memory_space<vmem>>, vector<1x128xf32>,
    return
  }
  func.func @transform_0(%arg0: i32) -> i32 {
    %c0_i32 = arith.constant 0 : i32
    %c0_i32_0 = arith.constant 0 : i32
    return %c0_i32 : i32
  }
  func.func @transform_1(%arg0: i32) -> (i32, i32) {
    %c0_i32 = arith.constant 0 : i32
    %c0_i32_0 = arith.constant 0 : i32
    return %arg0, %c0_i32 : i32, i32
  }
  func.func @transform_2(%arg0: i32) -> (i32, i32) {
    %c0_i32 = arith.constant 0 : i32
    %c0_i32_0 = arith.constant 0 : i32
    return %arg0, %c0_i32 : i32, i32
  }
  func.func @transform_3(%arg0: i32) -> (i32, i32) {
    %c0_i32 = arith.constant 0 : i32
    %c0_i32_0 = arith.constant 0 : i32
    %c0_i32_1 = arith.constant 0 : i32
    return %c0_i32, %c0_i32_0 : i32, i32
  }
  func.func @transform_4(%arg0: i32) -> (i32, i32) {
    %c0_i32 = arith.constant 0 : i32
    %c0_i32_0 = arith.constant 0 : i32
    %c0_i32_1 = arith.constant 0 : i32
    return %c0_i32, %c0_i32_0 : i32, i32
  }
  func.func @transform_5(%arg0: i32) -> (i32, i32) {
    %c0_i32 = arith.constant 0 : i32
    %c0_i32_0 = arith.constant 0 : i32
    return %arg0, %c0_i32 : i32, i32
  }
  func.func @transform_6(%arg0: i32) -> (i32, i32) {
    %c0_i32 = arith.constant 0 : i32
    %c0_i32_0 = arith.constant 0 : i32
    %c0_i32_1 = arith.constant 0 : i32
    return %c0_i32, %c0_i32_0 : i32, i32
  }
}

module attributes {stable_mosaic.version = 11 : i64} {
  func.func @_update_b_kernel(%arg0: i32, %arg1: memref<128x128xf32, #tpu.memory_space<vmem>>, %arg2: memref<2x128xf32, #tpu.memory_space<vmem>>, %arg3: memref<1x128xf32, #tpu.memory_space<vmem>>, %arg4: memref<1x128xf32, #tpu.memory_space<vmem>>, %arg5: memref<128x128xbf16, #tpu.memory_space<vmem>>, %arg6: memref<1x128xf32, #tpu.memory_space<vmem>>, %arg7: memref<128x128xf32, #tpu.memory_space<vmem>>, %arg8: memref<2x128xf32, #tpu.memory_space<vmem>>) attributes {dimension_semantics = [#tpu.dimension_semantics<arbitrary>], iteration_bounds = array<i64: 1>, scalar_prefetch = 0 : i64, scratch_operands = 0 : i64, tpu.core_type = #tpu.core_type<tc>, window_params = [{transform_indices = @transform_0, window_bounds = array<i64: 128, 128>}, {pipeline_mode = #tpu.pipeline_mode<synchronous>, transform_indices = @transform_1, window_bounds = array<i64: 2, 128>}, {pipeline_mode = #tpu.pipeline_mode<synchronous>, transform_indices = @transform_2, window_bounds = array<i64: 1, 128>}, {pipeline_mode = #tpu.pipeline_mode<synchronous>, transform_indices = @transform_3, window_bounds = array<i64: 1, 128>}, {pipeline_mode = #tpu.pipeline_mode<synchronous>, transform_indices = @transform_4, window_bounds = array<i64: 128, 128>}, {pipeline_mode = #tpu.pipeline_mode<synchronous>, transform_indices = @transform_5, window_bounds = array<i64: 1, 128>}, {transform_indices = @transform_6, window_bounds = array<i64: 128, 128>}, {pipeline_mode = #tpu.pipeline_mode<synchronous>, transform_indices = @transform_7, window_bounds = array<i64: 2, 128>}]} {
    %c0_i32 = arith.constant 0 : i32
    %0 = arith.cmpi eq, %arg0, %c0_i32 : i32
    %1 = arith.extui %0 : i1 to i32
    %c0_i32_0 = arith.constant 0 : i32
    %2 = arith.cmpi ne, %1, %c0_i32_0 : i32
    scf.if %2 {
      %cst_31 = arith.constant 0.000000e+00 : f32
      %56 = vector.broadcast %cst_31 : f32 to vector<2x128xf32>
      %c0_32 = arith.constant 0 : index
      %c0_33 = arith.constant 0 : index
      %57 = vector.load %arg8[%c0_32, %c0_33] : memref<2x128xf32, #tpu.memory_space<vmem>>, vector<2x128xf32>
      tpu.vector_store %arg8[%c0_32, %c0_33], %56 {strides = array<i32>} : memref<2x128xf32, #tpu.memory_space<vmem>>, vector<2x128xf32>,
    } else {
    }
    %c0 = arith.constant 0 : index
    %c0_1 = arith.constant 0 : index
    %3 = vector.load %arg2[%c0, %c0_1] : memref<2x128xf32, #tpu.memory_space<vmem>>, vector<1x128xf32>
    %cst = arith.constant 6.250000e-02 : f32
    %4 = vector.broadcast %cst : f32 to vector<1x128xf32>
    %5 = arith.mulf %3, %4 : vector<1x128xf32>
    %c1 = arith.constant 1 : index
    %c0_2 = arith.constant 0 : index
    %6 = vector.load %arg2[%c1, %c0_2] : memref<2x128xf32, #tpu.memory_space<vmem>>, vector<1x128xf32>
    %cst_3 = arith.constant 6.250000e-02 : f32
    %7 = vector.broadcast %cst_3 : f32 to vector<1x128xf32>
    %8 = arith.mulf %6, %7 : vector<1x128xf32>
    %9 = arith.mulf %5, %5 : vector<1x128xf32>
    %10 = arith.subf %8, %9 : vector<1x128xf32>
    %cst_4 = arith.constant 0.000000e+00 : f32
    %11 = vector.broadcast %cst_4 : f32 to vector<1x128xf32>
    %12 = arith.maximumf %10, %11 : vector<1x128xf32>
    %c0_5 = arith.constant 0 : index
    %c0_6 = arith.constant 0 : index
    %13 = vector.load %arg1[%c0_5, %c0_6] : memref<128x128xf32, #tpu.memory_space<vmem>>, vector<128x128xf32>
    %14 = vector.broadcast %5 : vector<1x128xf32> to vector<128x128xf32>
    %15 = arith.subf %13, %14 : vector<128x128xf32>
    %cst_7 = arith.constant 9.99999974E-6 : f32
    %16 = vector.broadcast %cst_7 : f32 to vector<1x128xf32>
    %17 = arith.addf %12, %16 : vector<1x128xf32>
    %18 = math.rsqrt %17 : vector<1x128xf32>
    %c0_8 = arith.constant 0 : index
    %c0_9 = arith.constant 0 : index
    %19 = vector.load %arg3[%c0_8, %c0_9] : memref<1x128xf32, #tpu.memory_space<vmem>>, vector<1x128xf32>
    %20 = arith.mulf %18, %19 : vector<1x128xf32>
    %21 = vector.broadcast %20 : vector<1x128xf32> to vector<128x128xf32>
    %22 = arith.mulf %15, %21 : vector<128x128xf32>
    %c0_10 = arith.constant 0 : index
    %c0_11 = arith.constant 0 : index
    %23 = vector.load %arg4[%c0_10, %c0_11] : memref<1x128xf32, #tpu.memory_space<vmem>>, vector<1x128xf32>
    %24 = vector.broadcast %23 : vector<1x128xf32> to vector<128x128xf32>
    %25 = arith.addf %22, %24 : vector<128x128xf32>
    %cst_12 = arith.constant 0.000000e+00 : f32
    %26 = vector.broadcast %cst_12 : f32 to vector<128x128xf32>
    %27 = arith.maximumf %25, %26 : vector<128x128xf32>
    %28 = arith.truncf %27 : vector<128x128xf32> to vector<128x128xbf16>
    %c0_13 = arith.constant 0 : index
    %c0_14 = arith.constant 0 : index
    %29 = vector.load %arg5[%c0_13, %c0_14] : memref<128x128xbf16, #tpu.memory_space<vmem>>, vector<128x128xbf16>
    %cst_15 = arith.constant dense<0.000000e+00> : vector<128x128xf32>
    %30 = tpu.matmul %28, %29, %cst_15 {dimension_numbers = #tpu.dot_dimension_numbers<[1], [0], [0], [1], [0, 0, 1, 1], [], []>} : vector<128x128xbf16>, vector<128x128xbf16>, vector<128x128xf32> -> vector<128x128xf32>
    %c0_16 = arith.constant 0 : index
    %c0_17 = arith.constant 0 : index
    %31 = vector.load %arg6[%c0_16, %c0_17] : memref<1x128xf32, #tpu.memory_space<vmem>>, vector<1x128xf32>
    %32 = vector.broadcast %31 : vector<1x128xf32> to vector<128x128xf32>
    %33 = arith.addf %30, %32 : vector<128x128xf32>
    %c0_18 = arith.constant 0 : index
    %c0_19 = arith.constant 0 : index
    %34 = vector.load %arg7[%c0_18, %c0_19] : memref<128x128xf32, #tpu.memory_space<vmem>>, vector<128x128xf32>
    tpu.vector_store %arg7[%c0_18, %c0_19], %33 {strides = array<i32>} : memref<128x128xf32, #tpu.memory_space<vmem>>, vector<128x128xf32>,
    %35 = tpu.iota {dimensions = array<i32: 0>} : vector<128x1xi32>
    %c128_i32 = arith.constant 128 : i32
    %36 = arith.muli %arg0, %c128_i32 : i32
    %37 = vector.broadcast %36 : i32 to vector<128x1xi32>
    %38 = arith.addi %35, %37 : vector<128x1xi32>
    %c16_i32 = arith.constant 16 : i32
    %39 = vector.broadcast %c16_i32 : i32 to vector<128x1xi32>
    %40 = arith.cmpi slt, %38, %39 : vector<128x1xi32>
    %cst_20 = arith.constant 0.000000e+00 : f32
    %41 = vector.shape_cast %40 : vector<128x1xi1> to vector<128x1xi1>
    %42 = vector.broadcast %41 : vector<128x1xi1> to vector<128x128xi1>
    %43 = vector.broadcast %cst_20 : f32 to vector<128x128xf32>
    %44 = arith.select %42, %33, %43 : vector<128x128xi1>, vector<128x128xf32>
    %c0_21 = arith.constant 0 : index
    %c0_22 = arith.constant 0 : index
    %45 = vector.load %arg8[%c0_21, %c0_22] : memref<2x128xf32, #tpu.memory_space<vmem>>, vector<1x128xf32>
    %cst_23 = arith.constant dense<0.000000e+00> : vector<128xf32>
    %46 = vector.multi_reduction <add>, %44, %cst_23 [0] : vector<128x128xf32> to vector<128xf32>
    %47 = vector.shape_cast %46 : vector<128xf32> to vector<1x128xf32>
    %48 = arith.addf %45, %47 : vector<1x128xf32>
    %c0_24 = arith.constant 0 : index
    %c0_25 = arith.constant 0 : index
    %49 = vector.load %arg8[%c0_24, %c0_25] : memref<2x128xf32, #tpu.memory_space<vmem>>, vector<1x128xf32>
    tpu.vector_store %arg8[%c0_24, %c0_25], %48 {strides = array<i32>} : memref<2x128xf32, #tpu.memory_space<vmem>>, vector<1x128xf32>,
    %c1_26 = arith.constant 1 : index
    %c0_27 = arith.constant 0 : index
    %50 = vector.load %arg8[%c1_26, %c0_27] : memref<2x128xf32, #tpu.memory_space<vmem>>, vector<1x128xf32>
    %51 = arith.mulf %44, %44 : vector<128x128xf32>
    %cst_28 = arith.constant dense<0.000000e+00> : vector<128xf32>
    %52 = vector.multi_reduction <add>, %51, %cst_28 [0] : vector<128x128xf32> to vector<128xf32>
    %53 = vector.shape_cast %52 : vector<128xf32> to vector<1x128xf32>
    %54 = arith.addf %50, %53 : vector<1x128xf32>
    %c1_29 = arith.constant 1 : index
    %c0_30 = arith.constant 0 : index
    %55 = vector.load %arg8[%c1_29, %c0_30] : memref<2x128xf32, #tpu.memory_space<vmem>>, vector<1x128xf32>
    tpu.vector_store %arg8[%c1_29, %c0_30], %54 {strides = array<i32>} : memref<2x128xf32, #tpu.memory_space<vmem>>, vector<1x128xf32>,
    return
  }
  func.func @transform_0(%arg0: i32) -> (i32, i32) {
    %c0_i32 = arith.constant 0 : i32
    %c0_i32_0 = arith.constant 0 : i32
    return %arg0, %c0_i32 : i32, i32
  }
  func.func @transform_1(%arg0: i32) -> (i32, i32) {
    %c0_i32 = arith.constant 0 : i32
    %c0_i32_0 = arith.constant 0 : i32
    %c0_i32_1 = arith.constant 0 : i32
    return %c0_i32, %c0_i32_0 : i32, i32
  }
  func.func @transform_2(%arg0: i32) -> (i32, i32) {
    %c0_i32 = arith.constant 0 : i32
    %c0_i32_0 = arith.constant 0 : i32
    %c0_i32_1 = arith.constant 0 : i32
    return %c0_i32, %c0_i32_0 : i32, i32
  }
  func.func @transform_3(%arg0: i32) -> (i32, i32) {
    %c0_i32 = arith.constant 0 : i32
    %c0_i32_0 = arith.constant 0 : i32
    %c0_i32_1 = arith.constant 0 : i32
    return %c0_i32, %c0_i32_0 : i32, i32
  }
  func.func @transform_4(%arg0: i32) -> (i32, i32) {
    %c0_i32 = arith.constant 0 : i32
    %c0_i32_0 = arith.constant 0 : i32
    %c0_i32_1 = arith.constant 0 : i32
    return %c0_i32, %c0_i32_0 : i32, i32
  }
  func.func @transform_5(%arg0: i32) -> (i32, i32) {
    %c0_i32 = arith.constant 0 : i32
    %c0_i32_0 = arith.constant 0 : i32
    %c0_i32_1 = arith.constant 0 : i32
    return %c0_i32, %c0_i32_0 : i32, i32
  }
  func.func @transform_6(%arg0: i32) -> (i32, i32) {
    %c0_i32 = arith.constant 0 : i32
    %c0_i32_0 = arith.constant 0 : i32
    return %arg0, %c0_i32 : i32, i32
  }
  func.func @transform_7(%arg0: i32) -> (i32, i32) {
    %c0_i32 = arith.constant 0 : i32
    %c0_i32_0 = arith.constant 0 : i32
    %c0_i32_1 = arith.constant 0 : i32
    return %c0_i32, %c0_i32_0 : i32, i32
  }
}

module attributes {stable_mosaic.version = 11 : i64} {
  func.func @_update_c_kernel(%arg0: i32, %arg1: memref<128x128xf32, #tpu.memory_space<vmem>>, %arg2: memref<2x128xf32, #tpu.memory_space<vmem>>, %arg3: memref<1x128xf32, #tpu.memory_space<vmem>>, %arg4: memref<1x128xf32, #tpu.memory_space<vmem>>, %arg5: memref<128x128xbf16, #tpu.memory_space<vmem>>) attributes {dimension_semantics = [#tpu.dimension_semantics<parallel>], iteration_bounds = array<i64: 1>, scalar_prefetch = 0 : i64, scratch_operands = 0 : i64, tpu.core_type = #tpu.core_type<tc>, window_params = [{transform_indices = @transform_0, window_bounds = array<i64: 128, 128>}, {pipeline_mode = #tpu.pipeline_mode<synchronous>, transform_indices = @transform_1, window_bounds = array<i64: 2, 128>}, {pipeline_mode = #tpu.pipeline_mode<synchronous>, transform_indices = @transform_2, window_bounds = array<i64: 1, 128>}, {pipeline_mode = #tpu.pipeline_mode<synchronous>, transform_indices = @transform_3, window_bounds = array<i64: 1, 128>}, {transform_indices = @transform_4, window_bounds = array<i64: 128, 128>}]} {
    %c0 = arith.constant 0 : index
    %c0_0 = arith.constant 0 : index
    %0 = vector.load %arg2[%c0, %c0_0] : memref<2x128xf32, #tpu.memory_space<vmem>>, vector<1x128xf32>
    %cst = arith.constant 6.250000e-02 : f32
    %1 = vector.broadcast %cst : f32 to vector<1x128xf32>
    %2 = arith.mulf %0, %1 : vector<1x128xf32>
    %c1 = arith.constant 1 : index
    %c0_1 = arith.constant 0 : index
    %3 = vector.load %arg2[%c1, %c0_1] : memref<2x128xf32, #tpu.memory_space<vmem>>, vector<1x128xf32>
    %cst_2 = arith.constant 6.250000e-02 : f32
    %4 = vector.broadcast %cst_2 : f32 to vector<1x128xf32>
    %5 = arith.mulf %3, %4 : vector<1x128xf32>
    %6 = arith.mulf %2, %2 : vector<1x128xf32>
    %7 = arith.subf %5, %6 : vector<1x128xf32>
    %cst_3 = arith.constant 0.000000e+00 : f32
    %8 = vector.broadcast %cst_3 : f32 to vector<1x128xf32>
    %9 = arith.maximumf %7, %8 : vector<1x128xf32>
    %c0_4 = arith.constant 0 : index
    %c0_5 = arith.constant 0 : index
    %10 = vector.load %arg1[%c0_4, %c0_5] : memref<128x128xf32, #tpu.memory_space<vmem>>, vector<128x128xf32>
    %11 = vector.broadcast %2 : vector<1x128xf32> to vector<128x128xf32>
    %12 = arith.subf %10, %11 : vector<128x128xf32>
    %cst_6 = arith.constant 9.99999974E-6 : f32
    %13 = vector.broadcast %cst_6 : f32 to vector<1x128xf32>
    %14 = arith.addf %9, %13 : vector<1x128xf32>
    %15 = math.rsqrt %14 : vector<1x128xf32>
    %c0_7 = arith.constant 0 : index
    %c0_8 = arith.constant 0 : index
    %16 = vector.load %arg3[%c0_7, %c0_8] : memref<1x128xf32, #tpu.memory_space<vmem>>, vector<1x128xf32>
    %17 = arith.mulf %15, %16 : vector<1x128xf32>
    %18 = vector.broadcast %17 : vector<1x128xf32> to vector<128x128xf32>
    %19 = arith.mulf %12, %18 : vector<128x128xf32>
    %c0_9 = arith.constant 0 : index
    %c0_10 = arith.constant 0 : index
    %20 = vector.load %arg4[%c0_9, %c0_10] : memref<1x128xf32, #tpu.memory_space<vmem>>, vector<1x128xf32>
    %21 = vector.broadcast %20 : vector<1x128xf32> to vector<128x128xf32>
    %22 = arith.addf %19, %21 : vector<128x128xf32>
    %cst_11 = arith.constant 0.000000e+00 : f32
    %23 = vector.broadcast %cst_11 : f32 to vector<128x128xf32>
    %24 = arith.maximumf %22, %23 : vector<128x128xf32>
    %25 = arith.truncf %24 : vector<128x128xf32> to vector<128x128xbf16>
    %c0_12 = arith.constant 0 : index
    %c0_13 = arith.constant 0 : index
    %26 = vector.load %arg5[%c0_12, %c0_13] : memref<128x128xbf16, #tpu.memory_space<vmem>>, vector<128x128xbf16>
    tpu.vector_store %arg5[%c0_12, %c0_13], %25 {strides = array<i32>} : memref<128x128xbf16, #tpu.memory_space<vmem>>, vector<128x128xbf16>,
    return
  }
  func.func @transform_0(%arg0: i32) -> (i32, i32) {
    %c0_i32 = arith.constant 0 : i32
    %c0_i32_0 = arith.constant 0 : i32
    return %arg0, %c0_i32 : i32, i32
  }
  func.func @transform_1(%arg0: i32) -> (i32, i32) {
    %c0_i32 = arith.constant 0 : i32
    %c0_i32_0 = arith.constant 0 : i32
    %c0_i32_1 = arith.constant 0 : i32
    return %c0_i32, %c0_i32_0 : i32, i32
  }
  func.func @transform_2(%arg0: i32) -> (i32, i32) {
    %c0_i32 = arith.constant 0 : i32
    %c0_i32_0 = arith.constant 0 : i32
    %c0_i32_1 = arith.constant 0 : i32
    return %c0_i32, %c0_i32_0 : i32, i32
  }
  func.func @transform_3(%arg0: i32) -> (i32, i32) {
    %c0_i32 = arith.constant 0 : i32
    %c0_i32_0 = arith.constant 0 : i32
    %c0_i32_1 = arith.constant 0 : i32
    return %c0_i32, %c0_i32_0 : i32, i32
  }
  func.func @transform_4(%arg0: i32) -> (i32, i32) {
    %c0_i32 = arith.constant 0 : i32
    %c0_i32_0 = arith.constant 0 : i32
    return %arg0, %c0_i32 : i32, i32
  }
}

module attributes {stable_mosaic.version = 11 : i64} {
  func.func @_readout_kernel(%arg0: memref<8x128xf32, #tpu.memory_space<vmem>>, %arg1: memref<8x128xf32, #tpu.memory_space<vmem>>, %arg2: memref<128x128xbf16, #tpu.memory_space<vmem>>, %arg3: memref<1x128xf32, #tpu.memory_space<vmem>>, %arg4: memref<128x128xbf16, #tpu.memory_space<vmem>>, %arg5: memref<1x128xf32, #tpu.memory_space<vmem>>, %arg6: memref<128x128xbf16, #tpu.memory_space<vmem>>, %arg7: memref<128x128xbf16, #tpu.memory_space<vmem>>, %arg8: memref<1x128xf32, #tpu.memory_space<vmem>>, %arg9: memref<8x128xf32, #tpu.memory_space<vmem>>) attributes {dimension_semantics = [], scalar_prefetch = 0 : i64, scratch_operands = 0 : i64, tpu.core_type = #tpu.core_type<tc>} {
    %c0 = arith.constant 0 : index
    %c0_0 = arith.constant 0 : index
    %0 = vector.load %arg0[%c0, %c0_0] : memref<8x128xf32, #tpu.memory_space<vmem>>, vector<8x128xf32>
    %1 = arith.truncf %0 : vector<8x128xf32> to vector<8x128xbf16>
    %c0_1 = arith.constant 0 : index
    %c0_2 = arith.constant 0 : index
    %2 = vector.load %arg2[%c0_1, %c0_2] : memref<128x128xbf16, #tpu.memory_space<vmem>>, vector<128x128xbf16>
    %cst = arith.constant dense<0.000000e+00> : vector<8x128xf32>
    %3 = tpu.matmul %1, %2, %cst {dimension_numbers = #tpu.dot_dimension_numbers<[1], [0], [0], [1], [0, 0, 1, 1], [], []>} : vector<8x128xbf16>, vector<128x128xbf16>, vector<8x128xf32> -> vector<8x128xf32>
    %c0_3 = arith.constant 0 : index
    %c0_4 = arith.constant 0 : index
    %4 = vector.load %arg3[%c0_3, %c0_4] : memref<1x128xf32, #tpu.memory_space<vmem>>, vector<1x128xf32>
    %5 = vector.broadcast %4 : vector<1x128xf32> to vector<8x128xf32>
    %6 = arith.addf %3, %5 : vector<8x128xf32>
    %cst_5 = arith.constant 0.000000e+00 : f32
    %7 = vector.broadcast %cst_5 : f32 to vector<8x128xf32>
    %8 = arith.maximumf %6, %7 : vector<8x128xf32>
    %c0_6 = arith.constant 0 : index
    %c0_7 = arith.constant 0 : index
    %9 = vector.load %arg1[%c0_6, %c0_7] : memref<8x128xf32, #tpu.memory_space<vmem>>, vector<8x128xf32>
    %10 = arith.truncf %9 : vector<8x128xf32> to vector<8x128xbf16>
    %c0_8 = arith.constant 0 : index
    %c0_9 = arith.constant 0 : index
    %11 = vector.load %arg4[%c0_8, %c0_9] : memref<128x128xbf16, #tpu.memory_space<vmem>>, vector<128x128xbf16>
    %cst_10 = arith.constant dense<0.000000e+00> : vector<8x128xf32>
    %12 = tpu.matmul %10, %11, %cst_10 {dimension_numbers = #tpu.dot_dimension_numbers<[1], [0], [0], [1], [0, 0, 1, 1], [], []>} : vector<8x128xbf16>, vector<128x128xbf16>, vector<8x128xf32> -> vector<8x128xf32>
    %c0_11 = arith.constant 0 : index
    %c0_12 = arith.constant 0 : index
    %13 = vector.load %arg5[%c0_11, %c0_12] : memref<1x128xf32, #tpu.memory_space<vmem>>, vector<1x128xf32>
    %14 = vector.broadcast %13 : vector<1x128xf32> to vector<8x128xf32>
    %15 = arith.addf %12, %14 : vector<8x128xf32>
    %cst_13 = arith.constant 0.000000e+00 : f32
    %16 = vector.broadcast %cst_13 : f32 to vector<8x128xf32>
    %17 = arith.maximumf %15, %16 : vector<8x128xf32>
    %18 = arith.truncf %8 : vector<8x128xf32> to vector<8x128xbf16>
    %c0_14 = arith.constant 0 : index
    %c0_15 = arith.constant 0 : index
    %19 = vector.load %arg6[%c0_14, %c0_15] : memref<128x128xbf16, #tpu.memory_space<vmem>>, vector<128x128xbf16>
    %cst_16 = arith.constant dense<0.000000e+00> : vector<8x128xf32>
    %20 = tpu.matmul %18, %19, %cst_16 {dimension_numbers = #tpu.dot_dimension_numbers<[1], [0], [0], [1], [0, 0, 1, 1], [], []>} : vector<8x128xbf16>, vector<128x128xbf16>, vector<8x128xf32> -> vector<8x128xf32>
    %21 = arith.truncf %17 : vector<8x128xf32> to vector<8x128xbf16>
    %c0_17 = arith.constant 0 : index
    %c0_18 = arith.constant 0 : index
    %22 = vector.load %arg7[%c0_17, %c0_18] : memref<128x128xbf16, #tpu.memory_space<vmem>>, vector<128x128xbf16>
    %cst_19 = arith.constant dense<0.000000e+00> : vector<8x128xf32>
    %23 = tpu.matmul %21, %22, %cst_19 {dimension_numbers = #tpu.dot_dimension_numbers<[1], [0], [0], [1], [0, 0, 1, 1], [], []>} : vector<8x128xbf16>, vector<128x128xbf16>, vector<8x128xf32> -> vector<8x128xf32>
    %24 = arith.addf %20, %23 : vector<8x128xf32>
    %c0_20 = arith.constant 0 : index
    %c0_21 = arith.constant 0 : index
    %25 = vector.load %arg8[%c0_20, %c0_21] : memref<1x128xf32, #tpu.memory_space<vmem>>, vector<1x128xf32>
    %26 = vector.broadcast %25 : vector<1x128xf32> to vector<8x128xf32>
    %27 = arith.addf %24, %26 : vector<8x128xf32>
    %c0_22 = arith.constant 0 : index
    %c0_23 = arith.constant 0 : index
    %28 = vector.load %arg9[%c0_22, %c0_23] : memref<8x128xf32, #tpu.memory_space<vmem>>, vector<8x128xf32>
    tpu.vector_store %arg9[%c0_22, %c0_23], %27 {strides = array<i32>} : memref<8x128xf32, #tpu.memory_space<vmem>>, vector<8x128xf32>,
    return
  }
}

</mosaic_0001>

<bundles_post_ra>
// kernel: mpnn_forward.20
= control target key start
LH: loop header
LB: loop body
LE: loop exit
PB: predicated region body
PF: predicated region fallthrough
CT: control target
= control target key end

     0   :  { %v54_v11 = vlaneseq  ;;  %s797_s4 = inlined_call_operand.vmem [shape: bf16[128,128], index: 4, kind: input, shape index: {}]   ;;  %s798_s1 = inlined_call_operand.vmem [shape: f32[2,128], index: 1, kind: input, shape index: {}]   ;;  %s799_s0 = inlined_call_operand.vmem [shape: f32[128,128], index: 0, kind: input, shape index: {}]   ;;  %s800_s2 = inlined_call_operand.vmem [shape: f32[1,128], index: 2, kind: input, shape index: {}]   ;;  %s801_s3 = inlined_call_operand.vmem [shape: f32[1,128], index: 3, kind: input, shape index: {}]   ;;  %s802_s7 = inlined_call_operand.vmem [shape: f32[2,128], index: 7, kind: output, shape index: {1}]   ;;  %s803_s5 = inlined_call_operand.vmem [shape: f32[1,128], index: 5, kind: input, shape index: {}]   ;;  %s804_s6 = inlined_call_operand.vmem [shape: f32[128,128], index: 6, kind: output, shape index: {0}]  }
   0x1   :  { %v575_v0 = vld [vmem:[%s797_s4] sm:$0xff]   ;;  %v576_v1 = vld [vmem:[%s797_s4 + $0x8] sm:$0xff]   ;;  %v577_v2 = vld [vmem:[%s797_s4 + $0x10] sm:$0xff]  }
   0x2   :  { %526 = vmatprep.subr.bf16.mxu0 %v575_v0  ;;  %558 = vmatprep.subr.bf16.mxu1 %v575_v0  ;;  %v578_v3 = vld [vmem:[%s797_s4 + $0x18] sm:$0xff]   ;;  %v31_v4 = vld [vmem:[%s798_s1] sm:$0x1]  ;;  %v33_v5 = vld [vmem:[%s798_s1 + $0x1] sm:$0x1]  ;;  %v55_v14 = vshrl.u32 %v54_v11, 7 }
   0x3   :  { %527 = vmatpush3.bf16.msra.mxu0 %v575_v0  ;;  %566 = vmatpush3.bf16.msra.mxu1 %v575_v0  ;;  %v32_v6 = vmul.f32 0.03125, %v31_v4  ;;  %v34_v7 = vmul.f32 0.03125, %v33_v5  ;;  %v579_v9 = vld [vmem:[%s797_s4 + $0x20] sm:$0xff]   ;;  %v580_v13 = vld [vmem:[%s797_s4 + $0x28] sm:$0xff]   ;;  %v581_v16 = vld [vmem:[%s797_s4 + $0x30] sm:$0xff]  }
   0x4   :  { %528 = vmatprep.subr.bf16.mxu0 %v576_v1  ;;  %559 = vmatprep.subr.bf16.mxu1 %v576_v1  ;;  %v56_v17 = vsub.s32 0, %v55_v14  ;;  %v582_v18 = vld [vmem:[%s797_s4 + $0x38] sm:$0xff]   ;;  %v38_v19 = vld [vmem:[%s799_s0] sm:$0xff]  ;;  %v39_v20 = vld [vmem:[%s799_s0 + $0x8] sm:$0xff] }
   0x5   :  { %v35_v8 = vmul.f32 %v32_v6, %v32_v6  ;;  %v76_v22 = vld [vmem:[%s800_s2] sm:$0x1]  ;;  %v40_v23 = vld [vmem:[%s799_s0 + $0x10] sm:$0xff]  ;;  %v41_v24 = vld [vmem:[%s799_s0 + $0x18] sm:$0xff] }
   0x6   :  { %v662_v21 = vrot.slane %v32_v6, %v56_v17  ;;  %v46_v25 = vld [vmem:[%s799_s0 + $0x40] sm:$0xff]  ;;  %v47_v26 = vld [vmem:[%s799_s0 + $0x48] sm:$0xff]  ;;  %v48_v27 = vld [vmem:[%s799_s0 + $0x50] sm:$0xff] }
   0x7   :  { %529 = vmatpush3.bf16.msra.mxu0 %v576_v1  ;;  %567 = vmatpush3.bf16.msra.mxu1 %v576_v1  ;;  %v36_v10 = vsub.f32 %v34_v7, %v35_v8  ;;  %v49_v28 = vld [vmem:[%s799_s0 + $0x58] sm:$0xff]  ;;  %v42_v29 = vld [vmem:[%s799_s0 + $0x20] sm:$0xff]  ;;  %v43_v30 = vld [vmem:[%s799_s0 + $0x28] sm:$0xff] }
   0x8   :  { %530 = vmatprep.subr.bf16.mxu0 %v577_v2  ;;  %560 = vmatprep.subr.bf16.mxu1 %v577_v2  ;;  %v58_v32 = vsub.f32 %v38_v19, %v662_v21  ;;  %v59_v33 = vsub.f32 %v39_v20, %v662_v21  ;;  %v60_v34 = vsub.f32 %v40_v23, %v662_v21  ;;  %v50_v35 = vld [vmem:[%s799_s0 + $0x60] sm:$0xff]  ;;  %v51_v36 = vld [vmem:[%s799_s0 + $0x68] sm:$0xff]  ;;  %v44_v37 = vld [vmem:[%s799_s0 + $0x30] sm:$0xff] }
   0x9   :  { %v37_v12 = vmax.f32 %v36_v10, 0.0  ;;  %v61_v39 = vsub.f32 %v41_v24, %v662_v21  ;;  %v66_v40 = vsub.f32 %v46_v25, %v662_v21  ;;  %v67_v41 = vsub.f32 %v47_v26, %v662_v21  ;;  %v45_v42 = vld [vmem:[%s799_s0 + $0x38] sm:$0xff]  ;;  %v52_v43 = vld [vmem:[%s799_s0 + $0x70] sm:$0xff]  ;;  %v500_v52 = vld [vmem:[%s801_s3] ss:$0 sm:$0xff] }
   0xa   :  { %v715_v44 = vld [vmem:[%s799_s0 + $0x78] sm:$0xff]  ;;  %v68_v45 = vsub.f32 %v48_v27, %v662_v21  ;;  %v69_v46 = vsub.f32 %v49_v28, %v662_v21  ;;  %v62_v47 = vsub.f32 %v42_v29, %v662_v21  ;;  %v63_v49 = vsub.f32 %v43_v30, %v662_v21 }
   0xb   :  { %531 = vmatpush3.bf16.msra.mxu0 %v577_v2  ;;  %568 = vmatpush3.bf16.msra.mxu1 %v577_v2  ;;  %v74_v15 = vadd.f32 1e-05, %v37_v12  ;;  %v70_v50 = vsub.f32 %v50_v35, %v662_v21  ;;  %v71_v51 = vsub.f32 %v51_v36, %v662_v21  ;;  %v64_v53 = vsub.f32 %v44_v37, %v662_v21 }
   0xc   :  { %532 = vmatprep.subr.bf16.mxu0 %v578_v3  ;;  %561 = vmatprep.subr.bf16.mxu1 %v578_v3  ;;  %v65_v54 = vsub.f32 %v45_v42, %v662_v21  ;;  %v72_v55 = vsub.f32 %v52_v43, %v662_v21  ;;  %v73_v56 = vsub.f32 %v715_v44, %v662_v21 }
   0xd   :  { %583 = vrsqrt.f32 %v74_v15 }
   0xf   :  { %533 = vmatpush3.bf16.msra.mxu0 %v578_v3  ;;  %569 = vmatpush3.bf16.msra.mxu1 %v578_v3 }
  0x10   :  { %534 = vmatprep.subr.bf16.mxu0 %v579_v9  ;;  %562 = vmatprep.subr.bf16.mxu1 %v579_v9 }
  0x13   :  { %535 = vmatpush3.bf16.msra.mxu0 %v579_v9  ;;  %570 = vmatpush3.bf16.msra.mxu1 %v579_v9 }
  0x14   :  { %536 = vmatprep.subr.bf16.mxu0 %v580_v13  ;;  %563 = vmatprep.subr.bf16.mxu1 %v580_v13 }
  0x17   :  { %537 = vmatpush3.bf16.msra.mxu0 %v580_v13  ;;  %571 = vmatpush3.bf16.msra.mxu1 %v580_v13  ;;  %v584_v31 = vpop.eup %583 }
  0x18   :  { %538 = vmatprep.subr.bf16.mxu0 %v581_v16  ;;  %564 = vmatprep.subr.bf16.mxu1 %v581_v16  ;;  %v77_v38 = vmul.f32 %v584_v31, %v76_v22 }
  0x1a   :  { %v81_v48 = vrot.slane %v77_v38, %v56_v17 }
  0x1b   :  { %539 = vmatpush3.bf16.msra.mxu0 %v581_v16  ;;  %572 = vmatpush3.bf16.msra.mxu1 %v581_v16 }
  0x1c   :  { %540 = vmatprep.subr.bf16.mxu0 %v582_v18  ;;  %565 = vmatprep.subr.bf16.mxu1 %v582_v18  ;;  %v82_v57 = vmul.f32 %v81_v48, %v58_v32  ;;  %v83_v58 = vmul.f32 %v81_v48, %v59_v33  ;;  %v84_v59 = vmul.f32 %v81_v48, %v60_v34 }
  0x1d   :  { %v85_v60 = vmul.f32 %v81_v48, %v61_v39  ;;  %v90_v61 = vmul.f32 %v81_v48, %v66_v40  ;;  %v91_v62 = vmul.f32 %v81_v48, %v67_v41  ;;  %v92_v63 = vmul.f32 %v81_v48, %v68_v45 }
  0x1e   :  { %v93_v0 = vmul.f32 %v81_v48, %v69_v46  ;;  %v105_v1 = vadd.f32 %v500_v52, %v82_v57  ;;  %v106_v2 = vadd.f32 %v500_v52, %v83_v58  ;;  %v107_v3 = vadd.f32 %v500_v52, %v84_v59 }
  0x1f   :  { %541 = vmatpush3.bf16.msra.mxu0 %v582_v18  ;;  %573 = vmatpush3.bf16.msra.mxu1 %v582_v18  ;;  %v108_v4 = vadd.f32 %v500_v52, %v85_v60  ;;  %v113_v5 = vadd.f32 %v500_v52, %v90_v61  ;;  %v114_v6 = vadd.f32 %v500_v52, %v91_v62 }
  0x20   :  { %v115_v7 = vadd.f32 %v500_v52, %v92_v63  ;;  %v116_v8 = vadd.f32 %v500_v52, %v93_v0  ;;  %v121_v9 = vmax.f32 %v105_v1, 0.0  ;;  %v122_v10 = vmax.f32 %v106_v2, 0.0 }
  0x21   :  { %v123_v11 = vmax.f32 %v107_v3, 0.0  ;;  %v124_v12 = vmax.f32 %v108_v4, 0.0  ;;  %v129_v13 = vmax.f32 %v113_v5, 0.0  ;;  %v130_v14 = vmax.f32 %v114_v6, 0.0 }
  0x22   :  { %v131_v15 = vmax.f32 %v115_v7, 0.0  ;;  %v132_v16 = vmax.f32 %v116_v8, 0.0  ;;  %v137_v17 = vpack.c.bf16 %v122_v10, %v121_v9  ;;  %v86_v19 = vmul.f32 %v81_v48, %v62_v47 }
  0x23   :  { %v138_v18 = vpack.c.bf16 %v124_v12, %v123_v11  ;;  %v87_v20 = vmul.f32 %v81_v48, %v63_v49  ;;  %v141_v21 = vpack.c.bf16 %v130_v14, %v129_v13  ;;  %v94_v23 = vmul.f32 %v81_v48, %v70_v50 }
  0x24   :  { %v142_v22 = vpack.c.bf16 %v132_v16, %v131_v15  ;;  %v95_v24 = vmul.f32 %v81_v48, %v71_v51  ;;  %542 = vmatprep.mubr.bf16.mxu0 %v137_v17  ;;  %v109_v25 = vadd.f32 %v500_v52, %v86_v19  ;;  %v88_v27 = vmul.f32 %v81_v48, %v64_v53 }
  0x25   :  { %v110_v26 = vadd.f32 %v500_v52, %v87_v20  ;;  %v89_v28 = vmul.f32 %v81_v48, %v65_v54  ;;  %543 = vmatmul.mubr.bf16.vlgmr.msra.gmra.mrb[0].mxu0 %v138_v18  ;;  %550 = vmatprep.mubr.bf16.mxu1 %v141_v21  ;;  %v117_v29 = vadd.f32 %v500_v52, %v94_v23  ;;  %v585_v50 = vmov 0.0  }
  0x26   :  { %v118_v30 = vadd.f32 %v500_v52, %v95_v24  ;;  %v96_v31 = vmul.f32 %v81_v48, %v72_v55  ;;  %551 = vmatmul.mubr.bf16.vlgmr.msra.gmra.mrb[0].mxu1 %v142_v22  ;;  %v125_v32 = vmax.f32 %v109_v25, 0.0  ;;  %v111_v34 = vadd.f32 %v500_v52, %v88_v27  ;;  %30 = vst [vmem:[%s802_s7] sm:$0x3] %v585_v50 }
  0x27   :  { %v126_v33 = vmax.f32 %v110_v26, 0.0  ;;  %v112_v35 = vadd.f32 %v500_v52, %v89_v28  ;;  %v133_v36 = vmax.f32 %v117_v29, 0.0  ;;  %v97_v38 = vmul.f32 %v81_v48, %v73_v56  ;;  %v501_v48 = vld [vmem:[%s803_s5] ss:$0 sm:$0xff] }
  0x28   :  { %v134_v37 = vmax.f32 %v118_v30, 0.0  ;;  %v119_v39 = vadd.f32 %v500_v52, %v96_v31  ;;  %v127_v41 = vmax.f32 %v111_v34, 0.0 }
  0x29   :  { %v139_v40 = vpack.c.bf16 %v126_v33, %v125_v32  ;;  %v128_v42 = vmax.f32 %v112_v35, 0.0  ;;  %v120_v44 = vadd.f32 %v500_v52, %v97_v38 }
  0x2a   :  { %v143_v43 = vpack.c.bf16 %v134_v37, %v133_v36  ;;  %v135_v45 = vmax.f32 %v119_v39, 0.0 }
  0x2b   :  { %546 = vmatprep.mubr.bf16.mxu0 %v139_v40  ;;  %v140_v46 = vpack.c.bf16 %v128_v42, %v127_v41  ;;  %v136_v47 = vmax.f32 %v120_v44, 0.0 }
  0x2c   :  { %554 = vmatprep.mubr.bf16.mxu1 %v143_v43 }
  0x2d   :  { %547 = vmatmul.mubr.bf16.gmra.mrb[4].mxu0 %v140_v46  ;;  %v144_v49 = vpack.c.bf16 %v136_v47, %v135_v45  ;;  %v428_v38 = vld [vmem:[%s802_s7] sm:$0x1]  ;;  %v452_v41 = vld [vmem:[%s802_s7 + $0x1] sm:$0x1] }
  0x2f   :  { %555 = vmatmul.mubr.bf16.gmra.mrb[4].mxu1 %v144_v49 }
  0xf8   :  { %v544_v51 = vpop.f32.mrb[0].mxu0 }
  0xf9   :  { %v259_v53 = vadd.f32 %v544_v51, %v501_v48  ;;  %v250_v52 = vpop.f32.mrb[1].mxu0  ;;  %v552_v54 = vpop.f32.mrb[0].mxu1 }
  0xfa   :  { %v251_v55 = vadd.f32 %v501_v48, %v250_v52  ;;  %v545_v56 = vpop.f32.mrb[2].mxu0  ;;  %v291_v57 = vadd.f32 %v552_v54, %v501_v48  ;;  %v282_v58 = vpop.f32.mrb[1].mxu1 }
  0xfb   :  { %315 = vst [vmem:[%s804_s6 + $0x10] sm:$0xff] %v259_v53  ;;  %v262_v59 = vadd.f32 %v545_v56, %v501_v48  ;;  %v253_v60 = vpop.f32.mrb[3].mxu0  ;;  %v283_v61 = vadd.f32 %v501_v48, %v282_v58  ;;  %v553_v62 = vpop.f32.mrb[2].mxu1  ;;  %v455_v6 = vmul.f32 %v259_v53, %v259_v53 }
  0xfc   :  { %313 = vst [vmem:[%s804_s6] sm:$0xff] %v251_v55  ;;  %v254_v63 = vadd.f32 %v501_v48, %v253_v60  ;;  %323 = vst [vmem:[%s804_s6 + $0x50] sm:$0xff] %v291_v57  ;;  %v294_v0 = vadd.f32 %v553_v62, %v501_v48  ;;  %v285_v1 = vpop.f32.mrb[3].mxu1  ;;  %v453_v3 = vmul.f32 %v251_v55, %v251_v55 }
  0xfd   :  { %316 = vst [vmem:[%s804_s6 + $0x18] sm:$0xff] %v262_v59  ;;  %321 = vst [vmem:[%s804_s6 + $0x40] sm:$0xff] %v283_v61  ;;  %v286_v2 = vadd.f32 %v501_v48, %v285_v1  ;;  %v456_v12 = vmul.f32 %v262_v59, %v262_v59 }
  0xfe   :  { %314 = vst [vmem:[%s804_s6 + $0x8] sm:$0xff] %v254_v63  ;;  %v429_v4 = vadd.f32 %v254_v63, %v251_v55  ;;  %v454_v5 = vmul.f32 %v254_v63, %v254_v63  ;;  %324 = vst [vmem:[%s804_s6 + $0x58] sm:$0xff] %v294_v0 }
  0xff   :  { %322 = vst [vmem:[%s804_s6 + $0x48] sm:$0xff] %v286_v2 }
 0x100   :  { %v430_v7 = vadd.f32 %v429_v4, %v259_v53  ;;  %v469_v8 = vadd.f32 %v454_v5, %v453_v3  ;;  %v548_v9 = vpop.f32.mrb[4].mxu0 }
 0x101   :  { %v275_v10 = vadd.f32 %v548_v9, %v501_v48  ;;  %v266_v11 = vpop.f32.mrb[5].mxu0 }
 0x102   :  { %v431_v13 = vadd.f32 %v430_v7, %v262_v59  ;;  %v470_v14 = vadd.f32 %v469_v8, %v455_v6  ;;  %v556_v15 = vpop.f32.mrb[4].mxu1  ;;  %v267_v16 = vadd.f32 %v501_v48, %v266_v11  ;;  %v549_v17 = vpop.f32.mrb[6].mxu0 }
 0x103   :  { %319 = vst [vmem:[%s804_s6 + $0x30] sm:$0xff] %v275_v10  ;;  %v307_v18 = vadd.f32 %v556_v15, %v501_v48  ;;  %v298_v19 = vpop.f32.mrb[5].mxu1  ;;  %v278_v20 = vadd.f32 %v549_v17, %v501_v48  ;;  %v269_v21 = vpop.f32.mrb[7].mxu0 }
 0x104   :  { %v444_v22 = vrot.slane %v431_v13, 4  ;;  %v471_v23 = vadd.f32 %v470_v14, %v456_v12  ;;  %317 = vst [vmem:[%s804_s6 + $0x20] sm:$0xff] %v267_v16  ;;  %v299_v24 = vadd.f32 %v501_v48, %v298_v19  ;;  %v557_v25 = vpop.f32.mrb[6].mxu1  ;;  %v270_v26 = vadd.f32 %v501_v48, %v269_v21 }
 0x105   :  { %327 = vst [vmem:[%s804_s6 + $0x70] sm:$0xff] %v307_v18  ;;  %320 = vst [vmem:[%s804_s6 + $0x38] sm:$0xff] %v278_v20  ;;  %v310_v27 = vadd.f32 %v557_v25, %v501_v48  ;;  %v301_v28 = vpop.f32.mrb[7].mxu1 }
 0x106   :  { %v445_v29 = vadd.f32 %v444_v22, %v431_v13  ;;  %v484_v30 = vrot.slane %v471_v23, 4  ;;  %325 = vst [vmem:[%s804_s6 + $0x60] sm:$0xff] %v299_v24  ;;  %318 = vst [vmem:[%s804_s6 + $0x28] sm:$0xff] %v270_v26  ;;  %v302_v31 = vadd.f32 %v501_v48, %v301_v28 }
 0x107   :  { %328 = vst [vmem:[%s804_s6 + $0x78] sm:$0xff] %v310_v27 }
 0x108   :  { %v446_v32 = vrot.slane %v445_v29, 2  ;;  %v485_v33 = vadd.f32 %v484_v30, %v471_v23  ;;  %326 = vst [vmem:[%s804_s6 + $0x68] sm:$0xff] %v302_v31 }
 0x10a   :  { %v447_v34 = vadd.f32 %v446_v32, %v445_v29  ;;  %v486_v35 = vrot.slane %v485_v33, 2 }
 0x10c   :  { %v448_v36 = vrot.slane %v447_v34, 1  ;;  %v487_v37 = vadd.f32 %v486_v35, %v485_v33 }
 0x10e   :  { %v449_v39 = vadd.f32 %v448_v36, %v447_v34  ;;  %v488_v40 = vrot.slane %v487_v37, 1 }
 0x110   :  { %v450_v42 = vadd.f32 %v449_v39, %v428_v38  ;;  %v489_v43 = vadd.f32 %v488_v40, %v487_v37 }
 0x112   :  { %451 = vst [vmem:[%s802_s7] sm:$0x1] %v450_v42  ;;  %v490_v44 = vadd.f32 %v489_v43, %v452_v41 }
 0x114   :  { %491 = vst [vmem:[%s802_s7 + $0x1] sm:$0x1] %v490_v44 }

// kernel: mpnn_forward.19
= control target key start
LH: loop header
LB: loop body
LE: loop exit
PB: predicated region body
PF: predicated region fallthrough
CT: control target
= control target key end

     0   :  { %s846_s3 = inlined_call_operand.vmem [shape: bf16[128,128], index: 3, kind: input, shape index: {}]   ;;  %s847_s0 = inlined_call_operand.<no memory space> [shape: f32[1], index: 0, kind: input, shape index: {}]   ;;  %s848_s1 = inlined_call_operand.vmem [shape: bf16[128,128], index: 1, kind: input, shape index: {}]   ;;  %s849_s2 = inlined_call_operand.vmem [shape: bf16[128,128], index: 2, kind: input, shape index: {}]   ;;  %s850_s6 = inlined_call_operand.vmem [shape: f32[2,128], index: 6, kind: output, shape index: {1}]   ;;  %s851_s4 = inlined_call_operand.vmem [shape: f32[1,128], index: 4, kind: input, shape index: {}]   ;;  %s852_s5 = inlined_call_operand.vmem [shape: f32[128,128], index: 5, kind: output, shape index: {0}]  }
   0x1   :  { %v643_v0 = vld [vmem:[%s846_s3] sm:$0xff]   ;;  %v644_v1 = vld [vmem:[%s846_s3 + $0x8] sm:$0xff]   ;;  %v645_v2 = vld [vmem:[%s846_s3 + $0x10] sm:$0xff]   ;;  %s62_s29 = sadd.f32 1.0, %s847_s0 }
   0x2   :  { %594 = vmatprep.subr.bf16.mxu0 %v643_v0  ;;  %626 = vmatprep.subr.bf16.mxu1 %v643_v0  ;;  %v646_v3 = vld [vmem:[%s846_s3 + $0x18] sm:$0xff]   ;;  %v501_v4 = vld [vmem:[%s848_s1] sm:$0xff]   ;;  %v571_v22 = vld [vmem:[%s849_s2 + $0x8] sm:$0xff]  }
   0x3   :  { %595 = vmatpush3.bf16.msra.mxu0 %v643_v0  ;;  %634 = vmatpush3.bf16.msra.mxu1 %v643_v0  ;;  %v533_v5 = vld [vmem:[%s849_s2] sm:$0xff]   ;;  %v708_v6 = vstv %s62_s29  ;;  %v502_v7 = vunpack.c.l.bf16 %v501_v4  ;;  %v503_v8 = vunpack.c.h.bf16 %v501_v4  ;;  %v575_v25 = vld [vmem:[%s849_s2 + $0x28] sm:$0xff]   ;;  %v572_v27 = vld [vmem:[%s849_s2 + $0x10] sm:$0xff]   ;;  %v538_v29 = vunpack.c.l.bf16 %v571_v22 }
   0x4   :  { %596 = vmatprep.subr.bf16.mxu0 %v644_v1  ;;  %627 = vmatprep.subr.bf16.mxu1 %v644_v1  ;;  %v534_v9 = vunpack.c.l.bf16 %v533_v5  ;;  %v535_v10 = vunpack.c.h.bf16 %v533_v5  ;;  %v567_v11 = vld [vmem:[%s848_s1 + $0x20] sm:$0xff]   ;;  %v648_v28 = vld [vmem:[%s846_s3 + $0x28] sm:$0xff]   ;;  %v539_v30 = vunpack.c.h.bf16 %v571_v22  ;;  %v576_v33 = vld [vmem:[%s849_s2 + $0x30] sm:$0xff]   ;;  %v554_v35 = vunpack.c.l.bf16 %v575_v25 }
   0x5   :  { %v574_v12 = vld [vmem:[%s849_s2 + $0x20] sm:$0xff]   ;;  %v518_v16 = vunpack.c.l.bf16 %v567_v11  ;;  %v519_v17 = vunpack.c.h.bf16 %v567_v11  ;;  %v564_v34 = vld [vmem:[%s848_s1 + $0x8] sm:$0xff]   ;;  %v555_v36 = vunpack.c.h.bf16 %v575_v25  ;;  %v542_v39 = vunpack.c.l.bf16 %v572_v27  ;;  %v565_v40 = vld [vmem:[%s848_s1 + $0x10] sm:$0xff]  }
   0x6   :  { %v96_v13 = vmul.f32 %v534_v9, %v708_v6  ;;  %v97_v14 = vmul.f32 %v535_v10, %v708_v6  ;;  %v647_v15 = vld [vmem:[%s846_s3 + $0x20] sm:$0xff]   ;;  %v550_v18 = vunpack.c.l.bf16 %v574_v12  ;;  %v551_v19 = vunpack.c.h.bf16 %v574_v12  ;;  %v568_v38 = vld [vmem:[%s848_s1 + $0x28] sm:$0xff]   ;;  %v569_v42 = vld [vmem:[%s848_s1 + $0x30] sm:$0xff]  }
   0x7   :  { %597 = vmatpush3.bf16.msra.mxu0 %v644_v1  ;;  %635 = vmatpush3.bf16.msra.mxu1 %v644_v1  ;;  %v543_v41 = vunpack.c.h.bf16 %v572_v27  ;;  %v558_v43 = vunpack.c.l.bf16 %v576_v33  ;;  %v559_v44 = vunpack.c.h.bf16 %v576_v33  ;;  %v649_v45 = vld [vmem:[%s846_s3 + $0x30] sm:$0xff]   ;;  %v506_v46 = vunpack.c.l.bf16 %v564_v34  ;;  %v573_v58 = vld [vmem:[%s849_s2 + $0x18] sm:$0xff]  }
   0x8   :  { %598 = vmatprep.subr.bf16.mxu0 %v645_v2  ;;  %628 = vmatprep.subr.bf16.mxu1 %v645_v2  ;;  %v112_v20 = vadd.f32 %v502_v7, %v96_v13  ;;  %v113_v21 = vadd.f32 %v503_v8, %v97_v14  ;;  %v104_v23 = vmul.f32 %v550_v18, %v708_v6  ;;  %v507_v47 = vunpack.c.h.bf16 %v564_v34  ;;  %v577_v63 = vld [vmem:[%s849_s2 + $0x38] sm:$0xff]  }
   0x9   :  { %v105_v24 = vmul.f32 %v551_v19, %v708_v6  ;;  %v98_v48 = vmul.f32 %v538_v29, %v708_v6  ;;  %v99_v49 = vmul.f32 %v539_v30, %v708_v6  ;;  %v522_v50 = vunpack.c.l.bf16 %v568_v38  ;;  %v650_v0 = vld [vmem:[%s846_s3 + $0x38] sm:$0xff]  }
   0xa   :  { %v128_v26 = vpack.c.bf16 %v113_v21, %v112_v20  ;;  %v120_v31 = vadd.f32 %v518_v16, %v104_v23  ;;  %v523_v51 = vunpack.c.h.bf16 %v568_v38  ;;  %v106_v52 = vmul.f32 %v554_v35, %v708_v6  ;;  %v566_v5 = vld [vmem:[%s848_s1 + $0x18] sm:$0xff]  }
   0xb   :  { %599 = vmatpush3.bf16.msra.mxu0 %v645_v2  ;;  %636 = vmatpush3.bf16.msra.mxu1 %v645_v2  ;;  %v121_v32 = vadd.f32 %v519_v17, %v105_v24  ;;  %v107_v53 = vmul.f32 %v555_v36, %v708_v6  ;;  %v510_v54 = vunpack.c.l.bf16 %v565_v40  ;;  %v511_v55 = vunpack.c.h.bf16 %v565_v40  ;;  %v570_v10 = vld [vmem:[%s848_s1 + $0x38] sm:$0xff]  }
   0xc   :  { %600 = vmatprep.subr.bf16.mxu0 %v646_v3  ;;  %629 = vmatprep.subr.bf16.mxu1 %v646_v3  ;;  %v100_v56 = vmul.f32 %v542_v39, %v708_v6  ;;  %v526_v57 = vunpack.c.l.bf16 %v569_v42  ;;  %v101_v59 = vmul.f32 %v543_v41, %v708_v6  ;;  %v527_v60 = vunpack.c.h.bf16 %v569_v42 }
   0xd   :  { %610 = vmatprep.mubr.bf16.mxu0 %v128_v26  ;;  %v132_v37 = vpack.c.bf16 %v121_v32, %v120_v31  ;;  %v108_v61 = vmul.f32 %v558_v43, %v708_v6  ;;  %v109_v62 = vmul.f32 %v559_v44, %v708_v6  ;;  %v114_v1 = vadd.f32 %v506_v46, %v98_v48 }
   0xe   :  { %v115_v2 = vadd.f32 %v507_v47, %v99_v49  ;;  %v123_v4 = vadd.f32 %v523_v51, %v107_v53  ;;  %v546_v7 = vunpack.c.l.bf16 %v573_v58  ;;  %v116_v8 = vadd.f32 %v510_v54, %v100_v56 }
   0xf   :  { %601 = vmatpush3.bf16.msra.mxu0 %v646_v3  ;;  %637 = vmatpush3.bf16.msra.mxu1 %v646_v3  ;;  %v122_v3 = vadd.f32 %v522_v50, %v106_v52  ;;  %v547_v9 = vunpack.c.h.bf16 %v573_v58  ;;  %v562_v11 = vunpack.c.l.bf16 %v577_v63  ;;  %v563_v12 = vunpack.c.h.bf16 %v577_v63 }
  0x10   :  { %602 = vmatprep.subr.bf16.mxu0 %v647_v15  ;;  %630 = vmatprep.subr.bf16.mxu1 %v647_v15  ;;  %v117_v13 = vadd.f32 %v511_v55, %v101_v59  ;;  %v124_v14 = vadd.f32 %v526_v57, %v108_v61  ;;  %v129_v16 = vpack.c.bf16 %v115_v2, %v114_v1  ;;  %v514_v17 = vunpack.c.l.bf16 %v566_v5 }
  0x11   :  { %618 = vmatprep.mubr.bf16.mxu1 %v132_v37  ;;  %v133_v18 = vpack.c.bf16 %v123_v4, %v122_v3  ;;  %v515_v19 = vunpack.c.h.bf16 %v566_v5  ;;  %v102_v20 = vmul.f32 %v546_v7, %v708_v6  ;;  %v530_v21 = vunpack.c.l.bf16 %v570_v10 }
  0x12   :  { %v103_v22 = vmul.f32 %v547_v9, %v708_v6  ;;  %v531_v23 = vunpack.c.h.bf16 %v570_v10  ;;  %v110_v24 = vmul.f32 %v562_v11, %v708_v6  ;;  %v111_v25 = vmul.f32 %v563_v12, %v708_v6  ;;  %v491_v6 = vld [vmem:[%s851_s4] ss:$0 sm:$0xff] }
  0x13   :  { %603 = vmatpush3.bf16.msra.mxu0 %v647_v15  ;;  %638 = vmatpush3.bf16.msra.mxu1 %v647_v15  ;;  %v125_v15 = vadd.f32 %v527_v60, %v109_v62  ;;  %v130_v26 = vpack.c.bf16 %v117_v13, %v116_v8  ;;  %v651_v34 = vmov 0.0  }
  0x14   :  { %604 = vmatprep.subr.bf16.mxu0 %v648_v28  ;;  %631 = vmatprep.subr.bf16.mxu1 %v648_v28  ;;  %v119_v29 = vadd.f32 %v515_v19, %v103_v22  ;;  %v126_v30 = vadd.f32 %v530_v21, %v110_v24  ;;  %v127_v31 = vadd.f32 %v531_v23, %v111_v25 }
  0x15   :  { %v134_v27 = vpack.c.bf16 %v125_v15, %v124_v14  ;;  %28 = vst [vmem:[%s850_s6] sm:$0x3] %v651_v34 }
  0x16   :  { %v135_v33 = vpack.c.bf16 %v127_v31, %v126_v30 }
  0x17   :  { %605 = vmatpush3.bf16.msra.mxu0 %v648_v28  ;;  %639 = vmatpush3.bf16.msra.mxu1 %v648_v28  ;;  %v118_v28 = vadd.f32 %v514_v17, %v102_v20 }
  0x18   :  { %606 = vmatprep.subr.bf16.mxu0 %v649_v45  ;;  %632 = vmatprep.subr.bf16.mxu1 %v649_v45 }
  0x19   :  { %v131_v32 = vpack.c.bf16 %v119_v29, %v118_v28 }
  0x1b   :  { %607 = vmatpush3.bf16.msra.mxu0 %v649_v45  ;;  %640 = vmatpush3.bf16.msra.mxu1 %v649_v45 }
  0x1c   :  { %608 = vmatprep.subr.bf16.mxu0 %v650_v0  ;;  %633 = vmatprep.subr.bf16.mxu1 %v650_v0  ;;  %v419_v23 = vld [vmem:[%s850_s6] sm:$0x1] }
  0x1f   :  { %609 = vmatpush3.bf16.msra.mxu0 %v650_v0  ;;  %641 = vmatpush3.bf16.msra.mxu1 %v650_v0 }
  0x22   :  { %611 = vmatmul.mubr.bf16.vlgmr.msra.gmra.mrb[0].mxu0 %v129_v16  ;;  %619 = vmatmul.mubr.bf16.vlgmr.msra.gmra.mrb[0].mxu1 %v133_v18 }
  0x23   :  { %614 = vmatprep.mubr.bf16.mxu0 %v130_v26  ;;  %622 = vmatprep.mubr.bf16.mxu1 %v134_v27  ;;  %v443_v26 = vld [vmem:[%s850_s6 + $0x1] sm:$0x1] }
  0x2a   :  { %615 = vmatmul.mubr.bf16.gmra.mrb[4].mxu0 %v131_v32  ;;  %623 = vmatmul.mubr.bf16.gmra.mrb[4].mxu1 %v135_v33 }
  0xf5   :  { %v612_v35 = vpop.f32.mrb[0].mxu0  ;;  %v620_v36 = vpop.f32.mrb[0].mxu1 }
  0xf6   :  { %v250_v37 = vadd.f32 %v612_v35, %v491_v6  ;;  %v241_v38 = vpop.f32.mrb[1].mxu0  ;;  %v282_v39 = vadd.f32 %v620_v36, %v491_v6  ;;  %v273_v40 = vpop.f32.mrb[1].mxu1 }
  0xf7   :  { %v242_v41 = vadd.f32 %v491_v6, %v241_v38  ;;  %v613_v42 = vpop.f32.mrb[2].mxu0  ;;  %v274_v43 = vadd.f32 %v491_v6, %v273_v40  ;;  %v621_v44 = vpop.f32.mrb[2].mxu1 }
  0xf8   :  { %306 = vst [vmem:[%s852_s5 + $0x10] sm:$0xff] %v250_v37  ;;  %v253_v45 = vadd.f32 %v613_v42, %v491_v6  ;;  %v244_v46 = vpop.f32.mrb[3].mxu0  ;;  %314 = vst [vmem:[%s852_s5 + $0x50] sm:$0xff] %v282_v39  ;;  %v285_v47 = vadd.f32 %v621_v44, %v491_v6  ;;  %v276_v48 = vpop.f32.mrb[3].mxu1  ;;  %v446_v54 = vmul.f32 %v250_v37, %v250_v37 }
  0xf9   :  { %304 = vst [vmem:[%s852_s5] sm:$0xff] %v242_v41  ;;  %v245_v49 = vadd.f32 %v491_v6, %v244_v46  ;;  %312 = vst [vmem:[%s852_s5 + $0x40] sm:$0xff] %v274_v43  ;;  %v277_v50 = vadd.f32 %v491_v6, %v276_v48  ;;  %v444_v51 = vmul.f32 %v242_v41, %v242_v41 }
  0xfa   :  { %307 = vst [vmem:[%s852_s5 + $0x18] sm:$0xff] %v253_v45  ;;  %315 = vst [vmem:[%s852_s5 + $0x58] sm:$0xff] %v285_v47  ;;  %v447_v59 = vmul.f32 %v253_v45, %v253_v45 }
  0xfb   :  { %305 = vst [vmem:[%s852_s5 + $0x8] sm:$0xff] %v245_v49  ;;  %v420_v52 = vadd.f32 %v245_v49, %v242_v41  ;;  %v445_v53 = vmul.f32 %v245_v49, %v245_v49  ;;  %313 = vst [vmem:[%s852_s5 + $0x48] sm:$0xff] %v277_v50 }
  0xfd   :  { %v421_v55 = vadd.f32 %v420_v52, %v250_v37  ;;  %v460_v56 = vadd.f32 %v445_v53, %v444_v51  ;;  %v616_v57 = vpop.f32.mrb[4].mxu0  ;;  %v624_v58 = vpop.f32.mrb[4].mxu1 }
  0xfe   :  { %v266_v60 = vadd.f32 %v616_v57, %v491_v6  ;;  %v298_v61 = vadd.f32 %v624_v58, %v491_v6  ;;  %v257_v62 = vpop.f32.mrb[5].mxu0  ;;  %v289_v63 = vpop.f32.mrb[5].mxu1 }
  0xff   :  { %v422_v0 = vadd.f32 %v421_v55, %v253_v45  ;;  %v461_v1 = vadd.f32 %v460_v56, %v446_v54  ;;  %v258_v2 = vadd.f32 %v491_v6, %v257_v62  ;;  %v290_v3 = vadd.f32 %v491_v6, %v289_v63  ;;  %v617_v4 = vpop.f32.mrb[6].mxu0  ;;  %v625_v5 = vpop.f32.mrb[6].mxu1 }
 0x100   :  { %310 = vst [vmem:[%s852_s5 + $0x30] sm:$0xff] %v266_v60  ;;  %318 = vst [vmem:[%s852_s5 + $0x70] sm:$0xff] %v298_v61  ;;  %v269_v7 = vadd.f32 %v617_v4, %v491_v6  ;;  %v301_v8 = vadd.f32 %v625_v5, %v491_v6  ;;  %v260_v9 = vpop.f32.mrb[7].mxu0  ;;  %v292_v10 = vpop.f32.mrb[7].mxu1 }
 0x101   :  { %v435_v11 = vrot.slane %v422_v0, 4  ;;  %v462_v12 = vadd.f32 %v461_v1, %v447_v59  ;;  %308 = vst [vmem:[%s852_s5 + $0x20] sm:$0xff] %v258_v2  ;;  %316 = vst [vmem:[%s852_s5 + $0x60] sm:$0xff] %v290_v3  ;;  %v261_v13 = vadd.f32 %v491_v6, %v260_v9  ;;  %v293_v14 = vadd.f32 %v491_v6, %v292_v10 }
 0x102   :  { %311 = vst [vmem:[%s852_s5 + $0x38] sm:$0xff] %v269_v7  ;;  %319 = vst [vmem:[%s852_s5 + $0x78] sm:$0xff] %v301_v8 }
 0x103   :  { %v436_v15 = vadd.f32 %v435_v11, %v422_v0  ;;  %v475_v16 = vrot.slane %v462_v12, 4  ;;  %309 = vst [vmem:[%s852_s5 + $0x28] sm:$0xff] %v261_v13  ;;  %317 = vst [vmem:[%s852_s5 + $0x68] sm:$0xff] %v293_v14 }
 0x105   :  { %v437_v17 = vrot.slane %v436_v15, 2  ;;  %v476_v18 = vadd.f32 %v475_v16, %v462_v12 }
 0x107   :  { %v438_v19 = vadd.f32 %v437_v17, %v436_v15  ;;  %v477_v20 = vrot.slane %v476_v18, 2 }
 0x109   :  { %v439_v21 = vrot.slane %v438_v19, 1  ;;  %v478_v22 = vadd.f32 %v477_v20, %v476_v18 }
 0x10b   :  { %v440_v24 = vadd.f32 %v439_v21, %v438_v19  ;;  %v479_v25 = vrot.slane %v478_v22, 1 }
 0x10d   :  { %v441_v27 = vadd.f32 %v440_v24, %v419_v23  ;;  %v480_v28 = vadd.f32 %v479_v25, %v478_v22 }
 0x10f   :  { %442 = vst [vmem:[%s850_s6] sm:$0x1] %v441_v27  ;;  %v481_v29 = vadd.f32 %v480_v28, %v443_v26 }
 0x111   :  { %482 = vst [vmem:[%s850_s6 + $0x1] sm:$0x1] %v481_v29 }

// kernel: mpnn_forward.15
= control target key start
LH: loop header
LB: loop body
LE: loop exit
PB: predicated region body
PF: predicated region fallthrough
CT: control target
= control target key end

     0   :  { %v890_v32 = vmov 0.0|0.0   ;;  %s1062_s3 = inlined_call_operand.vmem [shape: bf16[128,128], index: 3, kind: input, shape index: {}]   ;;  %s1063_s2 = inlined_call_operand.vmem [shape: bf16[128,128], index: 2, kind: input, shape index: {}]   ;;  %s1064_s1 = inlined_call_operand.vmem [shape: bf16[128,128], index: 1, kind: input, shape index: {}]   ;;  %s1065_s0 = inlined_call_operand.vmem [shape: bf16[128,128], index: 0, kind: input, shape index: {}]   ;;  %s1066_s5 = inlined_call_operand.vmem [shape: bf16[128,128], index: 5, kind: output, shape index: {}]   ;;  %s1067_s4 = inlined_call_operand.vmem [shape: f32[1,128], index: 4, kind: input, shape index: {}]  }
   0x1   :  { %v858_v0 = vld [vmem:[%s1062_s3] sm:$0xff]   ;;  %v860_v2 = vld [vmem:[%s1062_s3 + $0x8] sm:$0xff]   ;;  %v862_v4 = vld [vmem:[%s1062_s3 + $0x10] sm:$0xff]   ;;  %v730_v33 = vcombine.low %v890_v32, %v890_v32  ;;  %v731_v34 = vcombine.high %v890_v32, %v890_v32 }
   0x2   :  { %v859_v1 = vld [vmem:[%s1063_s2] sm:$0xff]   ;;  %789 = vmatprep.subr.bf16.mxu1 %v858_v0  ;;  %v861_v3 = vld [vmem:[%s1063_s2 + $0x8] sm:$0xff]   ;;  %v863_v5 = vld [vmem:[%s1063_s2 + $0x10] sm:$0xff]  }
   0x3   :  { %821 = vmatprep.subr.bf16.mxu0 %v859_v1  ;;  %790 = vmatpush3.bf16.msra.mxu1 %v858_v0  ;;  %v864_v6 = vld [vmem:[%s1062_s3 + $0x18] sm:$0xff]   ;;  %v866_v8 = vld [vmem:[%s1062_s3 + $0x20] sm:$0xff]   ;;  %v868_v10 = vld [vmem:[%s1062_s3 + $0x28] sm:$0xff]   ;;  %677 = vst [vmem:[%s1066_s5 + $0x10] sm:$0xf] %v730_v33 }
   0x4   :  { %822 = vmatpush3.bf16.msra.mxu0 %v859_v1  ;;  %791 = vmatprep.subr.bf16.mxu1 %v860_v2  ;;  %v865_v7 = vld [vmem:[%s1063_s2 + $0x18] sm:$0xff]   ;;  %v867_v9 = vld [vmem:[%s1063_s2 + $0x20] sm:$0xff]   ;;  %v869_v11 = vld [vmem:[%s1063_s2 + $0x28] sm:$0xff]   ;;  %678 = vst [vmem:[%s1066_s5 + $0x14] sm:$0xf] %v731_v34 }
   0x5   :  { %823 = vmatprep.subr.bf16.mxu0 %v861_v3  ;;  %v874_v12 = vld [vmem:[%s1064_s1] sm:$0xff]   ;;  %v870_v14 = vld [vmem:[%s1062_s3 + $0x30] sm:$0xff]   ;;  %v872_v16 = vld [vmem:[%s1062_s3 + $0x38] sm:$0xff]   ;;  %679 = vst [vmem:[%s1066_s5 + $0x18] sm:$0xf] %v730_v33 }
   0x6   :  { %v875_v13 = vld [vmem:[%s1065_s0] sm:$0xff]   ;;  %805 = vmatprep.mubr.bf16.mxu1 %v874_v12  ;;  %v871_v15 = vld [vmem:[%s1063_s2 + $0x30] sm:$0xff]   ;;  %v873_v17 = vld [vmem:[%s1063_s2 + $0x38] sm:$0xff]   ;;  %680 = vst [vmem:[%s1066_s5 + $0x1c] sm:$0xf] %v731_v34 }
   0x7   :  { %792 = vmatpush3.bf16.msra.mxu1 %v860_v2  ;;  %837 = vmatprep.mubr.bf16.mxu0 %v875_v13  ;;  %v876_v18 = vld [vmem:[%s1064_s1 + $0x8] sm:$0xff]   ;;  %v878_v20 = vld [vmem:[%s1064_s1 + $0x10] sm:$0xff]   ;;  %v880_v22 = vld [vmem:[%s1064_s1 + $0x18] sm:$0xff]   ;;  %681 = vst [vmem:[%s1066_s5 + $0x20] sm:$0xf] %v730_v33 }
   0x8   :  { %824 = vmatpush3.bf16.msra.mxu0 %v861_v3  ;;  %793 = vmatprep.subr.bf16.mxu1 %v862_v4  ;;  %v877_v19 = vld [vmem:[%s1065_s0 + $0x8] sm:$0xff]   ;;  %v879_v21 = vld [vmem:[%s1065_s0 + $0x10] sm:$0xff]   ;;  %v881_v23 = vld [vmem:[%s1065_s0 + $0x18] sm:$0xff]   ;;  %682 = vst [vmem:[%s1066_s5 + $0x24] sm:$0xf] %v731_v34 }
   0x9   :  { %825 = vmatprep.subr.bf16.mxu0 %v863_v5  ;;  %v882_v24 = vld [vmem:[%s1064_s1 + $0x20] sm:$0xff]   ;;  %v884_v26 = vld [vmem:[%s1064_s1 + $0x28] sm:$0xff]   ;;  %v886_v28 = vld [vmem:[%s1064_s1 + $0x30] sm:$0xff]   ;;  %683 = vst [vmem:[%s1066_s5 + $0x28] sm:$0xf] %v730_v33 }
   0xa   :  { %v883_v25 = vld [vmem:[%s1065_s0 + $0x20] sm:$0xff]   ;;  %v885_v27 = vld [vmem:[%s1065_s0 + $0x28] sm:$0xff]   ;;  %v887_v29 = vld [vmem:[%s1065_s0 + $0x30] sm:$0xff]   ;;  %684 = vst [vmem:[%s1066_s5 + $0x2c] sm:$0xf] %v731_v34 }
   0xb   :  { %794 = vmatpush3.bf16.msra.mxu1 %v862_v4  ;;  %v888_v30 = vld [vmem:[%s1064_s1 + $0x38] sm:$0xff]   ;;  %685 = vst [vmem:[%s1066_s5 + $0x30] sm:$0xf] %v730_v33  ;;  %686 = vst [vmem:[%s1066_s5 + $0x34] sm:$0xf] %v731_v34 }
   0xc   :  { %826 = vmatpush3.bf16.msra.mxu0 %v863_v5  ;;  %795 = vmatprep.subr.bf16.mxu1 %v864_v6  ;;  %v889_v31 = vld [vmem:[%s1065_s0 + $0x38] sm:$0xff]   ;;  %687 = vst [vmem:[%s1066_s5 + $0x38] sm:$0xf] %v730_v33  ;;  %688 = vst [vmem:[%s1066_s5 + $0x3c] sm:$0xf] %v731_v34 }
   0xd   :  { %827 = vmatprep.subr.bf16.mxu0 %v865_v7  ;;  %v725_v37 = vld [vmem:[%s1067_s4] ss:$0 sm:$0xff] }
   0xf   :  { %796 = vmatpush3.bf16.msra.mxu1 %v864_v6 }
  0x10   :  { %828 = vmatpush3.bf16.msra.mxu0 %v865_v7  ;;  %797 = vmatprep.subr.bf16.mxu1 %v866_v8 }
  0x11   :  { %829 = vmatprep.subr.bf16.mxu0 %v867_v9 }
  0x13   :  { %798 = vmatpush3.bf16.msra.mxu1 %v866_v8 }
  0x14   :  { %830 = vmatpush3.bf16.msra.mxu0 %v867_v9  ;;  %799 = vmatprep.subr.bf16.mxu1 %v868_v10 }
  0x15   :  { %831 = vmatprep.subr.bf16.mxu0 %v869_v11 }
  0x17   :  { %800 = vmatpush3.bf16.msra.mxu1 %v868_v10 }
  0x18   :  { %832 = vmatpush3.bf16.msra.mxu0 %v869_v11  ;;  %801 = vmatprep.subr.bf16.mxu1 %v870_v14 }
  0x19   :  { %833 = vmatprep.subr.bf16.mxu0 %v871_v15 }
  0x1b   :  { %802 = vmatpush3.bf16.msra.mxu1 %v870_v14 }
  0x1c   :  { %834 = vmatpush3.bf16.msra.mxu0 %v871_v15  ;;  %803 = vmatprep.subr.bf16.mxu1 %v872_v16 }
  0x1d   :  { %835 = vmatprep.subr.bf16.mxu0 %v873_v17 }
  0x1f   :  { %804 = vmatpush3.bf16.msra.mxu1 %v872_v16 }
  0x20   :  { %836 = vmatpush3.bf16.msra.mxu0 %v873_v17 }
  0x22   :  { %806 = vmatmul.mubr.bf16.vlgmr.msra.gmra.mrb[0].mxu1 %v876_v18 }
  0x23   :  { %838 = vmatmul.mubr.bf16.vlgmr.msra.gmra.mrb[0].mxu0 %v877_v19  ;;  %809 = vmatprep.mubr.bf16.mxu1 %v878_v20 }
  0x24   :  { %841 = vmatprep.mubr.bf16.mxu0 %v879_v21 }
  0x2a   :  { %810 = vmatmul.mubr.bf16.gmra.mrb[4].mxu1 %v880_v22 }
  0x2b   :  { %842 = vmatmul.mubr.bf16.gmra.mrb[4].mxu0 %v881_v23  ;;  %813 = vmatprep.mubr.bf16.mxu1 %v882_v24 }
  0x2c   :  { %845 = vmatprep.mubr.bf16.mxu0 %v883_v25 }
  0x32   :  { %814 = vmatmul.mubr.bf16.gmra.mrb[8].mxu1 %v884_v26 }
  0x33   :  { %846 = vmatmul.mubr.bf16.gmra.mrb[8].mxu0 %v885_v27  ;;  %817 = vmatprep.mubr.bf16.mxu1 %v886_v28 }
  0x34   :  { %849 = vmatprep.mubr.bf16.mxu0 %v887_v29 }
  0x3a   :  { %818 = vmatmul.mubr.bf16.gmra.mrb[12].mxu1 %v888_v30 }
  0x3b   :  { %850 = vmatmul.mubr.bf16.gmra.mrb[12].mxu0 %v889_v31 }
  0xf5   :  { %v807_v35 = vpop.f32.mrb[0].mxu1 }
  0xf6   :  { %v839_v36 = vpop.f32.mrb[0].mxu0  ;;  %v215_v38 = vpop.f32.mrb[1].mxu1 }
  0xf7   :  { %v417_v39 = vadd.f32 %v839_v36, %v807_v35  ;;  %v408_v40 = vpop.f32.mrb[1].mxu0  ;;  %v808_v41 = vpop.f32.mrb[2].mxu1 }
  0xf8   :  { %v409_v42 = vadd.f32 %v408_v40, %v215_v38  ;;  %v840_v43 = vpop.f32.mrb[2].mxu0  ;;  %v218_v44 = vpop.f32.mrb[3].mxu1 }
  0xf9   :  { %v480_v45 = vadd.f32 %v725_v37, %v417_v39  ;;  %v420_v46 = vadd.f32 %v840_v43, %v808_v41  ;;  %v411_v47 = vpop.f32.mrb[3].mxu0 }
  0xfa   :  { %v478_v48 = vadd.f32 %v725_v37, %v409_v42  ;;  %v412_v49 = vadd.f32 %v411_v47, %v218_v44 }
  0xfb   :  { %v481_v50 = vadd.f32 %v725_v37, %v420_v46  ;;  %v496_v52 = vmax.f32 %v480_v45, 0.0 }
  0xfc   :  { %v479_v51 = vadd.f32 %v725_v37, %v412_v49  ;;  %v494_v55 = vmax.f32 %v478_v48, 0.0 }
  0xfd   :  { %v497_v53 = vmax.f32 %v481_v50, 0.0  ;;  %v811_v54 = vpop.f32.mrb[4].mxu1 }
  0xfe   :  { %v495_v56 = vmax.f32 %v479_v51, 0.0  ;;  %v843_v57 = vpop.f32.mrb[4].mxu0  ;;  %v231_v58 = vpop.f32.mrb[5].mxu1 }
  0xff   :  { %v754_v59 = vpack.c.bf16 %v497_v53, %v496_v52  ;;  %v424_v60 = vpop.f32.mrb[5].mxu0  ;;  %v812_v61 = vpop.f32.mrb[6].mxu1 }
 0x100   :  { %v749_v62 = vpack.c.bf16 %v495_v56, %v494_v55  ;;  %v844_v63 = vpop.f32.mrb[6].mxu0  ;;  %v234_v0 = vpop.f32.mrb[7].mxu1 }
 0x101   :  { %756 = vst [vmem:[%s1066_s5 + $0x8] sm:$0xff] %v754_v59   ;;  %v427_v1 = vpop.f32.mrb[7].mxu0 }
 0x102   :  { %750 = vst [vmem:[%s1066_s5] sm:$0xff] %v749_v62  }
 0x105   :  { %v815_v2 = vpop.f32.mrb[8].mxu1 }
 0x106   :  { %v847_v3 = vpop.f32.mrb[8].mxu0  ;;  %v247_v4 = vpop.f32.mrb[9].mxu1 }
 0x107   :  { %v440_v5 = vpop.f32.mrb[9].mxu0  ;;  %v816_v6 = vpop.f32.mrb[10].mxu1 }
 0x108   :  { %v848_v7 = vpop.f32.mrb[10].mxu0  ;;  %v250_v8 = vpop.f32.mrb[11].mxu1 }
 0x109   :  { %v443_v9 = vpop.f32.mrb[11].mxu0 }
 0x10d   :  { %v819_v10 = vpop.f32.mrb[12].mxu1 }
 0x10e   :  { %v851_v11 = vpop.f32.mrb[12].mxu0  ;;  %v263_v12 = vpop.f32.mrb[13].mxu1 }
 0x10f   :  { %v456_v13 = vpop.f32.mrb[13].mxu0  ;;  %v820_v14 = vpop.f32.mrb[14].mxu1 }
 0x110   :  { %v852_v15 = vpop.f32.mrb[14].mxu0  ;;  %v266_v16 = vpop.f32.mrb[15].mxu1 }
 0x111   :  { %v459_v17 = vpop.f32.mrb[15].mxu0 }

// kernel: mpnn_forward.21
= control target key start
LH: loop header
LB: loop body
LE: loop exit
PB: predicated region body
PF: predicated region fallthrough
CT: control target
= control target key end

     0   :  { %v40_v6 = vlaneseq  ;;  %s416_s1 = inlined_call_operand.vmem [shape: f32[2,128], index: 1, kind: input, shape index: {}]   ;;  %s417_s0 = inlined_call_operand.vmem [shape: f32[128,128], index: 0, kind: input, shape index: {}]   ;;  %s418_s2 = inlined_call_operand.vmem [shape: f32[1,128], index: 2, kind: input, shape index: {}]   ;;  %s419_s3 = inlined_call_operand.vmem [shape: f32[1,128], index: 3, kind: input, shape index: {}]   ;;  %s420_s4 = inlined_call_operand.vmem [shape: bf16[128,128], index: 4, kind: output, shape index: {}]  }
   0x1   :  { %v17_v0 = vld [vmem:[%s416_s1] sm:$0x1]  ;;  %v19_v1 = vld [vmem:[%s416_s1 + $0x1] sm:$0x1]  ;;  %v25_v12 = vld [vmem:[%s417_s0 + $0x8] sm:$0xff] }
   0x2   :  { %v18_v2 = vmul.f32 0.03125, %v17_v0  ;;  %v20_v3 = vmul.f32 0.03125, %v19_v1  ;;  %v41_v8 = vshrl.u32 %v40_v6, 7  ;;  %v24_v11 = vld [vmem:[%s417_s0] sm:$0xff]  ;;  %v26_v15 = vld [vmem:[%s417_s0 + $0x10] sm:$0xff]  ;;  %v27_v16 = vld [vmem:[%s417_s0 + $0x18] sm:$0xff] }
   0x3   :  { %v62_v14 = vld [vmem:[%s418_s2] sm:$0x1]  ;;  %v29_v18 = vld [vmem:[%s417_s0 + $0x28] sm:$0xff]  ;;  %v30_v19 = vld [vmem:[%s417_s0 + $0x30] sm:$0xff] }
   0x4   :  { %v21_v4 = vmul.f32 %v18_v2, %v18_v2  ;;  %v42_v10 = vsub.s32 0, %v41_v8  ;;  %v28_v17 = vld [vmem:[%s417_s0 + $0x20] sm:$0xff]  ;;  %v31_v20 = vld [vmem:[%s417_s0 + $0x38] sm:$0xff]  ;;  %v33_v22 = vld [vmem:[%s417_s0 + $0x48] sm:$0xff] }
   0x5   :  { %v32_v21 = vld [vmem:[%s417_s0 + $0x40] sm:$0xff]  ;;  %v34_v26 = vld [vmem:[%s417_s0 + $0x50] sm:$0xff]  ;;  %v35_v27 = vld [vmem:[%s417_s0 + $0x58] sm:$0xff] }
   0x6   :  { %v22_v5 = vsub.f32 %v20_v3, %v21_v4  ;;  %v326_v13 = vrot.slane %v18_v2, %v42_v10  ;;  %v36_v28 = vld [vmem:[%s417_s0 + $0x60] sm:$0xff]  ;;  %v37_v33 = vld [vmem:[%s417_s0 + $0x68] sm:$0xff]  ;;  %v38_v34 = vld [vmem:[%s417_s0 + $0x70] sm:$0xff] }
   0x7   :  { %v39_v35 = vld [vmem:[%s417_s0 + $0x78] sm:$0xff]  ;;  %v207_v44 = vld [vmem:[%s419_s3] ss:$0 sm:$0xff] }
   0x8   :  { %v23_v7 = vmax.f32 %v22_v5, 0.0  ;;  %v44_v24 = vsub.f32 %v24_v11, %v326_v13  ;;  %v45_v25 = vsub.f32 %v25_v12, %v326_v13  ;;  %v46_v30 = vsub.f32 %v26_v15, %v326_v13 }
   0x9   :  { %v47_v31 = vsub.f32 %v27_v16, %v326_v13  ;;  %v48_v32 = vsub.f32 %v28_v17, %v326_v13  ;;  %v49_v36 = vsub.f32 %v29_v18, %v326_v13  ;;  %v50_v37 = vsub.f32 %v30_v19, %v326_v13 }
   0xa   :  { %v60_v9 = vadd.f32 1e-05, %v23_v7  ;;  %v51_v38 = vsub.f32 %v31_v20, %v326_v13  ;;  %v52_v39 = vsub.f32 %v32_v21, %v326_v13  ;;  %v53_v41 = vsub.f32 %v33_v22, %v326_v13 }
   0xb   :  { %v54_v42 = vsub.f32 %v34_v26, %v326_v13  ;;  %v55_v43 = vsub.f32 %v35_v27, %v326_v13  ;;  %v56_v45 = vsub.f32 %v36_v28, %v326_v13  ;;  %v57_v46 = vsub.f32 %v37_v33, %v326_v13 }
   0xc   :  { %287 = vrsqrt.f32 %v60_v9  ;;  %v58_v47 = vsub.f32 %v38_v34, %v326_v13  ;;  %v59_v48 = vsub.f32 %v39_v35, %v326_v13 }
  0x16   :  { %v288_v23 = vpop.eup %287 }
  0x17   :  { %v63_v29 = vmul.f32 %v288_v23, %v62_v14 }
  0x19   :  { %v67_v40 = vrot.slane %v63_v29, %v42_v10 }
  0x1b   :  { %v68_v49 = vmul.f32 %v67_v40, %v44_v24  ;;  %v69_v50 = vmul.f32 %v67_v40, %v45_v25  ;;  %v70_v51 = vmul.f32 %v67_v40, %v46_v30  ;;  %v71_v52 = vmul.f32 %v67_v40, %v47_v31 }
  0x1c   :  { %v72_v53 = vmul.f32 %v67_v40, %v48_v32  ;;  %v73_v54 = vmul.f32 %v67_v40, %v49_v36  ;;  %v74_v55 = vmul.f32 %v67_v40, %v50_v37  ;;  %v75_v56 = vmul.f32 %v67_v40, %v51_v38 }
  0x1d   :  { %v91_v57 = vadd.f32 %v207_v44, %v68_v49  ;;  %v92_v58 = vadd.f32 %v207_v44, %v69_v50  ;;  %v93_v59 = vadd.f32 %v207_v44, %v70_v51  ;;  %v94_v60 = vadd.f32 %v207_v44, %v71_v52 }
  0x1e   :  { %v95_v61 = vadd.f32 %v207_v44, %v72_v53  ;;  %v96_v62 = vadd.f32 %v207_v44, %v73_v54  ;;  %v97_v63 = vadd.f32 %v207_v44, %v74_v55  ;;  %v98_v0 = vadd.f32 %v207_v44, %v75_v56 }
  0x1f   :  { %v107_v1 = vmax.f32 %v91_v57, 0.0  ;;  %v108_v2 = vmax.f32 %v92_v58, 0.0  ;;  %v109_v3 = vmax.f32 %v93_v59, 0.0  ;;  %v110_v4 = vmax.f32 %v94_v60, 0.0 }
  0x20   :  { %v111_v5 = vmax.f32 %v95_v61, 0.0  ;;  %v112_v6 = vmax.f32 %v96_v62, 0.0  ;;  %v113_v7 = vmax.f32 %v97_v63, 0.0  ;;  %v114_v8 = vmax.f32 %v98_v0, 0.0 }
  0x21   :  { %v243_v9 = vpack.c.bf16 %v108_v2, %v107_v1  ;;  %v248_v10 = vpack.c.bf16 %v110_v4, %v109_v3  ;;  %v76_v11 = vmul.f32 %v67_v40, %v52_v39  ;;  %v77_v12 = vmul.f32 %v67_v40, %v53_v41 }
  0x22   :  { %v253_v13 = vpack.c.bf16 %v112_v6, %v111_v5  ;;  %v258_v14 = vpack.c.bf16 %v114_v8, %v113_v7  ;;  %v78_v15 = vmul.f32 %v67_v40, %v54_v42  ;;  %v79_v16 = vmul.f32 %v67_v40, %v55_v43 }
  0x23   :  { %244 = vst [vmem:[%s420_s4] sm:$0xff] %v243_v9   ;;  %280 = vst [vmem:[%s420_s4 + $0x8] sm:$0xff] %v248_v10   ;;  %v99_v17 = vadd.f32 %v207_v44, %v76_v11  ;;  %v100_v18 = vadd.f32 %v207_v44, %v77_v12  ;;  %v80_v19 = vmul.f32 %v67_v40, %v56_v45 }
  0x24   :  { %v81_v20 = vmul.f32 %v67_v40, %v57_v46  ;;  %281 = vst [vmem:[%s420_s4 + $0x10] sm:$0xff] %v253_v13   ;;  %282 = vst [vmem:[%s420_s4 + $0x18] sm:$0xff] %v258_v14   ;;  %v101_v21 = vadd.f32 %v207_v44, %v78_v15  ;;  %v102_v22 = vadd.f32 %v207_v44, %v79_v16 }
  0x25   :  { %v82_v23 = vmul.f32 %v67_v40, %v58_v47  ;;  %v83_v24 = vmul.f32 %v67_v40, %v59_v48  ;;  %v115_v25 = vmax.f32 %v99_v17, 0.0  ;;  %v116_v26 = vmax.f32 %v100_v18, 0.0 }
  0x26   :  { %v103_v27 = vadd.f32 %v207_v44, %v80_v19  ;;  %v104_v28 = vadd.f32 %v207_v44, %v81_v20  ;;  %v117_v29 = vmax.f32 %v101_v21, 0.0  ;;  %v118_v30 = vmax.f32 %v102_v22, 0.0 }
  0x27   :  { %v105_v31 = vadd.f32 %v207_v44, %v82_v23  ;;  %v106_v32 = vadd.f32 %v207_v44, %v83_v24  ;;  %v263_v33 = vpack.c.bf16 %v116_v26, %v115_v25 }
  0x28   :  { %v119_v34 = vmax.f32 %v103_v27, 0.0  ;;  %v120_v35 = vmax.f32 %v104_v28, 0.0  ;;  %v268_v36 = vpack.c.bf16 %v118_v30, %v117_v29 }
  0x29   :  { %v121_v37 = vmax.f32 %v105_v31, 0.0  ;;  %v122_v38 = vmax.f32 %v106_v32, 0.0  ;;  %283 = vst [vmem:[%s420_s4 + $0x20] sm:$0xff] %v263_v33  }
  0x2a   :  { %v273_v39 = vpack.c.bf16 %v120_v35, %v119_v34  ;;  %284 = vst [vmem:[%s420_s4 + $0x28] sm:$0xff] %v268_v36  }
  0x2b   :  { %v278_v40 = vpack.c.bf16 %v122_v38, %v121_v37 }
  0x2c   :  { %285 = vst [vmem:[%s420_s4 + $0x30] sm:$0xff] %v273_v39  }
  0x2d   :  { %286 = vst [vmem:[%s420_s4 + $0x38] sm:$0xff] %v278_v40  }

// kernel: mpnn_forward.16
= control target key start
LH: loop header
LB: loop body
LE: loop exit
PB: predicated region body
PF: predicated region fallthrough
CT: control target
= control target key end

     0   :  { %s815_s3 = inlined_call_operand.vmem [shape: bf16[128,128], index: 3, kind: input, shape index: {}]   ;;  %s816_s0 = inlined_call_operand.<no memory space> [shape: f32[1], index: 0, kind: input, shape index: {}]   ;;  %s817_s2 = inlined_call_operand.vmem [shape: bf16[128,128], index: 2, kind: input, shape index: {}]   ;;  %s818_s1 = inlined_call_operand.vmem [shape: f32[128,128], index: 1, kind: input, shape index: {}]   ;;  %s819_s6 = inlined_call_operand.vmem [shape: f32[2,128], index: 6, kind: output, shape index: {1}]   ;;  %s820_s4 = inlined_call_operand.vmem [shape: f32[1,128], index: 4, kind: input, shape index: {}]   ;;  %s821_s5 = inlined_call_operand.vmem [shape: f32[128,128], index: 5, kind: output, shape index: {0}]  }
   0x1   :  { %v588_v0 = vld [vmem:[%s815_s3] sm:$0xff]   ;;  %v589_v1 = vld [vmem:[%s815_s3 + $0x8] sm:$0xff]   ;;  %v590_v2 = vld [vmem:[%s815_s3 + $0x10] sm:$0xff]   ;;  %s46_s29 = sadd.f32 1.0, %s816_s0 }
   0x2   :  { %539 = vmatprep.subr.bf16.mxu0 %v588_v0  ;;  %571 = vmatprep.subr.bf16.mxu1 %v588_v0  ;;  %v591_v3 = vld [vmem:[%s815_s3 + $0x18] sm:$0xff]   ;;  %v485_v4 = vld [vmem:[%s817_s2] sm:$0xff]   ;;  %v31_v9 = vld [vmem:[%s818_s1 + $0x8] sm:$0xff] }
   0x3   :  { %540 = vmatpush3.bf16.msra.mxu0 %v588_v0  ;;  %579 = vmatpush3.bf16.msra.mxu1 %v588_v0  ;;  %v650_v5 = vstv %s46_s29  ;;  %v486_v6 = vunpack.c.l.bf16 %v485_v4  ;;  %v487_v7 = vunpack.c.h.bf16 %v485_v4  ;;  %v30_v8 = vld [vmem:[%s818_s1] sm:$0xff]  ;;  %v39_v17 = vld [vmem:[%s818_s1 + $0x48] sm:$0xff]  ;;  %v517_v27 = vld [vmem:[%s817_s2 + $0x10] sm:$0xff]  }
   0x4   :  { %541 = vmatprep.subr.bf16.mxu0 %v589_v1  ;;  %572 = vmatprep.subr.bf16.mxu1 %v589_v1  ;;  %v519_v10 = vld [vmem:[%s817_s2 + $0x20] sm:$0xff]   ;;  %v516_v20 = vld [vmem:[%s817_s2 + $0x8] sm:$0xff]   ;;  %v521_v30 = vld [vmem:[%s817_s2 + $0x30] sm:$0xff]   ;;  %v494_v35 = vunpack.c.l.bf16 %v517_v27  ;;  %v495_v36 = vunpack.c.h.bf16 %v517_v27 }
   0x5   :  { %v80_v11 = vmul.f32 %v486_v6, %v650_v5  ;;  %v81_v12 = vmul.f32 %v487_v7, %v650_v5  ;;  %v502_v13 = vunpack.c.l.bf16 %v519_v10  ;;  %v503_v14 = vunpack.c.h.bf16 %v519_v10  ;;  %v592_v15 = vld [vmem:[%s815_s3 + $0x20] sm:$0xff]   ;;  %v520_v23 = vld [vmem:[%s817_s2 + $0x28] sm:$0xff]   ;;  %v594_v39 = vld [vmem:[%s815_s3 + $0x30] sm:$0xff]  }
   0x6   :  { %v38_v16 = vld [vmem:[%s818_s1 + $0x40] sm:$0xff]  ;;  %v593_v28 = vld [vmem:[%s815_s3 + $0x28] sm:$0xff]   ;;  %v490_v29 = vunpack.c.l.bf16 %v516_v20  ;;  %v491_v31 = vunpack.c.h.bf16 %v516_v20  ;;  %v506_v33 = vunpack.c.l.bf16 %v520_v23  ;;  %v507_v34 = vunpack.c.h.bf16 %v520_v23  ;;  %v32_v41 = vld [vmem:[%s818_s1 + $0x10] sm:$0xff] }
   0x7   :  { %542 = vmatpush3.bf16.msra.mxu0 %v589_v1  ;;  %580 = vmatpush3.bf16.msra.mxu1 %v589_v1  ;;  %v96_v18 = vadd.f32 %v80_v11, %v30_v8  ;;  %v97_v19 = vadd.f32 %v81_v12, %v31_v9  ;;  %v88_v21 = vmul.f32 %v502_v13, %v650_v5  ;;  %v510_v37 = vunpack.c.l.bf16 %v521_v30  ;;  %v33_v42 = vld [vmem:[%s818_s1 + $0x18] sm:$0xff]  ;;  %v40_v46 = vld [vmem:[%s818_s1 + $0x50] sm:$0xff]  ;;  %v34_v51 = vld [vmem:[%s818_s1 + $0x20] sm:$0xff] }
   0x8   :  { %543 = vmatprep.subr.bf16.mxu0 %v590_v2  ;;  %573 = vmatprep.subr.bf16.mxu1 %v590_v2  ;;  %v89_v22 = vmul.f32 %v503_v14, %v650_v5  ;;  %v511_v38 = vunpack.c.h.bf16 %v521_v30  ;;  %v82_v40 = vmul.f32 %v490_v29, %v650_v5  ;;  %v83_v43 = vmul.f32 %v491_v31, %v650_v5  ;;  %v41_v47 = vld [vmem:[%s818_s1 + $0x58] sm:$0xff]  ;;  %v35_v57 = vld [vmem:[%s818_s1 + $0x28] sm:$0xff]  ;;  %v42_v58 = vld [vmem:[%s818_s1 + $0x60] sm:$0xff] }
   0x9   :  { %v112_v24 = vpack.c.bf16 %v97_v19, %v96_v18  ;;  %v104_v25 = vadd.f32 %v88_v21, %v38_v16  ;;  %v90_v44 = vmul.f32 %v506_v33, %v650_v5  ;;  %v91_v45 = vmul.f32 %v507_v34, %v650_v5  ;;  %v518_v49 = vld [vmem:[%s817_s2 + $0x18] sm:$0xff]   ;;  %v43_v59 = vld [vmem:[%s818_s1 + $0x68] sm:$0xff]  ;;  %v36_v11 = vld [vmem:[%s818_s1 + $0x30] sm:$0xff] }
   0xa   :  { %v105_v26 = vadd.f32 %v89_v22, %v39_v17  ;;  %v84_v48 = vmul.f32 %v494_v35, %v650_v5  ;;  %v595_v50 = vld [vmem:[%s815_s3 + $0x38] sm:$0xff]   ;;  %v85_v52 = vmul.f32 %v495_v36, %v650_v5  ;;  %v92_v53 = vmul.f32 %v510_v37, %v650_v5  ;;  %v44_v18 = vld [vmem:[%s818_s1 + $0x70] sm:$0xff] }
   0xb   :  { %544 = vmatpush3.bf16.msra.mxu0 %v590_v2  ;;  %581 = vmatpush3.bf16.msra.mxu1 %v590_v2  ;;  %v93_v54 = vmul.f32 %v511_v38, %v650_v5  ;;  %v522_v55 = vld [vmem:[%s817_s2 + $0x38] sm:$0xff]   ;;  %v98_v56 = vadd.f32 %v82_v40, %v32_v41  ;;  %v99_v60 = vadd.f32 %v83_v43, %v33_v42  ;;  %v498_v63 = vunpack.c.l.bf16 %v518_v49 }
   0xc   :  { %545 = vmatprep.subr.bf16.mxu0 %v591_v3  ;;  %574 = vmatprep.subr.bf16.mxu1 %v591_v3  ;;  %v116_v32 = vpack.c.bf16 %v105_v26, %v104_v25  ;;  %v106_v61 = vadd.f32 %v90_v44, %v40_v46  ;;  %v107_v62 = vadd.f32 %v91_v45, %v41_v47  ;;  %v499_v1 = vunpack.c.h.bf16 %v518_v49  ;;  %v37_v17 = vld [vmem:[%s818_s1 + $0x38] sm:$0xff]  ;;  %v475_v26 = vld [vmem:[%s820_s4] ss:$0 sm:$0xff] }
   0xd   :  { %555 = vmatprep.mubr.bf16.mxu0 %v112_v24  ;;  %v100_v0 = vadd.f32 %v84_v48, %v34_v51  ;;  %v514_v2 = vunpack.c.l.bf16 %v522_v55  ;;  %v101_v4 = vadd.f32 %v85_v52, %v35_v57  ;;  %v108_v6 = vadd.f32 %v92_v53, %v42_v58  ;;  %v45_v19 = vld [vmem:[%s818_s1 + $0x78] sm:$0xff] }
   0xe   :  { %563 = vmatprep.mubr.bf16.mxu1 %v116_v32  ;;  %v109_v7 = vadd.f32 %v93_v54, %v43_v59  ;;  %v113_v8 = vpack.c.bf16 %v99_v60, %v98_v56  ;;  %v86_v9 = vmul.f32 %v498_v63, %v650_v5  ;;  %v117_v10 = vpack.c.bf16 %v107_v62, %v106_v61 }
   0xf   :  { %546 = vmatpush3.bf16.msra.mxu0 %v591_v3  ;;  %582 = vmatpush3.bf16.msra.mxu1 %v591_v3  ;;  %v515_v3 = vunpack.c.h.bf16 %v522_v55  ;;  %v87_v12 = vmul.f32 %v499_v1, %v650_v5  ;;  %v94_v13 = vmul.f32 %v514_v2, %v650_v5  ;;  %v596_v25 = vmov 0.0  }
  0x10   :  { %547 = vmatprep.subr.bf16.mxu0 %v592_v15  ;;  %575 = vmatprep.subr.bf16.mxu1 %v592_v15  ;;  %v118_v16 = vpack.c.bf16 %v109_v7, %v108_v6  ;;  %v102_v20 = vadd.f32 %v86_v9, %v36_v11  ;;  %28 = vst [vmem:[%s819_s6] sm:$0x3] %v596_v25 }
  0x11   :  { %v95_v14 = vmul.f32 %v515_v3, %v650_v5  ;;  %v103_v5 = vadd.f32 %v87_v12, %v37_v17  ;;  %v110_v21 = vadd.f32 %v94_v13, %v44_v18 }
  0x13   :  { %548 = vmatpush3.bf16.msra.mxu0 %v592_v15  ;;  %583 = vmatpush3.bf16.msra.mxu1 %v592_v15  ;;  %v114_v15 = vpack.c.bf16 %v101_v4, %v100_v0  ;;  %v111_v22 = vadd.f32 %v95_v14, %v45_v19  ;;  %v115_v23 = vpack.c.bf16 %v103_v5, %v102_v20 }
  0x14   :  { %549 = vmatprep.subr.bf16.mxu0 %v593_v28  ;;  %576 = vmatprep.subr.bf16.mxu1 %v593_v28 }
  0x15   :  { %v119_v24 = vpack.c.bf16 %v111_v22, %v110_v21 }
  0x17   :  { %550 = vmatpush3.bf16.msra.mxu0 %v593_v28  ;;  %584 = vmatpush3.bf16.msra.mxu1 %v593_v28  ;;  %v403_v9 = vld [vmem:[%s819_s6] sm:$0x1]  ;;  %v427_v12 = vld [vmem:[%s819_s6 + $0x1] sm:$0x1] }
  0x18   :  { %551 = vmatprep.subr.bf16.mxu0 %v594_v39  ;;  %577 = vmatprep.subr.bf16.mxu1 %v594_v39 }
  0x1b   :  { %552 = vmatpush3.bf16.msra.mxu0 %v594_v39  ;;  %585 = vmatpush3.bf16.msra.mxu1 %v594_v39 }
  0x1c   :  { %553 = vmatprep.subr.bf16.mxu0 %v595_v50  ;;  %578 = vmatprep.subr.bf16.mxu1 %v595_v50 }
  0x1f   :  { %554 = vmatpush3.bf16.msra.mxu0 %v595_v50  ;;  %586 = vmatpush3.bf16.msra.mxu1 %v595_v50 }
  0x22   :  { %556 = vmatmul.mubr.bf16.vlgmr.msra.gmra.mrb[0].mxu0 %v113_v8  ;;  %564 = vmatmul.mubr.bf16.vlgmr.msra.gmra.mrb[0].mxu1 %v117_v10 }
  0x23   :  { %559 = vmatprep.mubr.bf16.mxu0 %v114_v15  ;;  %567 = vmatprep.mubr.bf16.mxu1 %v118_v16 }
  0x2a   :  { %560 = vmatmul.mubr.bf16.gmra.mrb[4].mxu0 %v115_v23  ;;  %568 = vmatmul.mubr.bf16.gmra.mrb[4].mxu1 %v119_v24 }
  0xf5   :  { %v557_v27 = vpop.f32.mrb[0].mxu0  ;;  %v565_v28 = vpop.f32.mrb[0].mxu1 }
  0xf6   :  { %v234_v29 = vadd.f32 %v557_v27, %v475_v26  ;;  %v225_v30 = vpop.f32.mrb[1].mxu0  ;;  %v266_v31 = vadd.f32 %v565_v28, %v475_v26  ;;  %v257_v32 = vpop.f32.mrb[1].mxu1 }
  0xf7   :  { %v226_v33 = vadd.f32 %v475_v26, %v225_v30  ;;  %v558_v34 = vpop.f32.mrb[2].mxu0  ;;  %v258_v35 = vadd.f32 %v475_v26, %v257_v32  ;;  %v566_v36 = vpop.f32.mrb[2].mxu1 }
  0xf8   :  { %290 = vst [vmem:[%s821_s5 + $0x10] sm:$0xff] %v234_v29  ;;  %v237_v37 = vadd.f32 %v558_v34, %v475_v26  ;;  %v228_v38 = vpop.f32.mrb[3].mxu0  ;;  %298 = vst [vmem:[%s821_s5 + $0x50] sm:$0xff] %v266_v31  ;;  %v269_v39 = vadd.f32 %v566_v36, %v475_v26  ;;  %v260_v40 = vpop.f32.mrb[3].mxu1 }
  0xf9   :  { %288 = vst [vmem:[%s821_s5] sm:$0xff] %v226_v33  ;;  %v229_v41 = vadd.f32 %v475_v26, %v228_v38  ;;  %296 = vst [vmem:[%s821_s5 + $0x40] sm:$0xff] %v258_v35  ;;  %v261_v42 = vadd.f32 %v475_v26, %v260_v40  ;;  %v428_v43 = vmul.f32 %v226_v33, %v226_v33 }
  0xfa   :  { %291 = vst [vmem:[%s821_s5 + $0x18] sm:$0xff] %v237_v37  ;;  %299 = vst [vmem:[%s821_s5 + $0x58] sm:$0xff] %v269_v39 }
  0xfb   :  { %289 = vst [vmem:[%s821_s5 + $0x8] sm:$0xff] %v229_v41  ;;  %v404_v44 = vadd.f32 %v229_v41, %v226_v33  ;;  %v429_v45 = vmul.f32 %v229_v41, %v229_v41  ;;  %297 = vst [vmem:[%s821_s5 + $0x48] sm:$0xff] %v261_v42 }
  0xfd   :  { %v419_v46 = vrot.slane %v404_v44, 4  ;;  %v444_v47 = vadd.f32 %v429_v45, %v428_v43  ;;  %v561_v48 = vpop.f32.mrb[4].mxu0  ;;  %v569_v49 = vpop.f32.mrb[4].mxu1 }
  0xfe   :  { %v250_v50 = vadd.f32 %v561_v48, %v475_v26  ;;  %v282_v51 = vadd.f32 %v569_v49, %v475_v26  ;;  %v241_v52 = vpop.f32.mrb[5].mxu0  ;;  %v273_v53 = vpop.f32.mrb[5].mxu1 }
  0xff   :  { %v420_v54 = vadd.f32 %v419_v46, %v404_v44  ;;  %v459_v55 = vrot.slane %v444_v47, 4  ;;  %v242_v56 = vadd.f32 %v475_v26, %v241_v52  ;;  %v274_v57 = vadd.f32 %v475_v26, %v273_v53  ;;  %v562_v58 = vpop.f32.mrb[6].mxu0  ;;  %v570_v59 = vpop.f32.mrb[6].mxu1 }
 0x100   :  { %294 = vst [vmem:[%s821_s5 + $0x30] sm:$0xff] %v250_v50  ;;  %302 = vst [vmem:[%s821_s5 + $0x70] sm:$0xff] %v282_v51  ;;  %v253_v60 = vadd.f32 %v562_v58, %v475_v26  ;;  %v285_v61 = vadd.f32 %v570_v59, %v475_v26  ;;  %v244_v62 = vpop.f32.mrb[7].mxu0  ;;  %v276_v63 = vpop.f32.mrb[7].mxu1 }
 0x101   :  { %v421_v0 = vrot.slane %v420_v54, 2  ;;  %v460_v1 = vadd.f32 %v459_v55, %v444_v47  ;;  %292 = vst [vmem:[%s821_s5 + $0x20] sm:$0xff] %v242_v56  ;;  %300 = vst [vmem:[%s821_s5 + $0x60] sm:$0xff] %v274_v57  ;;  %v245_v2 = vadd.f32 %v475_v26, %v244_v62  ;;  %v277_v3 = vadd.f32 %v475_v26, %v276_v63 }
 0x102   :  { %295 = vst [vmem:[%s821_s5 + $0x38] sm:$0xff] %v253_v60  ;;  %303 = vst [vmem:[%s821_s5 + $0x78] sm:$0xff] %v285_v61 }
 0x103   :  { %v422_v4 = vadd.f32 %v421_v0, %v420_v54  ;;  %v461_v6 = vrot.slane %v460_v1, 2  ;;  %293 = vst [vmem:[%s821_s5 + $0x28] sm:$0xff] %v245_v2  ;;  %301 = vst [vmem:[%s821_s5 + $0x68] sm:$0xff] %v277_v3 }
 0x105   :  { %v423_v7 = vrot.slane %v422_v4, 1  ;;  %v462_v8 = vadd.f32 %v461_v6, %v460_v1 }
 0x107   :  { %v424_v10 = vadd.f32 %v423_v7, %v422_v4  ;;  %v463_v11 = vrot.slane %v462_v8, 1 }
 0x109   :  { %v425_v13 = vadd.f32 %v424_v10, %v403_v9  ;;  %v464_v14 = vadd.f32 %v463_v11, %v462_v8 }
 0x10b   :  { %426 = vst [vmem:[%s819_s6] sm:$0x1] %v425_v13  ;;  %v465_v15 = vadd.f32 %v464_v14, %v427_v12 }
 0x10d   :  { %466 = vst [vmem:[%s819_s6 + $0x1] sm:$0x1] %v465_v15 }

// kernel: mpnn_forward.17
= control target key start
LH: loop header
LB: loop body
LE: loop exit
PB: predicated region body
PF: predicated region fallthrough
CT: control target
= control target key end

     0   :  { %v54_v11 = vlaneseq  ;;  %s797_s4 = inlined_call_operand.vmem [shape: bf16[128,128], index: 4, kind: input, shape index: {}]   ;;  %s798_s1 = inlined_call_operand.vmem [shape: f32[2,128], index: 1, kind: input, shape index: {}]   ;;  %s799_s0 = inlined_call_operand.vmem [shape: f32[128,128], index: 0, kind: input, shape index: {}]   ;;  %s800_s2 = inlined_call_operand.vmem [shape: f32[1,128], index: 2, kind: input, shape index: {}]   ;;  %s801_s3 = inlined_call_operand.vmem [shape: f32[1,128], index: 3, kind: input, shape index: {}]   ;;  %s802_s7 = inlined_call_operand.vmem [shape: f32[2,128], index: 7, kind: output, shape index: {1}]   ;;  %s803_s5 = inlined_call_operand.vmem [shape: f32[1,128], index: 5, kind: input, shape index: {}]   ;;  %s804_s6 = inlined_call_operand.vmem [shape: f32[128,128], index: 6, kind: output, shape index: {0}]  }
   0x1   :  { %v575_v0 = vld [vmem:[%s797_s4] sm:$0xff]   ;;  %v576_v1 = vld [vmem:[%s797_s4 + $0x8] sm:$0xff]   ;;  %v577_v2 = vld [vmem:[%s797_s4 + $0x10] sm:$0xff]  }
   0x2   :  { %526 = vmatprep.subr.bf16.mxu0 %v575_v0  ;;  %558 = vmatprep.subr.bf16.mxu1 %v575_v0  ;;  %v578_v3 = vld [vmem:[%s797_s4 + $0x18] sm:$0xff]   ;;  %v31_v4 = vld [vmem:[%s798_s1] sm:$0x1]  ;;  %v33_v5 = vld [vmem:[%s798_s1 + $0x1] sm:$0x1]  ;;  %v55_v14 = vshrl.u32 %v54_v11, 7 }
   0x3   :  { %527 = vmatpush3.bf16.msra.mxu0 %v575_v0  ;;  %566 = vmatpush3.bf16.msra.mxu1 %v575_v0  ;;  %v32_v6 = vmul.f32 0.0625, %v31_v4  ;;  %v34_v7 = vmul.f32 0.0625, %v33_v5  ;;  %v579_v9 = vld [vmem:[%s797_s4 + $0x20] sm:$0xff]   ;;  %v580_v13 = vld [vmem:[%s797_s4 + $0x28] sm:$0xff]   ;;  %v581_v16 = vld [vmem:[%s797_s4 + $0x30] sm:$0xff]  }
   0x4   :  { %528 = vmatprep.subr.bf16.mxu0 %v576_v1  ;;  %559 = vmatprep.subr.bf16.mxu1 %v576_v1  ;;  %v56_v17 = vsub.s32 0, %v55_v14  ;;  %v582_v18 = vld [vmem:[%s797_s4 + $0x38] sm:$0xff]   ;;  %v38_v19 = vld [vmem:[%s799_s0] sm:$0xff]  ;;  %v39_v20 = vld [vmem:[%s799_s0 + $0x8] sm:$0xff] }
   0x5   :  { %v35_v8 = vmul.f32 %v32_v6, %v32_v6  ;;  %v76_v22 = vld [vmem:[%s800_s2] sm:$0x1]  ;;  %v40_v23 = vld [vmem:[%s799_s0 + $0x10] sm:$0xff]  ;;  %v41_v24 = vld [vmem:[%s799_s0 + $0x18] sm:$0xff] }
   0x6   :  { %v662_v21 = vrot.slane %v32_v6, %v56_v17  ;;  %v46_v25 = vld [vmem:[%s799_s0 + $0x40] sm:$0xff]  ;;  %v47_v26 = vld [vmem:[%s799_s0 + $0x48] sm:$0xff]  ;;  %v48_v27 = vld [vmem:[%s799_s0 + $0x50] sm:$0xff] }
   0x7   :  { %529 = vmatpush3.bf16.msra.mxu0 %v576_v1  ;;  %567 = vmatpush3.bf16.msra.mxu1 %v576_v1  ;;  %v36_v10 = vsub.f32 %v34_v7, %v35_v8  ;;  %v49_v28 = vld [vmem:[%s799_s0 + $0x58] sm:$0xff]  ;;  %v42_v29 = vld [vmem:[%s799_s0 + $0x20] sm:$0xff]  ;;  %v43_v30 = vld [vmem:[%s799_s0 + $0x28] sm:$0xff] }
   0x8   :  { %530 = vmatprep.subr.bf16.mxu0 %v577_v2  ;;  %560 = vmatprep.subr.bf16.mxu1 %v577_v2  ;;  %v58_v32 = vsub.f32 %v38_v19, %v662_v21  ;;  %v59_v33 = vsub.f32 %v39_v20, %v662_v21  ;;  %v60_v34 = vsub.f32 %v40_v23, %v662_v21  ;;  %v50_v35 = vld [vmem:[%s799_s0 + $0x60] sm:$0xff]  ;;  %v51_v36 = vld [vmem:[%s799_s0 + $0x68] sm:$0xff]  ;;  %v44_v37 = vld [vmem:[%s799_s0 + $0x30] sm:$0xff] }
   0x9   :  { %v37_v12 = vmax.f32 %v36_v10, 0.0  ;;  %v61_v39 = vsub.f32 %v41_v24, %v662_v21  ;;  %v66_v40 = vsub.f32 %v46_v25, %v662_v21  ;;  %v67_v41 = vsub.f32 %v47_v26, %v662_v21  ;;  %v45_v42 = vld [vmem:[%s799_s0 + $0x38] sm:$0xff]  ;;  %v52_v43 = vld [vmem:[%s799_s0 + $0x70] sm:$0xff]  ;;  %v500_v52 = vld [vmem:[%s801_s3] ss:$0 sm:$0xff] }
   0xa   :  { %v715_v44 = vld [vmem:[%s799_s0 + $0x78] sm:$0xff]  ;;  %v68_v45 = vsub.f32 %v48_v27, %v662_v21  ;;  %v69_v46 = vsub.f32 %v49_v28, %v662_v21  ;;  %v62_v47 = vsub.f32 %v42_v29, %v662_v21  ;;  %v63_v49 = vsub.f32 %v43_v30, %v662_v21 }
   0xb   :  { %531 = vmatpush3.bf16.msra.mxu0 %v577_v2  ;;  %568 = vmatpush3.bf16.msra.mxu1 %v577_v2  ;;  %v74_v15 = vadd.f32 1e-05, %v37_v12  ;;  %v70_v50 = vsub.f32 %v50_v35, %v662_v21  ;;  %v71_v51 = vsub.f32 %v51_v36, %v662_v21  ;;  %v64_v53 = vsub.f32 %v44_v37, %v662_v21 }
   0xc   :  { %532 = vmatprep.subr.bf16.mxu0 %v578_v3  ;;  %561 = vmatprep.subr.bf16.mxu1 %v578_v3  ;;  %v65_v54 = vsub.f32 %v45_v42, %v662_v21  ;;  %v72_v55 = vsub.f32 %v52_v43, %v662_v21  ;;  %v73_v56 = vsub.f32 %v715_v44, %v662_v21 }
   0xd   :  { %583 = vrsqrt.f32 %v74_v15 }
   0xf   :  { %533 = vmatpush3.bf16.msra.mxu0 %v578_v3  ;;  %569 = vmatpush3.bf16.msra.mxu1 %v578_v3 }
  0x10   :  { %534 = vmatprep.subr.bf16.mxu0 %v579_v9  ;;  %562 = vmatprep.subr.bf16.mxu1 %v579_v9 }
  0x13   :  { %535 = vmatpush3.bf16.msra.mxu0 %v579_v9  ;;  %570 = vmatpush3.bf16.msra.mxu1 %v579_v9 }
  0x14   :  { %536 = vmatprep.subr.bf16.mxu0 %v580_v13  ;;  %563 = vmatprep.subr.bf16.mxu1 %v580_v13 }
  0x17   :  { %537 = vmatpush3.bf16.msra.mxu0 %v580_v13  ;;  %571 = vmatpush3.bf16.msra.mxu1 %v580_v13  ;;  %v584_v31 = vpop.eup %583 }
  0x18   :  { %538 = vmatprep.subr.bf16.mxu0 %v581_v16  ;;  %564 = vmatprep.subr.bf16.mxu1 %v581_v16  ;;  %v77_v38 = vmul.f32 %v584_v31, %v76_v22 }
  0x1a   :  { %v81_v48 = vrot.slane %v77_v38, %v56_v17 }
  0x1b   :  { %539 = vmatpush3.bf16.msra.mxu0 %v581_v16  ;;  %572 = vmatpush3.bf16.msra.mxu1 %v581_v16 }
  0x1c   :  { %540 = vmatprep.subr.bf16.mxu0 %v582_v18  ;;  %565 = vmatprep.subr.bf16.mxu1 %v582_v18  ;;  %v82_v57 = vmul.f32 %v81_v48, %v58_v32  ;;  %v83_v58 = vmul.f32 %v81_v48, %v59_v33  ;;  %v84_v59 = vmul.f32 %v81_v48, %v60_v34 }
  0x1d   :  { %v85_v60 = vmul.f32 %v81_v48, %v61_v39  ;;  %v90_v61 = vmul.f32 %v81_v48, %v66_v40  ;;  %v91_v62 = vmul.f32 %v81_v48, %v67_v41  ;;  %v92_v63 = vmul.f32 %v81_v48, %v68_v45 }
  0x1e   :  { %v93_v0 = vmul.f32 %v81_v48, %v69_v46  ;;  %v105_v1 = vadd.f32 %v500_v52, %v82_v57  ;;  %v106_v2 = vadd.f32 %v500_v52, %v83_v58  ;;  %v107_v3 = vadd.f32 %v500_v52, %v84_v59 }
  0x1f   :  { %541 = vmatpush3.bf16.msra.mxu0 %v582_v18  ;;  %573 = vmatpush3.bf16.msra.mxu1 %v582_v18  ;;  %v108_v4 = vadd.f32 %v500_v52, %v85_v60  ;;  %v113_v5 = vadd.f32 %v500_v52, %v90_v61  ;;  %v114_v6 = vadd.f32 %v500_v52, %v91_v62 }
  0x20   :  { %v115_v7 = vadd.f32 %v500_v52, %v92_v63  ;;  %v116_v8 = vadd.f32 %v500_v52, %v93_v0  ;;  %v121_v9 = vmax.f32 %v105_v1, 0.0  ;;  %v122_v10 = vmax.f32 %v106_v2, 0.0 }
  0x21   :  { %v123_v11 = vmax.f32 %v107_v3, 0.0  ;;  %v124_v12 = vmax.f32 %v108_v4, 0.0  ;;  %v129_v13 = vmax.f32 %v113_v5, 0.0  ;;  %v130_v14 = vmax.f32 %v114_v6, 0.0 }
  0x22   :  { %v131_v15 = vmax.f32 %v115_v7, 0.0  ;;  %v132_v16 = vmax.f32 %v116_v8, 0.0  ;;  %v137_v17 = vpack.c.bf16 %v122_v10, %v121_v9  ;;  %v86_v19 = vmul.f32 %v81_v48, %v62_v47 }
  0x23   :  { %v138_v18 = vpack.c.bf16 %v124_v12, %v123_v11  ;;  %v87_v20 = vmul.f32 %v81_v48, %v63_v49  ;;  %v141_v21 = vpack.c.bf16 %v130_v14, %v129_v13  ;;  %v94_v23 = vmul.f32 %v81_v48, %v70_v50 }
  0x24   :  { %v142_v22 = vpack.c.bf16 %v132_v16, %v131_v15  ;;  %v95_v24 = vmul.f32 %v81_v48, %v71_v51  ;;  %542 = vmatprep.mubr.bf16.mxu0 %v137_v17  ;;  %v109_v25 = vadd.f32 %v500_v52, %v86_v19  ;;  %v88_v27 = vmul.f32 %v81_v48, %v64_v53 }
  0x25   :  { %v110_v26 = vadd.f32 %v500_v52, %v87_v20  ;;  %v89_v28 = vmul.f32 %v81_v48, %v65_v54  ;;  %543 = vmatmul.mubr.bf16.vlgmr.msra.gmra.mrb[0].mxu0 %v138_v18  ;;  %550 = vmatprep.mubr.bf16.mxu1 %v141_v21  ;;  %v117_v29 = vadd.f32 %v500_v52, %v94_v23  ;;  %v585_v50 = vmov 0.0  }
  0x26   :  { %v118_v30 = vadd.f32 %v500_v52, %v95_v24  ;;  %v96_v31 = vmul.f32 %v81_v48, %v72_v55  ;;  %551 = vmatmul.mubr.bf16.vlgmr.msra.gmra.mrb[0].mxu1 %v142_v22  ;;  %v125_v32 = vmax.f32 %v109_v25, 0.0  ;;  %v111_v34 = vadd.f32 %v500_v52, %v88_v27  ;;  %30 = vst [vmem:[%s802_s7] sm:$0x3] %v585_v50 }
  0x27   :  { %v126_v33 = vmax.f32 %v110_v26, 0.0  ;;  %v112_v35 = vadd.f32 %v500_v52, %v89_v28  ;;  %v133_v36 = vmax.f32 %v117_v29, 0.0  ;;  %v97_v38 = vmul.f32 %v81_v48, %v73_v56  ;;  %v501_v48 = vld [vmem:[%s803_s5] ss:$0 sm:$0xff] }
  0x28   :  { %v134_v37 = vmax.f32 %v118_v30, 0.0  ;;  %v119_v39 = vadd.f32 %v500_v52, %v96_v31  ;;  %v127_v41 = vmax.f32 %v111_v34, 0.0 }
  0x29   :  { %v139_v40 = vpack.c.bf16 %v126_v33, %v125_v32  ;;  %v128_v42 = vmax.f32 %v112_v35, 0.0  ;;  %v120_v44 = vadd.f32 %v500_v52, %v97_v38 }
  0x2a   :  { %v143_v43 = vpack.c.bf16 %v134_v37, %v133_v36  ;;  %v135_v45 = vmax.f32 %v119_v39, 0.0 }
  0x2b   :  { %546 = vmatprep.mubr.bf16.mxu0 %v139_v40  ;;  %v140_v46 = vpack.c.bf16 %v128_v42, %v127_v41  ;;  %v136_v47 = vmax.f32 %v120_v44, 0.0 }
  0x2c   :  { %554 = vmatprep.mubr.bf16.mxu1 %v143_v43 }
  0x2d   :  { %547 = vmatmul.mubr.bf16.gmra.mrb[4].mxu0 %v140_v46  ;;  %v144_v49 = vpack.c.bf16 %v136_v47, %v135_v45  ;;  %v428_v32 = vld [vmem:[%s802_s7] sm:$0x1]  ;;  %v452_v35 = vld [vmem:[%s802_s7 + $0x1] sm:$0x1] }
  0x2f   :  { %555 = vmatmul.mubr.bf16.gmra.mrb[4].mxu1 %v144_v49 }
  0xf8   :  { %v544_v51 = vpop.f32.mrb[0].mxu0 }
  0xf9   :  { %v259_v53 = vadd.f32 %v544_v51, %v501_v48  ;;  %v250_v52 = vpop.f32.mrb[1].mxu0  ;;  %v552_v54 = vpop.f32.mrb[0].mxu1 }
  0xfa   :  { %v251_v55 = vadd.f32 %v501_v48, %v250_v52  ;;  %v545_v56 = vpop.f32.mrb[2].mxu0  ;;  %v291_v57 = vadd.f32 %v552_v54, %v501_v48  ;;  %v282_v58 = vpop.f32.mrb[1].mxu1 }
  0xfb   :  { %315 = vst [vmem:[%s804_s6 + $0x10] sm:$0xff] %v259_v53  ;;  %v262_v59 = vadd.f32 %v545_v56, %v501_v48  ;;  %v253_v60 = vpop.f32.mrb[3].mxu0  ;;  %v283_v61 = vadd.f32 %v501_v48, %v282_v58  ;;  %v553_v62 = vpop.f32.mrb[2].mxu1 }
  0xfc   :  { %313 = vst [vmem:[%s804_s6] sm:$0xff] %v251_v55  ;;  %v254_v63 = vadd.f32 %v501_v48, %v253_v60  ;;  %323 = vst [vmem:[%s804_s6 + $0x50] sm:$0xff] %v291_v57  ;;  %v294_v0 = vadd.f32 %v553_v62, %v501_v48  ;;  %v285_v1 = vpop.f32.mrb[3].mxu1  ;;  %v453_v3 = vmul.f32 %v251_v55, %v251_v55 }
  0xfd   :  { %316 = vst [vmem:[%s804_s6 + $0x18] sm:$0xff] %v262_v59  ;;  %321 = vst [vmem:[%s804_s6 + $0x40] sm:$0xff] %v283_v61  ;;  %v286_v2 = vadd.f32 %v501_v48, %v285_v1 }
  0xfe   :  { %314 = vst [vmem:[%s804_s6 + $0x8] sm:$0xff] %v254_v63  ;;  %v429_v4 = vadd.f32 %v254_v63, %v251_v55  ;;  %v454_v5 = vmul.f32 %v254_v63, %v254_v63  ;;  %324 = vst [vmem:[%s804_s6 + $0x58] sm:$0xff] %v294_v0 }
  0xff   :  { %322 = vst [vmem:[%s804_s6 + $0x48] sm:$0xff] %v286_v2 }
 0x100   :  { %v444_v6 = vrot.slane %v429_v4, 4  ;;  %v469_v7 = vadd.f32 %v454_v5, %v453_v3  ;;  %v548_v8 = vpop.f32.mrb[4].mxu0 }
 0x101   :  { %v275_v9 = vadd.f32 %v548_v8, %v501_v48  ;;  %v266_v10 = vpop.f32.mrb[5].mxu0 }
 0x102   :  { %v445_v11 = vadd.f32 %v444_v6, %v429_v4  ;;  %v484_v12 = vrot.slane %v469_v7, 4  ;;  %v556_v13 = vpop.f32.mrb[4].mxu1  ;;  %v267_v14 = vadd.f32 %v501_v48, %v266_v10  ;;  %v549_v15 = vpop.f32.mrb[6].mxu0 }
 0x103   :  { %319 = vst [vmem:[%s804_s6 + $0x30] sm:$0xff] %v275_v9  ;;  %v307_v16 = vadd.f32 %v556_v13, %v501_v48  ;;  %v298_v17 = vpop.f32.mrb[5].mxu1  ;;  %v278_v18 = vadd.f32 %v549_v15, %v501_v48  ;;  %v269_v19 = vpop.f32.mrb[7].mxu0 }
 0x104   :  { %v446_v20 = vrot.slane %v445_v11, 2  ;;  %v485_v21 = vadd.f32 %v484_v12, %v469_v7  ;;  %317 = vst [vmem:[%s804_s6 + $0x20] sm:$0xff] %v267_v14  ;;  %v299_v22 = vadd.f32 %v501_v48, %v298_v17  ;;  %v557_v23 = vpop.f32.mrb[6].mxu1  ;;  %v270_v24 = vadd.f32 %v501_v48, %v269_v19 }
 0x105   :  { %327 = vst [vmem:[%s804_s6 + $0x70] sm:$0xff] %v307_v16  ;;  %320 = vst [vmem:[%s804_s6 + $0x38] sm:$0xff] %v278_v18  ;;  %v310_v25 = vadd.f32 %v557_v23, %v501_v48  ;;  %v301_v26 = vpop.f32.mrb[7].mxu1 }
 0x106   :  { %v447_v27 = vadd.f32 %v446_v20, %v445_v11  ;;  %v486_v28 = vrot.slane %v485_v21, 2  ;;  %325 = vst [vmem:[%s804_s6 + $0x60] sm:$0xff] %v299_v22  ;;  %318 = vst [vmem:[%s804_s6 + $0x28] sm:$0xff] %v270_v24  ;;  %v302_v29 = vadd.f32 %v501_v48, %v301_v26 }
 0x107   :  { %328 = vst [vmem:[%s804_s6 + $0x78] sm:$0xff] %v310_v25 }
 0x108   :  { %v448_v30 = vrot.slane %v447_v27, 1  ;;  %v487_v31 = vadd.f32 %v486_v28, %v485_v21  ;;  %326 = vst [vmem:[%s804_s6 + $0x68] sm:$0xff] %v302_v29 }
 0x10a   :  { %v449_v33 = vadd.f32 %v448_v30, %v447_v27  ;;  %v488_v34 = vrot.slane %v487_v31, 1 }
 0x10c   :  { %v450_v36 = vadd.f32 %v449_v33, %v428_v32  ;;  %v489_v37 = vadd.f32 %v488_v34, %v487_v31 }
 0x10e   :  { %451 = vst [vmem:[%s802_s7] sm:$0x1] %v450_v36  ;;  %v490_v38 = vadd.f32 %v489_v37, %v452_v35 }
 0x110   :  { %491 = vst [vmem:[%s802_s7 + $0x1] sm:$0x1] %v490_v38 }

// kernel: mpnn_forward.18
= control target key start
LH: loop header
LB: loop body
LE: loop exit
PB: predicated region body
PF: predicated region fallthrough
CT: control target
= control target key end

     0   :  { %v40_v6 = vlaneseq  ;;  %s416_s1 = inlined_call_operand.vmem [shape: f32[2,128], index: 1, kind: input, shape index: {}]   ;;  %s417_s0 = inlined_call_operand.vmem [shape: f32[128,128], index: 0, kind: input, shape index: {}]   ;;  %s418_s2 = inlined_call_operand.vmem [shape: f32[1,128], index: 2, kind: input, shape index: {}]   ;;  %s419_s3 = inlined_call_operand.vmem [shape: f32[1,128], index: 3, kind: input, shape index: {}]   ;;  %s420_s4 = inlined_call_operand.vmem [shape: bf16[128,128], index: 4, kind: output, shape index: {}]  }
   0x1   :  { %v17_v0 = vld [vmem:[%s416_s1] sm:$0x1]  ;;  %v19_v1 = vld [vmem:[%s416_s1 + $0x1] sm:$0x1]  ;;  %v25_v12 = vld [vmem:[%s417_s0 + $0x8] sm:$0xff] }
   0x2   :  { %v18_v2 = vmul.f32 0.0625, %v17_v0  ;;  %v20_v3 = vmul.f32 0.0625, %v19_v1  ;;  %v41_v8 = vshrl.u32 %v40_v6, 7  ;;  %v24_v11 = vld [vmem:[%s417_s0] sm:$0xff]  ;;  %v26_v15 = vld [vmem:[%s417_s0 + $0x10] sm:$0xff]  ;;  %v27_v16 = vld [vmem:[%s417_s0 + $0x18] sm:$0xff] }
   0x3   :  { %v62_v14 = vld [vmem:[%s418_s2] sm:$0x1]  ;;  %v29_v18 = vld [vmem:[%s417_s0 + $0x28] sm:$0xff]  ;;  %v30_v19 = vld [vmem:[%s417_s0 + $0x30] sm:$0xff] }
   0x4   :  { %v21_v4 = vmul.f32 %v18_v2, %v18_v2  ;;  %v42_v10 = vsub.s32 0, %v41_v8  ;;  %v28_v17 = vld [vmem:[%s417_s0 + $0x20] sm:$0xff]  ;;  %v31_v20 = vld [vmem:[%s417_s0 + $0x38] sm:$0xff]  ;;  %v33_v22 = vld [vmem:[%s417_s0 + $0x48] sm:$0xff] }
   0x5   :  { %v32_v21 = vld [vmem:[%s417_s0 + $0x40] sm:$0xff]  ;;  %v34_v26 = vld [vmem:[%s417_s0 + $0x50] sm:$0xff]  ;;  %v35_v27 = vld [vmem:[%s417_s0 + $0x58] sm:$0xff] }
   0x6   :  { %v22_v5 = vsub.f32 %v20_v3, %v21_v4  ;;  %v326_v13 = vrot.slane %v18_v2, %v42_v10  ;;  %v36_v28 = vld [vmem:[%s417_s0 + $0x60] sm:$0xff]  ;;  %v37_v33 = vld [vmem:[%s417_s0 + $0x68] sm:$0xff]  ;;  %v38_v34 = vld [vmem:[%s417_s0 + $0x70] sm:$0xff] }
   0x7   :  { %v39_v35 = vld [vmem:[%s417_s0 + $0x78] sm:$0xff]  ;;  %v207_v44 = vld [vmem:[%s419_s3] ss:$0 sm:$0xff] }
   0x8   :  { %v23_v7 = vmax.f32 %v22_v5, 0.0  ;;  %v44_v24 = vsub.f32 %v24_v11, %v326_v13  ;;  %v45_v25 = vsub.f32 %v25_v12, %v326_v13  ;;  %v46_v30 = vsub.f32 %v26_v15, %v326_v13 }
   0x9   :  { %v47_v31 = vsub.f32 %v27_v16, %v326_v13  ;;  %v48_v32 = vsub.f32 %v28_v17, %v326_v13  ;;  %v49_v36 = vsub.f32 %v29_v18, %v326_v13  ;;  %v50_v37 = vsub.f32 %v30_v19, %v326_v13 }
   0xa   :  { %v60_v9 = vadd.f32 1e-05, %v23_v7  ;;  %v51_v38 = vsub.f32 %v31_v20, %v326_v13  ;;  %v52_v39 = vsub.f32 %v32_v21, %v326_v13  ;;  %v53_v41 = vsub.f32 %v33_v22, %v326_v13 }
   0xb   :  { %v54_v42 = vsub.f32 %v34_v26, %v326_v13  ;;  %v55_v43 = vsub.f32 %v35_v27, %v326_v13  ;;  %v56_v45 = vsub.f32 %v36_v28, %v326_v13  ;;  %v57_v46 = vsub.f32 %v37_v33, %v326_v13 }
   0xc   :  { %287 = vrsqrt.f32 %v60_v9  ;;  %v58_v47 = vsub.f32 %v38_v34, %v326_v13  ;;  %v59_v48 = vsub.f32 %v39_v35, %v326_v13 }
  0x16   :  { %v288_v23 = vpop.eup %287 }
  0x17   :  { %v63_v29 = vmul.f32 %v288_v23, %v62_v14 }
  0x19   :  { %v67_v40 = vrot.slane %v63_v29, %v42_v10 }
  0x1b   :  { %v68_v49 = vmul.f32 %v67_v40, %v44_v24  ;;  %v69_v50 = vmul.f32 %v67_v40, %v45_v25  ;;  %v70_v51 = vmul.f32 %v67_v40, %v46_v30  ;;  %v71_v52 = vmul.f32 %v67_v40, %v47_v31 }
  0x1c   :  { %v72_v53 = vmul.f32 %v67_v40, %v48_v32  ;;  %v73_v54 = vmul.f32 %v67_v40, %v49_v36  ;;  %v74_v55 = vmul.f32 %v67_v40, %v50_v37  ;;  %v75_v56 = vmul.f32 %v67_v40, %v51_v38 }
  0x1d   :  { %v91_v57 = vadd.f32 %v207_v44, %v68_v49  ;;  %v92_v58 = vadd.f32 %v207_v44, %v69_v50  ;;  %v93_v59 = vadd.f32 %v207_v44, %v70_v51  ;;  %v94_v60 = vadd.f32 %v207_v44, %v71_v52 }
  0x1e   :  { %v95_v61 = vadd.f32 %v207_v44, %v72_v53  ;;  %v96_v62 = vadd.f32 %v207_v44, %v73_v54  ;;  %v97_v63 = vadd.f32 %v207_v44, %v74_v55  ;;  %v98_v0 = vadd.f32 %v207_v44, %v75_v56 }
  0x1f   :  { %v107_v1 = vmax.f32 %v91_v57, 0.0  ;;  %v108_v2 = vmax.f32 %v92_v58, 0.0  ;;  %v109_v3 = vmax.f32 %v93_v59, 0.0  ;;  %v110_v4 = vmax.f32 %v94_v60, 0.0 }
  0x20   :  { %v111_v5 = vmax.f32 %v95_v61, 0.0  ;;  %v112_v6 = vmax.f32 %v96_v62, 0.0  ;;  %v113_v7 = vmax.f32 %v97_v63, 0.0  ;;  %v114_v8 = vmax.f32 %v98_v0, 0.0 }
  0x21   :  { %v243_v9 = vpack.c.bf16 %v108_v2, %v107_v1  ;;  %v248_v10 = vpack.c.bf16 %v110_v4, %v109_v3  ;;  %v76_v11 = vmul.f32 %v67_v40, %v52_v39  ;;  %v77_v12 = vmul.f32 %v67_v40, %v53_v41 }
  0x22   :  { %v253_v13 = vpack.c.bf16 %v112_v6, %v111_v5  ;;  %v258_v14 = vpack.c.bf16 %v114_v8, %v113_v7  ;;  %v78_v15 = vmul.f32 %v67_v40, %v54_v42  ;;  %v79_v16 = vmul.f32 %v67_v40, %v55_v43 }
  0x23   :  { %244 = vst [vmem:[%s420_s4] sm:$0xff] %v243_v9   ;;  %280 = vst [vmem:[%s420_s4 + $0x8] sm:$0xff] %v248_v10   ;;  %v99_v17 = vadd.f32 %v207_v44, %v76_v11  ;;  %v100_v18 = vadd.f32 %v207_v44, %v77_v12  ;;  %v80_v19 = vmul.f32 %v67_v40, %v56_v45 }
  0x24   :  { %v81_v20 = vmul.f32 %v67_v40, %v57_v46  ;;  %281 = vst [vmem:[%s420_s4 + $0x10] sm:$0xff] %v253_v13   ;;  %282 = vst [vmem:[%s420_s4 + $0x18] sm:$0xff] %v258_v14   ;;  %v101_v21 = vadd.f32 %v207_v44, %v78_v15  ;;  %v102_v22 = vadd.f32 %v207_v44, %v79_v16 }
  0x25   :  { %v82_v23 = vmul.f32 %v67_v40, %v58_v47  ;;  %v83_v24 = vmul.f32 %v67_v40, %v59_v48  ;;  %v115_v25 = vmax.f32 %v99_v17, 0.0  ;;  %v116_v26 = vmax.f32 %v100_v18, 0.0 }
  0x26   :  { %v103_v27 = vadd.f32 %v207_v44, %v80_v19  ;;  %v104_v28 = vadd.f32 %v207_v44, %v81_v20  ;;  %v117_v29 = vmax.f32 %v101_v21, 0.0  ;;  %v118_v30 = vmax.f32 %v102_v22, 0.0 }
  0x27   :  { %v105_v31 = vadd.f32 %v207_v44, %v82_v23  ;;  %v106_v32 = vadd.f32 %v207_v44, %v83_v24  ;;  %v263_v33 = vpack.c.bf16 %v116_v26, %v115_v25 }
  0x28   :  { %v119_v34 = vmax.f32 %v103_v27, 0.0  ;;  %v120_v35 = vmax.f32 %v104_v28, 0.0  ;;  %v268_v36 = vpack.c.bf16 %v118_v30, %v117_v29 }
  0x29   :  { %v121_v37 = vmax.f32 %v105_v31, 0.0  ;;  %v122_v38 = vmax.f32 %v106_v32, 0.0  ;;  %283 = vst [vmem:[%s420_s4 + $0x20] sm:$0xff] %v263_v33  }
  0x2a   :  { %v273_v39 = vpack.c.bf16 %v120_v35, %v119_v34  ;;  %284 = vst [vmem:[%s420_s4 + $0x28] sm:$0xff] %v268_v36  }
  0x2b   :  { %v278_v40 = vpack.c.bf16 %v122_v38, %v121_v37 }
  0x2c   :  { %285 = vst [vmem:[%s420_s4 + $0x30] sm:$0xff] %v273_v39  }
  0x2d   :  { %286 = vst [vmem:[%s420_s4 + $0x38] sm:$0xff] %v278_v40  }

// kernel: mpnn_forward.29
= control target key start
LH: loop header
LB: loop body
LE: loop exit
PB: predicated region body
PF: predicated region fallthrough
CT: control target
= control target key end

     0   :  { %v669_v0 = vmov 0.0   ;;  %vm670_vm0 = vmmov 0   ;;  %s875_s2 = inlined_call_operand.vmem [shape: bf16[128,128], index: 2, kind: input, shape index: {}]   ;;  %s876_s4 = inlined_call_operand.vmem [shape: bf16[128,128], index: 4, kind: input, shape index: {}]   ;;  %s877_s7 = inlined_call_operand.vmem [shape: bf16[128,128], index: 7, kind: input, shape index: {}]   ;;  %s878_s6 = inlined_call_operand.vmem [shape: bf16[128,128], index: 6, kind: input, shape index: {}]   ;;  %s879_s0 = inlined_call_operand.vmem [shape: f32[8,128], index: 0, kind: input, shape index: {}]   ;;  %s880_s1 = inlined_call_operand.vmem [shape: f32[8,128], index: 1, kind: input, shape index: {}]   ;;  %s881_s3 = inlined_call_operand.vmem [shape: f32[1,128], index: 3, kind: input, shape index: {}]   ;;  %s882_s5 = inlined_call_operand.vmem [shape: f32[1,128], index: 5, kind: input, shape index: {}]   ;;  %s883_s8 = inlined_call_operand.vmem [shape: f32[1,128], index: 8, kind: input, shape index: {}]   ;;  %s884_s9 = inlined_call_operand.vmem [shape: f32[8,128], index: 9, kind: output, shape index: {}]  }
   0x1   :  { %555 = vmatprep.subr.bf16.mxu0 %v669_v0  ;;  %575 = vmatprep.subr.bf16.mxu1 %v669_v0  ;;  %v637_v1 = vld [vmem:[%s875_s2] sm:$0xff]   ;;  %v639_v3 = vld [vmem:[%s875_s2 + $0x8] sm:$0xff]   ;;  %v641_v5 = vld [vmem:[%s875_s2 + $0x10] sm:$0xff]  }
   0x2   :  { %v638_v2 = vld [vmem:[%s876_s4] sm:$0xff]   ;;  %571 = vmatprep.mubr.msk.bf16.mxu0 %vm670_vm0, %v669_v0  ;;  %591 = vmatprep.mubr.msk.bf16.mxu1 %vm670_vm0, %v669_v0  ;;  %v640_v4 = vld [vmem:[%s876_s4 + $0x8] sm:$0xff]   ;;  %v642_v6 = vld [vmem:[%s876_s4 + $0x10] sm:$0xff]  }
   0x3   :  { %556 = vmatpush3.bf16.msra.mxu0 %v637_v1  ;;  %576 = vmatpush3.bf16.msra.mxu1 %v638_v2  ;;  %v643_v7 = vld [vmem:[%s875_s2 + $0x18] sm:$0xff]   ;;  %v645_v9 = vld [vmem:[%s875_s2 + $0x20] sm:$0xff]   ;;  %v647_v11 = vld [vmem:[%s875_s2 + $0x28] sm:$0xff]  }
   0x4   :  { %557 = vmatprep.subr.bf16.mxu0 %v669_v0  ;;  %577 = vmatprep.subr.bf16.mxu1 %v669_v0  ;;  %v644_v8 = vld [vmem:[%s876_s4 + $0x18] sm:$0xff]   ;;  %v646_v10 = vld [vmem:[%s876_s4 + $0x20] sm:$0xff]   ;;  %v648_v12 = vld [vmem:[%s876_s4 + $0x28] sm:$0xff]  }
   0x5   :  { %v649_v13 = vld [vmem:[%s875_s2 + $0x30] sm:$0xff]   ;;  %v651_v15 = vld [vmem:[%s875_s2 + $0x38] sm:$0xff]   ;;  %v33_v17 = vld [vmem:[%s879_s0] sm:$0xff] }
   0x6   :  { %v650_v14 = vld [vmem:[%s876_s4 + $0x30] sm:$0xff]   ;;  %v652_v16 = vld [vmem:[%s876_s4 + $0x38] sm:$0xff]   ;;  %v147_v18 = vld [vmem:[%s880_s1] sm:$0xff]  ;;  %v34_v20 = vpack.c.bf16 %v33_v17, %v33_v17 }
   0x7   :  { %558 = vmatpush3.bf16.msra.mxu0 %v639_v3  ;;  %578 = vmatpush3.bf16.msra.mxu1 %v640_v4  ;;  %v653_v19 = vld [vmem:[%s877_s7] sm:$0xff]   ;;  %v148_v21 = vpack.c.bf16 %v147_v18, %v147_v18  ;;  %v655_v23 = vld [vmem:[%s877_s7 + $0x8] sm:$0xff]   ;;  %v657_v25 = vld [vmem:[%s877_s7 + $0x10] sm:$0xff]  }
   0x8   :  { %559 = vmatprep.subr.bf16.mxu0 %v669_v0  ;;  %579 = vmatprep.subr.bf16.mxu1 %v669_v0  ;;  %v654_v22 = vld [vmem:[%s878_s6] sm:$0xff]   ;;  %v656_v24 = vld [vmem:[%s878_s6 + $0x8] sm:$0xff]   ;;  %v658_v26 = vld [vmem:[%s878_s6 + $0x10] sm:$0xff]  }
   0x9   :  { %v659_v27 = vld [vmem:[%s877_s7 + $0x18] sm:$0xff]   ;;  %v661_v29 = vld [vmem:[%s877_s7 + $0x20] sm:$0xff]   ;;  %v663_v31 = vld [vmem:[%s877_s7 + $0x28] sm:$0xff]  }
   0xa   :  { %v660_v28 = vld [vmem:[%s878_s6 + $0x18] sm:$0xff]   ;;  %v662_v30 = vld [vmem:[%s878_s6 + $0x20] sm:$0xff]   ;;  %v664_v32 = vld [vmem:[%s878_s6 + $0x28] sm:$0xff]  }
   0xb   :  { %560 = vmatpush3.bf16.msra.mxu0 %v641_v5  ;;  %580 = vmatpush3.bf16.msra.mxu1 %v642_v6  ;;  %v665_v33 = vld [vmem:[%s877_s7 + $0x30] sm:$0xff]   ;;  %v667_v35 = vld [vmem:[%s877_s7 + $0x38] sm:$0xff]   ;;  %v484_v37 = vld [vmem:[%s881_s3] ss:$0 sm:$0xff] }
   0xc   :  { %561 = vmatprep.subr.bf16.mxu0 %v669_v0  ;;  %581 = vmatprep.subr.bf16.mxu1 %v669_v0  ;;  %v666_v34 = vld [vmem:[%s878_s6 + $0x30] sm:$0xff]   ;;  %v668_v36 = vld [vmem:[%s878_s6 + $0x38] sm:$0xff]   ;;  %v493_v38 = vld [vmem:[%s882_s5] ss:$0 sm:$0xff] }
   0xd   :  { %v518_v55 = vld [vmem:[%s883_s8] ss:$0 sm:$0xff] }
   0xf   :  { %562 = vmatpush3.bf16.msra.mxu0 %v643_v7  ;;  %582 = vmatpush3.bf16.msra.mxu1 %v644_v8 }
  0x10   :  { %563 = vmatprep.subr.bf16.mxu0 %v669_v0  ;;  %583 = vmatprep.subr.bf16.mxu1 %v669_v0 }
  0x13   :  { %564 = vmatpush3.bf16.msra.mxu0 %v645_v9  ;;  %584 = vmatpush3.bf16.msra.mxu1 %v646_v10 }
  0x14   :  { %565 = vmatprep.subr.bf16.mxu0 %v669_v0  ;;  %585 = vmatprep.subr.bf16.mxu1 %v669_v0 }
  0x17   :  { %566 = vmatpush3.bf16.msra.mxu0 %v647_v11  ;;  %586 = vmatpush3.bf16.msra.mxu1 %v648_v12 }
  0x18   :  { %567 = vmatprep.subr.bf16.mxu0 %v669_v0  ;;  %587 = vmatprep.subr.bf16.mxu1 %v669_v0 }
  0x1b   :  { %568 = vmatpush3.bf16.msra.mxu0 %v649_v13  ;;  %588 = vmatpush3.bf16.msra.mxu1 %v650_v14 }
  0x1c   :  { %569 = vmatprep.subr.bf16.mxu0 %v669_v0  ;;  %589 = vmatprep.subr.bf16.mxu1 %v669_v0 }
  0x1f   :  { %570 = vmatpush3.bf16.msra.mxu0 %v651_v15  ;;  %590 = vmatpush3.bf16.msra.mxu1 %v652_v16 }
  0x20   :  { %595 = vmatprep.subr.bf16.mxu0 %v669_v0  ;;  %615 = vmatprep.subr.bf16.mxu1 %v669_v0 }
  0x22   :  { %572 = vmatmul.mubr.bf16.vlgmr.msra.gmra.mrb[0].mxu0 %v34_v20  ;;  %592 = vmatmul.mubr.bf16.vlgmr.msra.gmra.mrb[0].mxu1 %v148_v21 }
  0x23   :  { %596 = vmatpush3.bf16.msra.mxu0 %v653_v19  ;;  %616 = vmatpush3.bf16.msra.mxu1 %v654_v22 }
  0x24   :  { %597 = vmatprep.subr.bf16.mxu0 %v669_v0  ;;  %617 = vmatprep.subr.bf16.mxu1 %v669_v0 }
  0x25   :  { %611 = vmatprep.mubr.msk.bf16.mxu0 %vm670_vm0, %v669_v0  ;;  %631 = vmatprep.mubr.msk.bf16.mxu1 %vm670_vm0, %v669_v0 }
  0x27   :  { %598 = vmatpush3.bf16.msra.mxu0 %v655_v23  ;;  %618 = vmatpush3.bf16.msra.mxu1 %v656_v24 }
  0x28   :  { %599 = vmatprep.subr.bf16.mxu0 %v669_v0  ;;  %619 = vmatprep.subr.bf16.mxu1 %v669_v0 }
  0x2b   :  { %600 = vmatpush3.bf16.msra.mxu0 %v657_v25  ;;  %620 = vmatpush3.bf16.msra.mxu1 %v658_v26 }
  0x2c   :  { %601 = vmatprep.subr.bf16.mxu0 %v669_v0  ;;  %621 = vmatprep.subr.bf16.mxu1 %v669_v0 }
  0x2f   :  { %602 = vmatpush3.bf16.msra.mxu0 %v659_v27  ;;  %622 = vmatpush3.bf16.msra.mxu1 %v660_v28 }
  0x30   :  { %603 = vmatprep.subr.bf16.mxu0 %v669_v0  ;;  %623 = vmatprep.subr.bf16.mxu1 %v669_v0 }
  0x33   :  { %604 = vmatpush3.bf16.msra.mxu0 %v661_v29  ;;  %624 = vmatpush3.bf16.msra.mxu1 %v662_v30 }
  0x34   :  { %605 = vmatprep.subr.bf16.mxu0 %v669_v0  ;;  %625 = vmatprep.subr.bf16.mxu1 %v669_v0 }
  0x37   :  { %606 = vmatpush3.bf16.msra.mxu0 %v663_v31  ;;  %626 = vmatpush3.bf16.msra.mxu1 %v664_v32 }
  0x38   :  { %607 = vmatprep.subr.bf16.mxu0 %v669_v0  ;;  %627 = vmatprep.subr.bf16.mxu1 %v669_v0 }
  0x3b   :  { %608 = vmatpush3.bf16.msra.mxu0 %v665_v33  ;;  %628 = vmatpush3.bf16.msra.mxu1 %v666_v34 }
  0x3c   :  { %609 = vmatprep.subr.bf16.mxu0 %v669_v0  ;;  %629 = vmatprep.subr.bf16.mxu1 %v669_v0 }
  0x3f   :  { %610 = vmatpush3.bf16.msra.mxu0 %v667_v35  ;;  %630 = vmatpush3.bf16.msra.mxu1 %v668_v36 }
  0xf5   :  { %v140_v39 = vpop.f32.mrb[0].mxu0  ;;  %v254_v41 = vpop.f32.mrb[0].mxu1 }
  0xf6   :  { %v141_v40 = vadd.f32 %v484_v37, %v140_v39  ;;  %v573_v42 = vpop.f32.mrb[1].mxu0  ;;  %v255_v43 = vadd.f32 %v493_v38, %v254_v41  ;;  %v593_v44 = vpop.f32.mrb[1].mxu1 }
  0xf7   :  { %v143_v45 = vpop.f32.mrb[2].mxu0  ;;  %v257_v47 = vpop.f32.mrb[2].mxu1 }
  0xf8   :  { %v146_v46 = vmax.f32 %v141_v40, 0.0  ;;  %v574_v48 = vpop.f32.mrb[3].mxu0  ;;  %v260_v49 = vmax.f32 %v255_v43, 0.0  ;;  %v594_v50 = vpop.f32.mrb[3].mxu1 }
  0xfa   :  { %v261_v51 = vpack.c.bf16 %v146_v46, %v146_v46  ;;  %v278_v52 = vpack.c.bf16 %v260_v49, %v260_v49 }
  0xfc   :  { %632 = vmatmul.mubr.bf16.vlgmr.msra.gmra.mrb[4].mxu1 %v261_v51  ;;  %612 = vmatmul.mubr.bf16.vlgmr.msra.gmra.mrb[4].mxu0 %v278_v52 }
 0x1cf   :  { %v465_v53 = vpop.f32.mrb[4].mxu1  ;;  %v377_v54 = vpop.f32.mrb[4].mxu0 }
 0x1d0   :  { %v633_v56 = vpop.f32.mrb[5].mxu1  ;;  %v466_v57 = vadd.f32 %v465_v53, %v377_v54  ;;  %v613_v58 = vpop.f32.mrb[5].mxu0 }
 0x1d1   :  { %v468_v59 = vpop.f32.mrb[6].mxu1  ;;  %v380_v60 = vpop.f32.mrb[6].mxu0 }
 0x1d2   :  { %v634_v61 = vpop.f32.mrb[7].mxu1  ;;  %v478_v62 = vadd.f32 %v518_v55, %v466_v57  ;;  %v614_v63 = vpop.f32.mrb[7].mxu0 }
 0x1d4   :  { %479 = vst [vmem:[%s884_s9] sm:$0xff] %v478_v62 }

</bundles_post_ra>
